<compile_context>
chip_gen: v7x
topology: tpu7x:2x2x1
jax: 0.10.0
libtpu: 0.0.40
codegen_flags: <defaults>
</compile_context>

<pallas_src>
import functools

import jax
import jax.numpy as jnp
from jax.experimental import pallas as pl
from jax.experimental.pallas import tpu as pltpu

LEAKY_SLOPE = 0.01  # torch.nn.LeakyReLU default negative_slope


def _leaky_relu(x):
    # For 0 < slope < 1, LeakyReLU(x) == max(x, slope*x): mul+max (2 VPU ops)
    # instead of compare+select+mul (3 VPU ops).
    return jnp.maximum(x, LEAKY_SLOPE * x)


def _round_up(x, m):
    return ((x + m - 1) // m) * m


def _tpu_kind():
    try:
        return jax.devices()[0].device_kind.lower()
    except Exception:
        return ""


def _choose_batch_tile(batch):
    """Generation-aware batch tile (always a multiple of 128)."""
    kind = _tpu_kind()
    is_v7 = ("v7" in kind) or ("tpu7" in kind)
    # 128-row granule on v5e (128-wide MXU) and on v7x (so 2 TCs can split small
    # batches); 256 elsewhere (v6e/v4 256-wide MXU).
    granule = 128 if (is_v7 or "v5" in kind) else 256
    if is_v7 and batch > granule:
        # v7x has 2 TensorCores: aim for >= 2 grid steps so both get work.
        tile = min(512, max(granule, _round_up(pl.cdiv(batch, 2), granule)))
    else:
        # Single TC: the grid is a serial loop, so prefer one big MXU-friendly
        # tile and avoid per-step pipeline overhead.
        tile = min(512, _round_up(batch, granule))
    return tile


# ---------------------------------------------------------------------------
# Kernels
# ---------------------------------------------------------------------------

def _shared_hidden(hidden_dim, compute_dtype,
                   x_ref, w1c_ref, b1c_ref,
                   tw2_ref, tb2_ref, pw2_ref, pb2_ref):
    """Fused layer-1 (both nets share x) + per-net layer 2. Returns (g_t, g_p)."""
    # Layer 1 of both networks fused along N: one (tile, S) @ (S, 2H) matmul.
    h = jnp.dot(x_ref[...], w1c_ref[...], preferred_element_type=jnp.float32)
    # Bias add in f32, activation in the compute dtype (the cast is needed for
    # the next matmul anyway).
    h = _leaky_relu((h + b1c_ref[...]).astype(compute_dtype))
    h_t = h[:, :hidden_dim]       # target-network hidden
    h_p = h[:, hidden_dim:]       # predictor-network hidden

    g_t = jnp.dot(h_t, tw2_ref[...], preferred_element_type=jnp.float32)
    g_t = _leaky_relu((g_t + tb2_ref[...]).astype(compute_dtype))
    g_p = jnp.dot(h_p, pw2_ref[...], preferred_element_type=jnp.float32)
    g_p = _leaky_relu((g_p + pb2_ref[...]).astype(compute_dtype))
    return g_t, g_p


def rnd_forward_kernel(hidden_dim, compute_dtype,
                       x_ref, w1c_ref, b1c_ref,
                       tw2_ref, tb2_ref, pw2_ref, pb2_ref,
                       tw3_ref, tb3_ref, pw3_ref, pb3_ref,
                       rand_ref, pred_ref):
    g_t, g_p = _shared_hidden(hidden_dim, compute_dtype,
                              x_ref, w1c_ref, b1c_ref,
                              tw2_ref, tb2_ref, pw2_ref, pb2_ref)
    rand = jnp.dot(g_t, tw3_ref[...], preferred_element_type=jnp.float32) + tb3_ref[...]
    pred = jnp.dot(g_p, pw3_ref[...], preferred_element_type=jnp.float32) + pb3_ref[...]
    rand_ref[...] = rand.astype(rand_ref.dtype)
    pred_ref[...] = pred.astype(pred_ref.dtype)


def rnd_reward_kernel(hidden_dim, compute_dtype,
                      x_ref, w1c_ref, b1c_ref,
                      tw2_ref, tb2_ref, pw2_ref, pb2_ref,
                      ntw3_ref, pw3_ref, db3_ref,
                      sq_ref):
    g_t, g_p = _shared_hidden(hidden_dim, compute_dtype,
                              x_ref, w1c_ref, b1c_ref,
                              tw2_ref, tb2_ref, pw2_ref, pb2_ref)
    # (pred - rand) folded into layer 3: d = g_p @ pw3 + g_t @ (-tw3) + (pb3 - tb3)
    d = jnp.dot(g_p, pw3_ref[...], preferred_element_type=jnp.float32)
    d = d + jnp.dot(g_t, ntw3_ref[...], preferred_element_type=jnp.float32)
    d = d + db3_ref[...]
    sq = jnp.sum(d * d, axis=-1)              # (tile,) per-row squared norms
    # Lane-dense store: one (1, tile) row, no masked last-dim-1 partial stores.
    sq_ref[...] = sq.reshape(1, sq.shape[0])


# ---------------------------------------------------------------------------
# Parameters
# ---------------------------------------------------------------------------

def init_linear_params(key, in_dim, out_dim, dtype=jnp.float32):
    """torch.nn.Linear-style init, weight stored as [in_dim, out_dim]."""
    kw, kb = jax.random.split(key)
    bound = 1.0 / (in_dim ** 0.5)
    w = jax.random.uniform(kw, (in_dim, out_dim), dtype, minval=-bound, maxval=bound)
    b = jax.random.uniform(kb, (1, out_dim), dtype, minval=-bound, maxval=bound)
    return w, b


def make_rnd_params(key, state_dim, hidden_dim=256, s_latent_dim=128):
    keys = jax.random.split(key, 6)
    tw1, tb1 = init_linear_params(keys[0], state_dim, hidden_dim)
    tw2, tb2 = init_linear_params(keys[1], hidden_dim, hidden_dim)
    tw3, tb3 = init_linear_params(keys[2], hidden_dim, s_latent_dim)
    pw1, pb1 = init_linear_params(keys[3], state_dim, hidden_dim)
    pw2, pb2 = init_linear_params(keys[4], hidden_dim, hidden_dim)
    pw3, pb3 = init_linear_params(keys[5], hidden_dim, s_latent_dim)
    return (tw1, tb1, tw2, tb2, tw3, tb3, pw1, pb1, pw2, pb2, pw3, pb3)


def _pack_common(params, compute_dtype):
    (tw1, tb1, tw2, tb2, _tw3, _tb3, pw1, pb1, pw2, pb2, _pw3, _pb3) = params
    # Fuse the shared-input first layer of the two networks along N.
    w1c = jnp.concatenate([tw1, pw1], axis=1).astype(compute_dtype)
    b1c = jnp.concatenate([tb1, pb1], axis=1).astype(jnp.float32)
    return (w1c, b1c,
            tw2.astype(compute_dtype), tb2.astype(jnp.float32),
            pw2.astype(compute_dtype), pb2.astype(jnp.float32))


def _pack_forward(params, compute_dtype):
    (_tw1, _tb1, _tw2, _tb2, tw3, tb3, _pw1, _pb1, _pw2, _pb2, pw3, pb3) = params
    return _pack_common(params, compute_dtype) + (
        tw3.astype(compute_dtype), tb3.astype(jnp.float32),
        pw3.astype(compute_dtype), pb3.astype(jnp.float32))


def _pack_reward(params, compute_dtype):
    (_tw1, _tb1, _tw2, _tb2, tw3, tb3, _pw1, _pb1, _pw2, _pb2, pw3, pb3) = params
    # Fold (pred - rand) into the last layer: negate the target head, diff the bias.
    return _pack_common(params, compute_dtype) + (
        (-tw3).astype(compute_dtype),
        pw3.astype(compute_dtype),
        (pb3 - tb3).astype(jnp.float32))


# ---------------------------------------------------------------------------
# pallas_call wrappers
# ---------------------------------------------------------------------------

def _pallas_rnd_call(kernel_fn, out_shape, out_specs, x, packed, tile, state_dim):
    grid = (x.shape[0] // tile,)
    x_spec = pl.BlockSpec((tile, state_dim), lambda i: (i, 0))
    # Replicated params: full-extent blocks, constant index_map -> DMA'd once.
    rep_specs = [pl.BlockSpec(a.shape, lambda i: (0, 0)) for a in packed]
    return pl.pallas_call(
        kernel_fn,
        out_shape=out_shape,
        grid_spec=pltpu.PrefetchScalarGridSpec(
            num_scalar_prefetch=0,
            grid=grid,
            in_specs=[x_spec] + rep_specs,
            out_specs=out_specs,
        ),
        compiler_params=pltpu.CompilerParams(
            dimension_semantics=("parallel",),
            vmem_limit_bytes=32 * 1024 * 1024,
        ),
    )(x, *packed)


def _prep_input(next_state, tile, compute_dtype):
    B = next_state.shape[0]
    B_pad = _round_up(B, tile)
    x = next_state.astype(compute_dtype)          # cast once in the wrapper
    if B_pad != B:
        x = jnp.pad(x, ((0, B_pad - B), (0, 0)))
    return x, B, B_pad


@functools.partial(jax.jit, static_argnames=("batch_tile", "compute_dtype"))
def rnd_forward(next_state, params, *, batch_tile=None, compute_dtype=jnp.bfloat16):
    """Returns (random_phi_s_next, predicted_phi_s_next), each [B, s_latent_dim].

    Outputs are in `compute_dtype` (bf16 by default; pass jnp.float32 for an
    exact match with the PyTorch f32 reference).
    """
    B, state_dim = next_state.shape
    hidden_dim = params[2].shape[0]     # tw2: [hidden, hidden]
    s_latent_dim = params[4].shape[1]   # tw3: [hidden, s_latent]

    tile = _choose_batch_tile(B) if batch_tile is None else batch_tile
    x, B, B_pad = _prep_input(next_state, tile, compute_dtype)

    packed = _pack_forward(params, compute_dtype)
    kernel = functools.partial(rnd_forward_kernel, hidden_dim, compute_dtype)
    out_spec = pl.BlockSpec((tile, s_latent_dim), lambda i: (i, 0))
    rand, pred = _pallas_rnd_call(
        kernel,
        out_shape=(jax.ShapeDtypeStruct((B_pad, s_latent_dim), compute_dtype),
                   jax.ShapeDtypeStruct((B_pad, s_latent_dim), compute_dtype)),
        out_specs=(out_spec, out_spec),
        x=x, packed=packed, tile=tile, state_dim=state_dim)
    return rand[:B], pred[:B]


def _squared_dist(next_states, params, batch_tile, compute_dtype):
    """Per-row squared L2 norm of (pred - rand), fused in one kernel."""
    B, state_dim = next_states.shape
    hidden_dim = params[2].shape[0]

    tile = _choose_batch_tile(B) if batch_tile is None else batch_tile
    x, B, B_pad = _prep_input(next_states, tile, compute_dtype)

    packed = _pack_reward(params, compute_dtype)
    kernel = functools.partial(rnd_reward_kernel, hidden_dim, compute_dtype)
    # Lane-dense output: a single (1, B_pad) row; each grid step writes a
    # (1, tile) slab of lanes (no masked last-dim-1 stores).
    sq = _pallas_rnd_call(
        kernel,
        out_shape=jax.ShapeDtypeStruct((1, B_pad), jnp.float32),
        out_specs=pl.BlockSpec((1, tile), lambda i: (0, i)),
        x=x, packed=packed, tile=tile, state_dim=state_dim)
    return sq[0, :B]                     # drop exactly the zero-padded rows


@functools.partial(jax.jit, static_argnames=("batch_tile", "compute_dtype"))
def compute_intrinsic_reward(next_states, params, reward_scale=0.5, *,
                             batch_tile=None, compute_dtype=jnp.bfloat16):
    """Only B*4 bytes (per-row squared norms) leave the kernel."""
    sq = _squared_dist(next_states, params, batch_tile, compute_dtype)
    return reward_scale * jnp.sqrt(sq)
    # TODO(synk): the PyTorch version returns a host numpy array via .cpu();
    # here we return a device array and leave host transfer to the caller.


@functools.partial(jax.jit, static_argnames=("batch_tile", "compute_dtype"))
def compute_loss(next_states, params, *, batch_tile=None, compute_dtype=jnp.bfloat16):
    """mean_b || pred(x_b) - rand(x_b) ||_2 (forward value of the RND loss)."""
    sq = _squared_dist(next_states, params, batch_tile, compute_dtype)
    return jnp.mean(jnp.sqrt(sq))


def rnd_forward_ref(next_state, params):
    """Pure-JAX f32 reference of the PyTorch forward pass."""
    (tw1, tb1, tw2, tb2, tw3, tb3, pw1, pb1, pw2, pb2, pw3, pb3) = params

    def mlp(x, w1, b1, w2, b2, w3, b3):
        h = _leaky_relu(x @ w1 + b1)
        h = _leaky_relu(h @ w2 + b2)
        return h @ w3 + b3

    rand = mlp(next_state, tw1, tb1, tw2, tb2, tw3, tb3)
    pred = mlp(next_state, pw1, pb1, pw2, pb2, pw3, pb3)
    return rand, pred


if __name__ == "__main__":
    key = jax.random.PRNGKey(0)
    k_params, k_x, k_x2 = jax.random.split(key, 3)

    batch = 8
    state_dim = 32
    hidden_dim = 256
    s_latent_dim = 128

    params = make_rnd_params(k_params, state_dim, hidden_dim, s_latent_dim)
    next_state = jax.random.normal(k_x, (batch, state_dim), dtype=jnp.float32)

    rand_ref, pred_ref = rnd_forward_ref(next_state, params)

    # f32 compute path: tight match against the PyTorch-style reference.
    rand_f32, pred_f32 = jax.block_until_ready(
        rnd_forward(next_state, params, compute_dtype=jnp.float32))
    assert rand_f32.shape == (batch, s_latent_dim)
    assert pred_f32.shape == (batch, s_latent_dim)
    assert jnp.allclose(rand_f32, rand_ref, atol=1e-4, rtol=1e-4)
    assert jnp.allclose(pred_f32, pred_ref, atol=1e-4, rtol=1e-4)

    # Default bf16 path (bf16 in / bf16 matmuls / f32 accumulation / bf16 out).
    rand_bf, pred_bf = jax.block_until_ready(rnd_forward(next_state, params))
    assert rand_bf.dtype == jnp.bfloat16 and pred_bf.dtype == jnp.bfloat16
    assert jnp.allclose(rand_bf.astype(jnp.float32), rand_ref, atol=5e-2, rtol=5e-2)
    assert jnp.allclose(pred_bf.astype(jnp.float32), pred_ref, atol=5e-2, rtol=5e-2)

    # Non-divisible batch: exercises tile auto-choice and 128-granule padding.
    batch2 = 200
    next_state2 = jax.random.normal(k_x2, (batch2, state_dim), dtype=jnp.float32)
    rand2, pred2 = jax.block_until_ready(rnd_forward(next_state2, params))
    rand2_ref, pred2_ref = rnd_forward_ref(next_state2, params)
    assert rand2.shape == (batch2, s_latent_dim)
    assert pred2.shape == (batch2, s_latent_dim)
    assert jnp.allclose(rand2.astype(jnp.float32), rand2_ref, atol=5e-2, rtol=5e-2)
    assert jnp.allclose(pred2.astype(jnp.float32), pred2_ref, atol=5e-2, rtol=5e-2)

    # Fused intrinsic-reward kernel (lane-dense per-row squared norms).
    r_ref = 0.5 * jnp.linalg.norm(pred_ref - rand_ref, ord=2, axis=-1)
    r32 = jax.block_until_ready(
        compute_intrinsic_reward(next_state, params, compute_dtype=jnp.float32))
    assert r32.shape == (batch,)
    assert jnp.allclose(r32, r_ref, atol=1e-4, rtol=1e-4)
    r = jax.block_until_ready(compute_intrinsic_reward(next_state, params))
    assert r.shape == (batch,)
    assert jnp.allclose(r, r_ref, atol=5e-2, rtol=5e-2)

    # Forward value of the RND loss (reuses the fused reward kernel).
    loss = jax.block_until_ready(compute_loss(next_state, params))
    loss_ref = jnp.mean(jnp.linalg.norm(pred_ref - rand_ref, axis=-1))
    assert jnp.allclose(loss, loss_ref, atol=5e-2, rtol=5e-2)

    print("KERNEL_OK")
</pallas_src>

<mosaic_0001>
module attributes {stable_mosaic.version = 11 : i64} {
  func.func @rnd_forward_kernel(%arg0: i32, %arg1: memref<256x32xf32, #tpu.memory_space<vmem>>, %arg2: memref<32x512xf32, #tpu.memory_space<vmem>>, %arg3: memref<1x512xf32, #tpu.memory_space<vmem>>, %arg4: memref<256x256xf32, #tpu.memory_space<vmem>>, %arg5: memref<1x256xf32, #tpu.memory_space<vmem>>, %arg6: memref<256x256xf32, #tpu.memory_space<vmem>>, %arg7: memref<1x256xf32, #tpu.memory_space<vmem>>, %arg8: memref<256x128xf32, #tpu.memory_space<vmem>>, %arg9: memref<1x128xf32, #tpu.memory_space<vmem>>, %arg10: memref<256x128xf32, #tpu.memory_space<vmem>>, %arg11: memref<1x128xf32, #tpu.memory_space<vmem>>, %arg12: memref<256x128xf32, #tpu.memory_space<vmem>>, %arg13: memref<256x128xf32, #tpu.memory_space<vmem>>) attributes {dimension_semantics = [#tpu.dimension_semantics<parallel>], iteration_bounds = array<i64: 1>, scalar_prefetch = 0 : i64, scratch_operands = 0 : i64, tpu.core_type = #tpu.core_type<tc>, window_params = [{transform_indices = @transform_0, window_bounds = array<i64: 256, 32>}, {pipeline_mode = #tpu.pipeline_mode<synchronous>, transform_indices = @transform_1, window_bounds = array<i64: 32, 512>}, {pipeline_mode = #tpu.pipeline_mode<synchronous>, transform_indices = @transform_2, window_bounds = array<i64: 1, 512>}, {pipeline_mode = #tpu.pipeline_mode<synchronous>, transform_indices = @transform_3, window_bounds = array<i64: 256, 256>}, {pipeline_mode = #tpu.pipeline_mode<synchronous>, transform_indices = @transform_4, window_bounds = array<i64: 1, 256>}, {pipeline_mode = #tpu.pipeline_mode<synchronous>, transform_indices = @transform_5, window_bounds = array<i64: 256, 256>}, {pipeline_mode = #tpu.pipeline_mode<synchronous>, transform_indices = @transform_6, window_bounds = array<i64: 1, 256>}, {pipeline_mode = #tpu.pipeline_mode<synchronous>, transform_indices = @transform_7, window_bounds = array<i64: 256, 128>}, {pipeline_mode = #tpu.pipeline_mode<synchronous>, transform_indices = @transform_8, window_bounds = array<i64: 1, 128>}, {pipeline_mode = #tpu.pipeline_mode<synchronous>, transform_indices = @transform_9, window_bounds = array<i64: 256, 128>}, {pipeline_mode = #tpu.pipeline_mode<synchronous>, transform_indices = @transform_10, window_bounds = array<i64: 1, 128>}, {transform_indices = @transform_11, window_bounds = array<i64: 256, 128>}, {transform_indices = @transform_12, window_bounds = array<i64: 256, 128>}]} {
    %c0 = arith.constant 0 : index
    %c0_0 = arith.constant 0 : index
    %0 = vector.load %arg1[%c0, %c0_0] : memref<256x32xf32, #tpu.memory_space<vmem>>, vector<256x32xf32>
    %c0_1 = arith.constant 0 : index
    %c0_2 = arith.constant 0 : index
    %1 = vector.load %arg2[%c0_1, %c0_2] : memref<32x512xf32, #tpu.memory_space<vmem>>, vector<32x512xf32>
    %cst = arith.constant dense<0.000000e+00> : vector<256x512xf32>
    %2 = tpu.matmul %0, %1, %cst {dimension_numbers = #tpu.dot_dimension_numbers<[1], [0], [0], [1], [0, 0, 1, 1], [], []>} : vector<256x32xf32>, vector<32x512xf32>, vector<256x512xf32> -> vector<256x512xf32>
    %c0_3 = arith.constant 0 : index
    %c0_4 = arith.constant 0 : index
    %3 = vector.load %arg3[%c0_3, %c0_4] : memref<1x512xf32, #tpu.memory_space<vmem>>, vector<1x512xf32>
    %4 = vector.broadcast %3 : vector<1x512xf32> to vector<256x512xf32>
    %5 = arith.addf %2, %4 : vector<256x512xf32>
    %cst_5 = arith.constant 0.00999999977 : f32
    %6 = vector.broadcast %cst_5 : f32 to vector<256x512xf32>
    %7 = arith.mulf %6, %5 : vector<256x512xf32>
    %8 = arith.maximumf %5, %7 : vector<256x512xf32>
    %9 = vector.extract_strided_slice %8 {offsets = [0, 0], sizes = [256, 256], strides = [1, 1]} : vector<256x512xf32> to vector<256x256xf32>
    %10 = vector.extract_strided_slice %8 {offsets = [0, 256], sizes = [256, 256], strides = [1, 1]} : vector<256x512xf32> to vector<256x256xf32>
    %c0_6 = arith.constant 0 : index
    %c0_7 = arith.constant 0 : index
    %11 = vector.load %arg4[%c0_6, %c0_7] : memref<256x256xf32, #tpu.memory_space<vmem>>, vector<256x256xf32>
    %cst_8 = arith.constant dense<0.000000e+00> : vector<256x256xf32>
    %12 = tpu.matmul %9, %11, %cst_8 {dimension_numbers = #tpu.dot_dimension_numbers<[1], [0], [0], [1], [0, 0, 1, 1], [], []>} : vector<256x256xf32>, vector<256x256xf32>, vector<256x256xf32> -> vector<256x256xf32>
    %c0_9 = arith.constant 0 : index
    %c0_10 = arith.constant 0 : index
    %13 = vector.load %arg5[%c0_9, %c0_10] : memref<1x256xf32, #tpu.memory_space<vmem>>, vector<1x256xf32>
    %14 = vector.broadcast %13 : vector<1x256xf32> to vector<256x256xf32>
    %15 = arith.addf %12, %14 : vector<256x256xf32>
    %cst_11 = arith.constant 0.00999999977 : f32
    %16 = vector.broadcast %cst_11 : f32 to vector<256x256xf32>
    %17 = arith.mulf %16, %15 : vector<256x256xf32>
    %18 = arith.maximumf %15, %17 : vector<256x256xf32>
    %c0_12 = arith.constant 0 : index
    %c0_13 = arith.constant 0 : index
    %19 = vector.load %arg6[%c0_12, %c0_13] : memref<256x256xf32, #tpu.memory_space<vmem>>, vector<256x256xf32>
    %cst_14 = arith.constant dense<0.000000e+00> : vector<256x256xf32>
    %20 = tpu.matmul %10, %19, %cst_14 {dimension_numbers = #tpu.dot_dimension_numbers<[1], [0], [0], [1], [0, 0, 1, 1], [], []>} : vector<256x256xf32>, vector<256x256xf32>, vector<256x256xf32> -> vector<256x256xf32>
    %c0_15 = arith.constant 0 : index
    %c0_16 = arith.constant 0 : index
    %21 = vector.load %arg7[%c0_15, %c0_16] : memref<1x256xf32, #tpu.memory_space<vmem>>, vector<1x256xf32>
    %22 = vector.broadcast %21 : vector<1x256xf32> to vector<256x256xf32>
    %23 = arith.addf %20, %22 : vector<256x256xf32>
    %cst_17 = arith.constant 0.00999999977 : f32
    %24 = vector.broadcast %cst_17 : f32 to vector<256x256xf32>
    %25 = arith.mulf %24, %23 : vector<256x256xf32>
    %26 = arith.maximumf %23, %25 : vector<256x256xf32>
    %c0_18 = arith.constant 0 : index
    %c0_19 = arith.constant 0 : index
    %27 = vector.load %arg8[%c0_18, %c0_19] : memref<256x128xf32, #tpu.memory_space<vmem>>, vector<256x128xf32>
    %cst_20 = arith.constant dense<0.000000e+00> : vector<256x128xf32>
    %28 = tpu.matmul %18, %27, %cst_20 {dimension_numbers = #tpu.dot_dimension_numbers<[1], [0], [0], [1], [0, 0, 1, 1], [], []>} : vector<256x256xf32>, vector<256x128xf32>, vector<256x128xf32> -> vector<256x128xf32>
    %c0_21 = arith.constant 0 : index
    %c0_22 = arith.constant 0 : index
    %29 = vector.load %arg9[%c0_21, %c0_22] : memref<1x128xf32, #tpu.memory_space<vmem>>, vector<1x128xf32>
    %30 = vector.broadcast %29 : vector<1x128xf32> to vector<256x128xf32>
    %31 = arith.addf %28, %30 : vector<256x128xf32>
    %c0_23 = arith.constant 0 : index
    %c0_24 = arith.constant 0 : index
    %32 = vector.load %arg10[%c0_23, %c0_24] : memref<256x128xf32, #tpu.memory_space<vmem>>, vector<256x128xf32>
    %cst_25 = arith.constant dense<0.000000e+00> : vector<256x128xf32>
    %33 = tpu.matmul %26, %32, %cst_25 {dimension_numbers = #tpu.dot_dimension_numbers<[1], [0], [0], [1], [0, 0, 1, 1], [], []>} : vector<256x256xf32>, vector<256x128xf32>, vector<256x128xf32> -> vector<256x128xf32>
    %c0_26 = arith.constant 0 : index
    %c0_27 = arith.constant 0 : index
    %34 = vector.load %arg11[%c0_26, %c0_27] : memref<1x128xf32, #tpu.memory_space<vmem>>, vector<1x128xf32>
    %35 = vector.broadcast %34 : vector<1x128xf32> to vector<256x128xf32>
    %36 = arith.addf %33, %35 : vector<256x128xf32>
    %c0_28 = arith.constant 0 : index
    %c0_29 = arith.constant 0 : index
    %37 = vector.load %arg12[%c0_28, %c0_29] : memref<256x128xf32, #tpu.memory_space<vmem>>, vector<256x128xf32>
    tpu.vector_store %arg12[%c0_28, %c0_29], %31 {strides = array<i32>} : memref<256x128xf32, #tpu.memory_space<vmem>>, vector<256x128xf32>,
    %c0_30 = arith.constant 0 : index
    %c0_31 = arith.constant 0 : index
    %38 = vector.load %arg13[%c0_30, %c0_31] : memref<256x128xf32, #tpu.memory_space<vmem>>, vector<256x128xf32>
    tpu.vector_store %arg13[%c0_30, %c0_31], %36 {strides = array<i32>} : memref<256x128xf32, #tpu.memory_space<vmem>>, vector<256x128xf32>,
    return
  }
  func.func @transform_0(%arg0: i32) -> (i32, i32) {
    %c0_i32 = arith.constant 0 : i32
    %c0_i32_0 = arith.constant 0 : i32
    return %arg0, %c0_i32 : i32, i32
  }
  func.func @transform_1(%arg0: i32) -> (i32, i32) {
    %c0_i32 = arith.constant 0 : i32
    %c0_i32_0 = arith.constant 0 : i32
    %c0_i32_1 = arith.constant 0 : i32
    return %c0_i32, %c0_i32_0 : i32, i32
  }
  func.func @transform_2(%arg0: i32) -> (i32, i32) {
    %c0_i32 = arith.constant 0 : i32
    %c0_i32_0 = arith.constant 0 : i32
    %c0_i32_1 = arith.constant 0 : i32
    return %c0_i32, %c0_i32_0 : i32, i32
  }
  func.func @transform_3(%arg0: i32) -> (i32, i32) {
    %c0_i32 = arith.constant 0 : i32
    %c0_i32_0 = arith.constant 0 : i32
    %c0_i32_1 = arith.constant 0 : i32
    return %c0_i32, %c0_i32_0 : i32, i32
  }
  func.func @transform_4(%arg0: i32) -> (i32, i32) {
    %c0_i32 = arith.constant 0 : i32
    %c0_i32_0 = arith.constant 0 : i32
    %c0_i32_1 = arith.constant 0 : i32
    return %c0_i32, %c0_i32_0 : i32, i32
  }
  func.func @transform_5(%arg0: i32) -> (i32, i32) {
    %c0_i32 = arith.constant 0 : i32
    %c0_i32_0 = arith.constant 0 : i32
    %c0_i32_1 = arith.constant 0 : i32
    return %c0_i32, %c0_i32_0 : i32, i32
  }
  func.func @transform_6(%arg0: i32) -> (i32, i32) {
    %c0_i32 = arith.constant 0 : i32
    %c0_i32_0 = arith.constant 0 : i32
    %c0_i32_1 = arith.constant 0 : i32
    return %c0_i32, %c0_i32_0 : i32, i32
  }
  func.func @transform_7(%arg0: i32) -> (i32, i32) {
    %c0_i32 = arith.constant 0 : i32
    %c0_i32_0 = arith.constant 0 : i32
    %c0_i32_1 = arith.constant 0 : i32
    return %c0_i32, %c0_i32_0 : i32, i32
  }
  func.func @transform_8(%arg0: i32) -> (i32, i32) {
    %c0_i32 = arith.constant 0 : i32
    %c0_i32_0 = arith.constant 0 : i32
    %c0_i32_1 = arith.constant 0 : i32
    return %c0_i32, %c0_i32_0 : i32, i32
  }
  func.func @transform_9(%arg0: i32) -> (i32, i32) {
    %c0_i32 = arith.constant 0 : i32
    %c0_i32_0 = arith.constant 0 : i32
    %c0_i32_1 = arith.constant 0 : i32
    return %c0_i32, %c0_i32_0 : i32, i32
  }
  func.func @transform_10(%arg0: i32) -> (i32, i32) {
    %c0_i32 = arith.constant 0 : i32
    %c0_i32_0 = arith.constant 0 : i32
    %c0_i32_1 = arith.constant 0 : i32
    return %c0_i32, %c0_i32_0 : i32, i32
  }
  func.func @transform_11(%arg0: i32) -> (i32, i32) {
    %c0_i32 = arith.constant 0 : i32
    %c0_i32_0 = arith.constant 0 : i32
    return %arg0, %c0_i32 : i32, i32
  }
  func.func @transform_12(%arg0: i32) -> (i32, i32) {
    %c0_i32 = arith.constant 0 : i32
    %c0_i32_0 = arith.constant 0 : i32
    return %arg0, %c0_i32 : i32, i32
  }
}

</mosaic_0001>

<bundles_post_ra>
// kernel: rnd_forward.1
= control target key start
LH: loop header
LB: loop body
LE: loop exit
PB: predicated region body
PF: predicated region fallthrough
CT: control target
= control target key end

     0   :  { %18 = vsyncpa [#allocation3], 0  ;;  %s4096_s0 = inlined_call_operand.vmem [shape: f32[256,32], index: 0, kind: input, shape index: {}]   ;;  %s4097_s1 = inlined_call_operand.vmem [shape: f32[32,512], index: 1, kind: input, shape index: {}]   ;;  %s4098_s2 = inlined_call_operand.vmem [shape: f32[1,512], index: 2, kind: input, shape index: {}]   ;;  %s4099_s3 = inlined_call_operand.vmem [shape: f32[256,256], index: 3, kind: input, shape index: {}]   ;;  %s4100_s4 = inlined_call_operand.vmem [shape: f32[1,256], index: 4, kind: input, shape index: {}]   ;;  %s4101_s5 = inlined_call_operand.hbm [shape: f32[256,256], index: 5, kind: input, shape index: {}]   ;;  %s4102_s6 = inlined_call_operand.vmem [shape: f32[1,256], index: 6, kind: input, shape index: {}]   ;;  %s4103_s7 = inlined_call_operand.hbm [shape: f32[256,128], index: 7, kind: input, shape index: {}]   ;;  %s4104_s8 = inlined_call_operand.vmem [shape: f32[1,128], index: 8, kind: input, shape index: {}]   ;;  %s4105_s9 = inlined_call_operand.hbm [shape: f32[256,128], index: 9, kind: input, shape index: {}]   ;;  %s4106_s10 = inlined_call_operand.vmem [shape: f32[1,128], index: 10, kind: input, shape index: {}]   ;;  %s4107_s11 = inlined_call_operand.vmem [shape: f32[256,128], index: 11, kind: output, shape index: {0}]   ;;  %s4108_s12 = inlined_call_operand.vmem [shape: f32[256,128], index: 12, kind: output, shape index: {1}]  }
   0x1   :  { %19 = vsyncpa [#allocation5], 0  ;;  %s2927_s21 = smov [#allocation4]   ;;  %s2857_s25 = scalar_lea.hbm %s4103_s7, 4096 }
   0x2   :  { %s49_s22 = sshll.u32 %s2927_s21, 4  ;;  %p2858_p0 = scmp.ne.s32.totalorder %s4103_s7, %s2857_s25  ;;  %s50_s22 = int_to_ptr.vmem [resolvable:$true] %s49_s22 }
   0x3   :  { %p2861_p1 = scmp.lt.u32.totalorder %s2857_s25, %s4103_s7 }
   0x5   :  { %p2863_p2 = pnand %p2861_p1, %p2858_p0 }
   0x7   :  { %2866 = shalt.err (!%p2863_p2)
}
   0x8   :  { %s2867_s30 = scalar_lea.vmem %s50_s22, 4096  ;;  %p2872_p4 = scmp.lt.s32.totalorder %s50_s22, %s50_s22 }
   0x9   :  { %p2868_p3 = scmp.ne.s32.totalorder %s50_s22, %s2867_s30  ;;  %p2873_p5 = scmp.lt.s32.totalorder %s2867_s30, %s2867_s30 }
   0xb   :  { %p2874_p6 = por %p2873_p5, %p2872_p4 }
   0xd   :  { %p2875_p7 = pnand %p2874_p6, %p2868_p3 }
   0xf   :  { %2878 = shalt.err (!%p2875_p7)
}
  0x10   :  { %s2928_s13 = smov 128   ;;  %s2929_s14 = smov 8  }
  0x11   :  { %55 = dma.hbm_to_vmem [thread:$0]  %s4103_s7, 4096, %s50_s22, [#allocation5], %s2928_s13, %s2928_s13, %s2929_s14  }
  0x12   :  { %s2930_s17 = smov [#allocation2]   ;;  %s2879_s21 = scalar_lea.hbm %s4101_s5, 8192 }
  0x13   :  { %s35_s18 = sshll.u32 %s2930_s17, 4  ;;  %p2880_p8 = scmp.ne.s32.totalorder %s4101_s5, %s2879_s21  ;;  %s36_s18 = int_to_ptr.vmem [resolvable:$true] %s35_s18 }
  0x14   :  { %p2883_p9 = scmp.lt.u32.totalorder %s2879_s21, %s4101_s5 }
  0x16   :  { %p2885_p10 = pnand %p2883_p9, %p2880_p8 }
  0x18   :  { %2888 = shalt.err (!%p2885_p10)
}
  0x19   :  { %s2889_s27 = scalar_lea.vmem %s36_s18, 8192  ;;  %p2894_p12 = scmp.lt.s32.totalorder %s36_s18, %s36_s18 }
  0x1a   :  { %p2890_p11 = scmp.ne.s32.totalorder %s36_s18, %s2889_s27  ;;  %p2895_p13 = scmp.lt.s32.totalorder %s2889_s27, %s2889_s27 }
  0x1c   :  { %p2896_p0 = por %p2895_p13, %p2894_p12 }
  0x1e   :  { %p2897_p1 = pnand %p2896_p0, %p2890_p11 }
  0x20   :  { %2900 = shalt.err (!%p2897_p1)
}
  0x21   :  { %s2931_s7 = smov 256   ;;  %s2932_s22 = smov 16  }
  0x22   :  { %41 = dma.hbm_to_vmem [thread:$0]  %s4101_s5, 8192, %s36_s18, [#allocation3], %s2931_s7, %s2931_s7, %s2932_s22  }
  0x23   :  { %s2933_s30 = smov [#allocation6]   ;;  %s2901_s19 = scalar_lea.hbm %s4105_s9, 4096 }
  0x24   :  { %s63_s15 = sshll.u32 %s2933_s30, 4  ;;  %p2902_p2 = scmp.ne.s32.totalorder %s4105_s9, %s2901_s19  ;;  %s64_s15 = int_to_ptr.vmem [resolvable:$true] %s63_s15 }
  0x25   :  { %p2905_p3 = scmp.lt.u32.totalorder %s2901_s19, %s4105_s9 }
  0x27   :  { %p2907_p4 = pnand %p2905_p3, %p2902_p2 }
  0x29   :  { %2910 = shalt.err (!%p2907_p4)
}
  0x2a   :  { %s2911_s25 = scalar_lea.vmem %s64_s15, 4096  ;;  %p2916_p6 = scmp.lt.s32.totalorder %s64_s15, %s64_s15 }
  0x2b   :  { %p2912_p5 = scmp.ne.s32.totalorder %s64_s15, %s2911_s25  ;;  %p2917_p7 = scmp.lt.s32.totalorder %s2911_s25, %s2911_s25 }
  0x2d   :  { %p2918_p8 = por %p2917_p7, %p2916_p6 }
  0x2f   :  { %p2919_p9 = pnand %p2918_p8, %p2912_p5 }
  0x31   :  { %2922 = shalt.err (!%p2919_p9)
}
  0x32   :  { %69 = dma.hbm_to_vmem [thread:$0]  %s4105_s9, 4096, %s64_s15, [#allocation5], %s2928_s13, %s2928_s13, %s2929_s14  }
  0x33   :  { %2923 = dma.done.wait [#allocation3], 8192  }
  0x34   :  { %2924 = vsyncadd [#allocation3], 4294959104 }
  0x35   :  { %2925 = dma.done.wait [#allocation5], 8192  }
  0x36   :  { %2926 = vsyncadd [#allocation5], 4294959104  ;;  %v2934_v0 = vmov 0.0   ;;  %v114_v1 = vld [vmem:[%s4097_s1 + $0x8] sm:$0xff]  ;;  %v116_v3 = vld [vmem:[%s4097_s1 + $0x18] sm:$0xff]  ;;  %vm151_vm0 = vcmask 261120  }
  0x37   :  { %312 = vmatprep.mubr.f32.mxu0 %v2934_v0  ;;  %569 = vmatprep.mubr.f32.mxu1 %v2934_v0  ;;  %v118_v2 = vld [vmem:[%s4097_s1 + $0x28] sm:$0xff]  ;;  %v120_v5 = vld [vmem:[%s4097_s1 + $0x38] sm:$0xff]  ;;  %v113_v6 = vld [vmem:[%s4097_s1] sm:$0xff] }
  0x38   :  { %v2608_v4 = vpack.c.bf16 %v118_v2, %v114_v1  ;;  %v117_v7 = vld [vmem:[%s4097_s1 + $0x20] sm:$0xff]  ;;  %v2616_v8 = vpack.c.bf16 %v120_v5, %v116_v3  ;;  %v115_v10 = vld [vmem:[%s4097_s1 + $0x10] sm:$0xff]  ;;  %v122_v12 = vld [vmem:[%s4097_s1 + $0x48] sm:$0xff] }
  0x39   :  { %v2610_v9 = vpack.c.bf16 %v117_v7, %v113_v6  ;;  %v119_v11 = vld [vmem:[%s4097_s1 + $0x30] sm:$0xff]  ;;  %v126_v14 = vld [vmem:[%s4097_s1 + $0x68] sm:$0xff]  ;;  %v124_v15 = vld [vmem:[%s4097_s1 + $0x58] sm:$0xff] }
  0x3a   :  { %2609 = vmatprep.subr.bf16.mxu0 %v2608_v4  ;;  %v2618_v13 = vpack.c.bf16 %v119_v11, %v115_v10  ;;  %v128_v16 = vld [vmem:[%s4097_s1 + $0x78] sm:$0xff]  ;;  %2617 = vmatprep.subr.bf16.mxu1 %v2616_v8  ;;  %v2612_v17 = vpack.c.bf16 %v126_v14, %v122_v12  ;;  %v121_v19 = vld [vmem:[%s4097_s1 + $0x40] sm:$0xff]  ;;  %v123_v21 = vld [vmem:[%s4097_s1 + $0x50] sm:$0xff] }
  0x3b   :  { %2611 = vmatpush1.bf16.msra.mxu0 %v2610_v9  ;;  %v2620_v18 = vpack.c.bf16 %v128_v16, %v124_v15  ;;  %v125_v20 = vld [vmem:[%s4097_s1 + $0x60] sm:$0xff]  ;;  %v127_v23 = vld [vmem:[%s4097_s1 + $0x70] sm:$0xff]  ;;  %v82_v26 = vld [vmem:[%s4096_s0 + $0x8] sm:$0xff] }
  0x3c   :  { %2619 = vmatpush1.bf16.msra.mxu1 %v2618_v13  ;;  %v2614_v22 = vpack.c.bf16 %v125_v20, %v121_v19  ;;  %2613 = vmatprep.subr.bf16.mxu0 %v2612_v17  ;;  %v2622_v24 = vpack.c.bf16 %v127_v23, %v123_v21  ;;  %v81_v25 = vld [vmem:[%s4096_s0] sm:$0xff]  ;;  %v1019_v27 = vld [vmem:[%s4099_s3 + $0x8] sm:$0xff]  ;;  %v1021_v28 = vld [vmem:[%s4099_s3 + $0x18] sm:$0xff] }
  0x3d   :  { %2621 = vmatprep.subr.bf16.mxu1 %v2620_v18  ;;  %v1480_v29 = vld [vmem:[#allocation2 + $0x8] sm:$0xff]  ;;  %v2624_v30 = vpack.c.bf16 %v1021_v28, %v1019_v27  ;;  %v1482_v31 = vld [vmem:[#allocation2 + $0x18] sm:$0xff]  ;;  %v1018_v32 = vld [vmem:[%s4099_s3] sm:$0xff] }
  0x3e   :  { %v2688_v33 = vpack.c.bf16 %v1482_v31, %v1480_v29  ;;  %v1020_v34 = vld [vmem:[%s4099_s3 + $0x10] sm:$0xff]  ;;  %v1479_v35 = vld [vmem:[#allocation2] sm:$0xff]  ;;  %v1023_v40 = vld [vmem:[%s4099_s3 + $0x28] sm:$0xff] }
  0x3f   :  { %2615 = vmatpush1.bf16.msra.mxu0 %v2614_v22  ;;  %v1481_v36 = vld [vmem:[#allocation2 + $0x10] sm:$0xff]  ;;  %v2626_v38 = vpack.c.bf16 %v1020_v34, %v1018_v32  ;;  %v1025_v41 = vld [vmem:[%s4099_s3 + $0x38] sm:$0xff]  ;;  %v1484_v43 = vld [vmem:[#allocation2 + $0x28] sm:$0xff] }
  0x40   :  { %2623 = vmatpush1.bf16.msra.mxu1 %v2622_v24  ;;  %v83_v37 = vld [vmem:[%s4096_s0 + $0x10] sm:$0xff]  ;;  %v2690_v39 = vpack.c.bf16 %v1481_v36, %v1479_v35  ;;  %2625 = vmatprep.subr.bf16.mxu0 %v2624_v30  ;;  %v2628_v42 = vpack.c.bf16 %v1025_v41, %v1023_v40  ;;  %v1486_v44 = vld [vmem:[#allocation2 + $0x38] sm:$0xff]  ;;  %v1022_v46 = vld [vmem:[%s4099_s3 + $0x20] sm:$0xff] }
  0x41   :  { %2689 = vmatprep.subr.bf16.mxu1 %v2688_v33  ;;  %v2692_v45 = vpack.c.bf16 %v1486_v44, %v1484_v43  ;;  %v1024_v47 = vld [vmem:[%s4099_s3 + $0x30] sm:$0xff]  ;;  %v1483_v48 = vld [vmem:[#allocation2 + $0x20] sm:$0xff]  ;;  %v84_v49 = vld [vmem:[%s4096_s0 + $0x18] sm:$0xff] }
  0x42   :  { %2542 = vmatmul.mubr.msk.f32.vlgmr.msra.gmra.mrb[0].mxu0 %vm151_vm0, %v81_v25  ;;  %v2630_v50 = vpack.c.bf16 %v1024_v47, %v1022_v46  ;;  %v1485_v51 = vld [vmem:[#allocation2 + $0x30] sm:$0xff]  ;;  %v1027_v52 = vld [vmem:[%s4099_s3 + $0x48] sm:$0xff]  ;;  %v1029_v54 = vld [vmem:[%s4099_s3 + $0x58] sm:$0xff] }
  0x43   :  { %2574 = vmatmul.mubr.msk.f32.vlgmr.msra.gmra.mrb[0].mxu1 %vm151_vm0, %v81_v25  ;;  %318 = vmatprep.mubr.f32.mxu0 %v2934_v0  ;;  %v2694_v53 = vpack.c.bf16 %v1485_v51, %v1483_v48  ;;  %v1488_v55 = vld [vmem:[#allocation2 + $0x48] sm:$0xff]  ;;  %v1490_v56 = vld [vmem:[#allocation2 + $0x58] sm:$0xff]  ;;  %v2632_v57 = vpack.c.bf16 %v1029_v54, %v1027_v52  ;;  %v1026_v58 = vld [vmem:[%s4099_s3 + $0x40] sm:$0xff] }
  0x44   :  { %575 = vmatprep.mubr.f32.mxu1 %v2934_v0  ;;  %2627 = vmatpush1.bf16.msra.mxu0 %v2626_v38  ;;  %v1028_v59 = vld [vmem:[%s4099_s3 + $0x50] sm:$0xff]  ;;  %v2696_v60 = vpack.c.bf16 %v1490_v56, %v1488_v55  ;;  %v1487_v62 = vld [vmem:[#allocation2 + $0x40] sm:$0xff]  ;;  %v1031_v2 = vld [vmem:[%s4099_s3 + $0x68] sm:$0xff] }
  0x45   :  { %2691 = vmatpush1.bf16.msra.mxu1 %v2690_v39  ;;  %2629 = vmatprep.subr.bf16.mxu0 %v2628_v42  ;;  %v2634_v61 = vpack.c.bf16 %v1028_v59, %v1026_v58  ;;  %v1489_v63 = vld [vmem:[#allocation2 + $0x50] sm:$0xff]  ;;  %v1033_v3 = vld [vmem:[%s4099_s3 + $0x78] sm:$0xff]  ;;  %v1492_v4 = vld [vmem:[#allocation2 + $0x68] sm:$0xff] }
  0x46   :  { %2543 = vmatmul.mubr.msk.f32.gmra.mrb[2].mxu0 %vm151_vm0, %v82_v26  ;;  %2693 = vmatprep.subr.bf16.mxu1 %v2692_v45  ;;  %v2698_v1 = vpack.c.bf16 %v1489_v63, %v1487_v62  ;;  %v85_v5 = vld [vmem:[%s4096_s0 + $0x20] sm:$0xff]  ;;  %v1494_v6 = vld [vmem:[#allocation2 + $0x78] sm:$0xff]  ;;  %v2636_v8 = vpack.c.bf16 %v1033_v3, %v1031_v2  ;;  %v1032_v9 = vld [vmem:[%s4099_s3 + $0x70] sm:$0xff] }
  0x47   :  { %2575 = vmatmul.mubr.msk.f32.gmra.mrb[2].mxu1 %vm151_vm0, %v82_v26  ;;  %324 = vmatprep.mubr.f32.mxu0 %v2934_v0  ;;  %v1030_v7 = vld [vmem:[%s4099_s3 + $0x60] sm:$0xff]  ;;  %v1493_v11 = vld [vmem:[#allocation2 + $0x70] sm:$0xff]  ;;  %v2700_v12 = vpack.c.bf16 %v1494_v6, %v1492_v4  ;;  %v1035_v14 = vld [vmem:[%s4099_s3 + $0x88] sm:$0xff] }
  0x48   :  { %581 = vmatprep.mubr.f32.mxu1 %v2934_v0  ;;  %2631 = vmatpush1.bf16.msra.mxu0 %v2630_v50  ;;  %v1491_v10 = vld [vmem:[#allocation2 + $0x60] sm:$0xff]  ;;  %v2638_v13 = vpack.c.bf16 %v1032_v9, %v1030_v7  ;;  %v1037_v15 = vld [vmem:[%s4099_s3 + $0x98] sm:$0xff]  ;;  %v86_v16 = vld [vmem:[%s4096_s0 + $0x28] sm:$0xff] }
  0x49   :  { %2695 = vmatpush1.bf16.msra.mxu1 %v2694_v53  ;;  %2633 = vmatprep.subr.bf16.mxu0 %v2632_v57  ;;  %v2702_v17 = vpack.c.bf16 %v1493_v11, %v1491_v10  ;;  %v1496_v18 = vld [vmem:[#allocation2 + $0x88] sm:$0xff]  ;;  %v1498_v19 = vld [vmem:[#allocation2 + $0x98] sm:$0xff]  ;;  %v1034_v20 = vld [vmem:[%s4099_s3 + $0x80] sm:$0xff]  ;;  %v2640_v23 = vpack.c.bf16 %v1037_v15, %v1035_v14 }
  0x4a   :  { %2544 = vmatmul.mubr.msk.f32.gmra.mrb[4].mxu0 %vm151_vm0, %v83_v37  ;;  %2697 = vmatprep.subr.bf16.mxu1 %v2696_v60  ;;  %v1036_v21 = vld [vmem:[%s4099_s3 + $0x90] sm:$0xff]  ;;  %v1495_v22 = vld [vmem:[#allocation2 + $0x80] sm:$0xff]  ;;  %v2704_v25 = vpack.c.bf16 %v1498_v19, %v1496_v18  ;;  %v1039_v27 = vld [vmem:[%s4099_s3 + $0xa8] sm:$0xff] }
  0x4b   :  { %2576 = vmatmul.mubr.msk.f32.gmra.mrb[4].mxu1 %vm151_vm0, %v83_v37  ;;  %330 = vmatprep.mubr.f32.mxu0 %v2934_v0  ;;  %v1497_v24 = vld [vmem:[#allocation2 + $0x90] sm:$0xff]  ;;  %v2642_v26 = vpack.c.bf16 %v1036_v21, %v1034_v20  ;;  %v1041_v28 = vld [vmem:[%s4099_s3 + $0xb8] sm:$0xff]  ;;  %v1500_v29 = vld [vmem:[#allocation2 + $0xa8] sm:$0xff] }
  0x4c   :  { %587 = vmatprep.mubr.f32.mxu1 %v2934_v0  ;;  %2635 = vmatpush1.bf16.msra.mxu0 %v2634_v61  ;;  %v2706_v30 = vpack.c.bf16 %v1497_v24, %v1495_v22  ;;  %v1502_v31 = vld [vmem:[#allocation2 + $0xb8] sm:$0xff]  ;;  %v1038_v32 = vld [vmem:[%s4099_s3 + $0xa0] sm:$0xff]  ;;  %v1040_v33 = vld [vmem:[%s4099_s3 + $0xb0] sm:$0xff]  ;;  %v2644_v37 = vpack.c.bf16 %v1041_v28, %v1039_v27 }
  0x4d   :  { %2699 = vmatpush1.bf16.msra.mxu1 %v2698_v1  ;;  %2637 = vmatprep.subr.bf16.mxu0 %v2636_v8  ;;  %v87_v34 = vld [vmem:[%s4096_s0 + $0x30] sm:$0xff]  ;;  %v1499_v35 = vld [vmem:[#allocation2 + $0xa0] sm:$0xff]  ;;  %v2708_v38 = vpack.c.bf16 %v1502_v31, %v1500_v29  ;;  %v2646_v39 = vpack.c.bf16 %v1040_v33, %v1038_v32  ;;  %v1043_v40 = vld [vmem:[%s4099_s3 + $0xc8] sm:$0xff] }
  0x4e   :  { %2545 = vmatmul.mubr.msk.f32.gmra.mrb[6].mxu0 %vm151_vm0, %v84_v49  ;;  %2701 = vmatprep.subr.bf16.mxu1 %v2700_v12  ;;  %v1501_v36 = vld [vmem:[#allocation2 + $0xb0] sm:$0xff]  ;;  %v1045_v41 = vld [vmem:[%s4099_s3 + $0xd8] sm:$0xff]  ;;  %v1504_v42 = vld [vmem:[#allocation2 + $0xc8] sm:$0xff] }
  0x4f   :  { %2577 = vmatmul.mubr.msk.f32.gmra.mrb[6].mxu1 %vm151_vm0, %v84_v49  ;;  %336 = vmatprep.mubr.f32.mxu0 %v2934_v0  ;;  %v2710_v43 = vpack.c.bf16 %v1501_v36, %v1499_v35  ;;  %v1506_v44 = vld [vmem:[#allocation2 + $0xd8] sm:$0xff]  ;;  %v1042_v45 = vld [vmem:[%s4099_s3 + $0xc0] sm:$0xff]  ;;  %v1044_v46 = vld [vmem:[%s4099_s3 + $0xd0] sm:$0xff]  ;;  %v2648_v50 = vpack.c.bf16 %v1045_v41, %v1043_v40 }
  0x50   :  { %593 = vmatprep.mubr.f32.mxu1 %v2934_v0  ;;  %2639 = vmatpush1.bf16.msra.mxu0 %v2638_v13  ;;  %v88_v47 = vld [vmem:[%s4096_s0 + $0x38] sm:$0xff]  ;;  %v1503_v48 = vld [vmem:[#allocation2 + $0xc0] sm:$0xff]  ;;  %v1505_v49 = vld [vmem:[#allocation2 + $0xd0] sm:$0xff]  ;;  %v2712_v51 = vpack.c.bf16 %v1506_v44, %v1504_v42  ;;  %v2650_v52 = vpack.c.bf16 %v1044_v46, %v1042_v45 }
  0x51   :  { %2703 = vmatpush1.bf16.msra.mxu1 %v2702_v17  ;;  %2641 = vmatprep.subr.bf16.mxu0 %v2640_v23  ;;  %v1047_v53 = vld [vmem:[%s4099_s3 + $0xe8] sm:$0xff]  ;;  %v1049_v54 = vld [vmem:[%s4099_s3 + $0xf8] sm:$0xff]  ;;  %v2714_v56 = vpack.c.bf16 %v1505_v49, %v1503_v48  ;;  %v1046_v58 = vld [vmem:[%s4099_s3 + $0xe0] sm:$0xff] }
  0x52   :  { %2546 = vmatmul.mubr.msk.f32.gmra.mrb[8].mxu0 %vm151_vm0, %v85_v5  ;;  %2705 = vmatprep.subr.bf16.mxu1 %v2704_v25  ;;  %v1508_v55 = vld [vmem:[#allocation2 + $0xe8] sm:$0xff]  ;;  %v1510_v57 = vld [vmem:[#allocation2 + $0xf8] sm:$0xff]  ;;  %v1048_v59 = vld [vmem:[%s4099_s3 + $0xf0] sm:$0xff]  ;;  %v2652_v63 = vpack.c.bf16 %v1049_v54, %v1047_v53 }
  0x53   :  { %2578 = vmatmul.mubr.msk.f32.gmra.mrb[8].mxu1 %vm151_vm0, %v85_v5  ;;  %342 = vmatprep.mubr.f32.mxu0 %v2934_v0  ;;  %v89_v60 = vld [vmem:[%s4096_s0 + $0x40] sm:$0xff]  ;;  %v1509_v62 = vld [vmem:[#allocation2 + $0xf0] sm:$0xff]  ;;  %v2716_v1 = vpack.c.bf16 %v1510_v57, %v1508_v55  ;;  %v2654_v2 = vpack.c.bf16 %v1048_v59, %v1046_v58  ;;  %v1051_v3 = vld [vmem:[%s4099_s3 + $0x108] sm:$0xff] }
  0x54   :  { %599 = vmatprep.mubr.f32.mxu1 %v2934_v0  ;;  %2643 = vmatpush1.bf16.msra.mxu0 %v2642_v26  ;;  %v1507_v61 = vld [vmem:[#allocation2 + $0xe0] sm:$0xff]  ;;  %v1053_v4 = vld [vmem:[%s4099_s3 + $0x118] sm:$0xff]  ;;  %v1512_v5 = vld [vmem:[#allocation2 + $0x108] sm:$0xff] }
  0x55   :  { %2707 = vmatpush1.bf16.msra.mxu1 %v2706_v30  ;;  %2645 = vmatprep.subr.bf16.mxu0 %v2644_v37  ;;  %v2718_v6 = vpack.c.bf16 %v1509_v62, %v1507_v61  ;;  %v1514_v7 = vld [vmem:[#allocation2 + $0x118] sm:$0xff]  ;;  %v1050_v8 = vld [vmem:[%s4099_s3 + $0x100] sm:$0xff]  ;;  %v1052_v9 = vld [vmem:[%s4099_s3 + $0x110] sm:$0xff]  ;;  %v2656_v13 = vpack.c.bf16 %v1053_v4, %v1051_v3 }
  0x56   :  { %2547 = vmatmul.mubr.msk.f32.gmra.mrb[10].mxu0 %vm151_vm0, %v86_v16  ;;  %2709 = vmatprep.subr.bf16.mxu1 %v2708_v38  ;;  %v90_v10 = vld [vmem:[%s4096_s0 + $0x48] sm:$0xff]  ;;  %v1511_v11 = vld [vmem:[#allocation2 + $0x100] sm:$0xff]  ;;  %v1513_v12 = vld [vmem:[#allocation2 + $0x110] sm:$0xff]  ;;  %v2720_v14 = vpack.c.bf16 %v1514_v7, %v1512_v5  ;;  %v2658_v15 = vpack.c.bf16 %v1052_v9, %v1050_v8 }
  0x57   :  { %2579 = vmatmul.mubr.msk.f32.gmra.mrb[10].mxu1 %vm151_vm0, %v86_v16  ;;  %348 = vmatprep.mubr.f32.mxu0 %v2934_v0  ;;  %v1055_v16 = vld [vmem:[%s4099_s3 + $0x128] sm:$0xff]  ;;  %v1057_v17 = vld [vmem:[%s4099_s3 + $0x138] sm:$0xff]  ;;  %v2722_v19 = vpack.c.bf16 %v1513_v12, %v1511_v11  ;;  %v1054_v21 = vld [vmem:[%s4099_s3 + $0x120] sm:$0xff] }
  0x58   :  { %605 = vmatprep.mubr.f32.mxu1 %v2934_v0  ;;  %2647 = vmatpush1.bf16.msra.mxu0 %v2646_v39  ;;  %v1516_v18 = vld [vmem:[#allocation2 + $0x128] sm:$0xff]  ;;  %v1518_v20 = vld [vmem:[#allocation2 + $0x138] sm:$0xff]  ;;  %v1056_v22 = vld [vmem:[%s4099_s3 + $0x130] sm:$0xff]  ;;  %v2660_v26 = vpack.c.bf16 %v1057_v17, %v1055_v16 }
  0x59   :  { %2711 = vmatpush1.bf16.msra.mxu1 %v2710_v43  ;;  %2649 = vmatprep.subr.bf16.mxu0 %v2648_v50  ;;  %v91_v23 = vld [vmem:[%s4096_s0 + $0x50] sm:$0xff]  ;;  %v1515_v24 = vld [vmem:[#allocation2 + $0x120] sm:$0xff]  ;;  %v2724_v27 = vpack.c.bf16 %v1518_v20, %v1516_v18  ;;  %v2662_v28 = vpack.c.bf16 %v1056_v22, %v1054_v21  ;;  %v1059_v29 = vld [vmem:[%s4099_s3 + $0x148] sm:$0xff] }
  0x5a   :  { %2548 = vmatmul.mubr.msk.f32.gmra.mrb[12].mxu0 %vm151_vm0, %v87_v34  ;;  %2713 = vmatprep.subr.bf16.mxu1 %v2712_v51  ;;  %v1517_v25 = vld [vmem:[#allocation2 + $0x130] sm:$0xff]  ;;  %v1061_v30 = vld [vmem:[%s4099_s3 + $0x158] sm:$0xff]  ;;  %v1520_v31 = vld [vmem:[#allocation2 + $0x148] sm:$0xff] }
  0x5b   :  { %2580 = vmatmul.mubr.msk.f32.gmra.mrb[12].mxu1 %vm151_vm0, %v87_v34  ;;  %354 = vmatprep.mubr.f32.mxu0 %v2934_v0  ;;  %v2726_v32 = vpack.c.bf16 %v1517_v25, %v1515_v24  ;;  %v1522_v33 = vld [vmem:[#allocation2 + $0x158] sm:$0xff]  ;;  %v1058_v34 = vld [vmem:[%s4099_s3 + $0x140] sm:$0xff]  ;;  %v1060_v35 = vld [vmem:[%s4099_s3 + $0x150] sm:$0xff]  ;;  %v2664_v39 = vpack.c.bf16 %v1061_v30, %v1059_v29 }
  0x5c   :  { %611 = vmatprep.mubr.f32.mxu1 %v2934_v0  ;;  %2651 = vmatpush1.bf16.msra.mxu0 %v2650_v52  ;;  %v92_v36 = vld [vmem:[%s4096_s0 + $0x58] sm:$0xff]  ;;  %v1519_v37 = vld [vmem:[#allocation2 + $0x140] sm:$0xff]  ;;  %v1521_v38 = vld [vmem:[#allocation2 + $0x150] sm:$0xff]  ;;  %v2728_v40 = vpack.c.bf16 %v1522_v33, %v1520_v31  ;;  %v2666_v41 = vpack.c.bf16 %v1060_v35, %v1058_v34 }
  0x5d   :  { %2715 = vmatpush1.bf16.msra.mxu1 %v2714_v56  ;;  %2653 = vmatprep.subr.bf16.mxu0 %v2652_v63  ;;  %v1063_v42 = vld [vmem:[%s4099_s3 + $0x168] sm:$0xff]  ;;  %v1065_v43 = vld [vmem:[%s4099_s3 + $0x178] sm:$0xff]  ;;  %v2730_v45 = vpack.c.bf16 %v1521_v38, %v1519_v37  ;;  %v1064_v48 = vld [vmem:[%s4099_s3 + $0x170] sm:$0xff] }
  0x5e   :  { %2549 = vmatmul.mubr.msk.f32.gmra.mrb[14].mxu0 %vm151_vm0, %v88_v47  ;;  %2717 = vmatprep.subr.bf16.mxu1 %v2716_v1  ;;  %v1524_v44 = vld [vmem:[#allocation2 + $0x168] sm:$0xff]  ;;  %v1526_v46 = vld [vmem:[#allocation2 + $0x178] sm:$0xff]  ;;  %v93_v49 = vld [vmem:[%s4096_s0 + $0x60] sm:$0xff]  ;;  %v2668_v52 = vpack.c.bf16 %v1065_v43, %v1063_v42 }
  0x5f   :  { %2581 = vmatmul.mubr.msk.f32.gmra.mrb[14].mxu1 %vm151_vm0, %v88_v47  ;;  %360 = vmatprep.mubr.f32.mxu0 %v2934_v0  ;;  %v1062_v47 = vld [vmem:[%s4099_s3 + $0x160] sm:$0xff]  ;;  %v1525_v51 = vld [vmem:[#allocation2 + $0x170] sm:$0xff]  ;;  %v2732_v53 = vpack.c.bf16 %v1526_v46, %v1524_v44  ;;  %v1067_v55 = vld [vmem:[%s4099_s3 + $0x188] sm:$0xff] }
  0x60   :  { %617 = vmatprep.mubr.f32.mxu1 %v2934_v0  ;;  %2655 = vmatpush1.bf16.msra.mxu0 %v2654_v2  ;;  %v1523_v50 = vld [vmem:[#allocation2 + $0x160] sm:$0xff]  ;;  %v2670_v54 = vpack.c.bf16 %v1064_v48, %v1062_v47  ;;  %v1069_v56 = vld [vmem:[%s4099_s3 + $0x198] sm:$0xff]  ;;  %v1528_v57 = vld [vmem:[#allocation2 + $0x188] sm:$0xff] }
  0x61   :  { %2719 = vmatpush1.bf16.msra.mxu1 %v2718_v6  ;;  %2657 = vmatprep.subr.bf16.mxu0 %v2656_v13  ;;  %v2734_v58 = vpack.c.bf16 %v1525_v51, %v1523_v50  ;;  %v1530_v59 = vld [vmem:[#allocation2 + $0x198] sm:$0xff]  ;;  %v1068_v61 = vld [vmem:[%s4099_s3 + $0x190] sm:$0xff]  ;;  %v94_v62 = vld [vmem:[%s4096_s0 + $0x68] sm:$0xff]  ;;  %v2672_v2 = vpack.c.bf16 %v1069_v56, %v1067_v55 }
  0x62   :  { %2550 = vmatmul.mubr.msk.f32.gmra.mrb[16].mxu0 %vm151_vm0, %v89_v60  ;;  %2721 = vmatprep.subr.bf16.mxu1 %v2720_v14  ;;  %v1527_v63 = vld [vmem:[#allocation2 + $0x180] sm:$0xff]  ;;  %v1529_v1 = vld [vmem:[#allocation2 + $0x190] sm:$0xff]  ;;  %v2736_v3 = vpack.c.bf16 %v1530_v59, %v1528_v57  ;;  %v1071_v5 = vld [vmem:[%s4099_s3 + $0x1a8] sm:$0xff] }
  0x63   :  { %2582 = vmatmul.mubr.msk.f32.gmra.mrb[16].mxu1 %vm151_vm0, %v89_v60  ;;  %366 = vmatprep.mubr.f32.mxu0 %v2934_v0  ;;  %v1066_v60 = vld [vmem:[%s4099_s3 + $0x180] sm:$0xff]  ;;  %v1073_v6 = vld [vmem:[%s4099_s3 + $0x1b8] sm:$0xff]  ;;  %v1532_v7 = vld [vmem:[#allocation2 + $0x1a8] sm:$0xff]  ;;  %v2738_v8 = vpack.c.bf16 %v1529_v1, %v1527_v63 }
  0x64   :  { %623 = vmatprep.mubr.f32.mxu1 %v2934_v0  ;;  %2659 = vmatpush1.bf16.msra.mxu0 %v2658_v15  ;;  %v2674_v4 = vpack.c.bf16 %v1068_v61, %v1066_v60  ;;  %v1534_v9 = vld [vmem:[#allocation2 + $0x1b8] sm:$0xff]  ;;  %v1072_v11 = vld [vmem:[%s4099_s3 + $0x1b0] sm:$0xff]  ;;  %v1531_v13 = vld [vmem:[#allocation2 + $0x1a0] sm:$0xff]  ;;  %v2676_v15 = vpack.c.bf16 %v1073_v6, %v1071_v5  ;;  %v2935_v60 = vmov 0.0|0.0   ;;  %v131_v61 = vlaneseq }
  0x65   :  { %2723 = vmatpush1.bf16.msra.mxu1 %v2722_v19  ;;  %2661 = vmatprep.subr.bf16.mxu0 %v2660_v26  ;;  %v95_v12 = vld [vmem:[%s4096_s0 + $0x70] sm:$0xff]  ;;  %v2740_v16 = vpack.c.bf16 %v1534_v9, %v1532_v7  ;;  %v1075_v18 = vld [vmem:[%s4099_s3 + $0x1c8] sm:$0xff]  ;;  %v1077_v19 = vld [vmem:[%s4099_s3 + $0x1d8] sm:$0xff] }
  0x66   :  { %2551 = vmatmul.mubr.msk.f32.gmra.mrb[18].mxu0 %vm151_vm0, %v90_v10  ;;  %2725 = vmatprep.subr.bf16.mxu1 %v2724_v27  ;;  %v1533_v14 = vld [vmem:[#allocation2 + $0x1b0] sm:$0xff]  ;;  %v1536_v20 = vld [vmem:[#allocation2 + $0x1c8] sm:$0xff]  ;;  %v1538_v22 = vld [vmem:[#allocation2 + $0x1d8] sm:$0xff] }
  0x67   :  { %2583 = vmatmul.mubr.msk.f32.gmra.mrb[18].mxu1 %vm151_vm0, %v90_v10  ;;  %372 = vmatprep.mubr.f32.mxu0 %v2934_v0  ;;  %v1070_v10 = vld [vmem:[%s4099_s3 + $0x1a0] sm:$0xff]  ;;  %v2742_v21 = vpack.c.bf16 %v1533_v14, %v1531_v13  ;;  %v1076_v24 = vld [vmem:[%s4099_s3 + $0x1d0] sm:$0xff]  ;;  %v96_v25 = vld [vmem:[%s4096_s0 + $0x78] sm:$0xff]  ;;  %v2744_v29 = vpack.c.bf16 %v1538_v22, %v1536_v20 }
  0x68   :  { %629 = vmatprep.mubr.f32.mxu1 %v2934_v0  ;;  %2663 = vmatpush1.bf16.msra.mxu0 %v2662_v28  ;;  %v2678_v17 = vpack.c.bf16 %v1072_v11, %v1070_v10  ;;  %v1535_v26 = vld [vmem:[#allocation2 + $0x1c0] sm:$0xff]  ;;  %v1537_v27 = vld [vmem:[#allocation2 + $0x1d0] sm:$0xff]  ;;  %v2680_v28 = vpack.c.bf16 %v1077_v19, %v1075_v18  ;;  %v98_v33 = vld [vmem:[%s4096_s0 + $0x88] sm:$0xff] }
  0x69   :  { %2727 = vmatpush1.bf16.msra.mxu1 %v2726_v32  ;;  %2665 = vmatprep.subr.bf16.mxu0 %v2664_v39  ;;  %v2746_v31 = vpack.c.bf16 %v1537_v27, %v1535_v26  ;;  %v97_v32 = vld [vmem:[%s4096_s0 + $0x80] sm:$0xff]  ;;  %v99_v34 = vld [vmem:[%s4096_s0 + $0x90] sm:$0xff]  ;;  %v100_v35 = vld [vmem:[%s4096_s0 + $0x98] sm:$0xff] }
  0x6a   :  { %2552 = vmatmul.mubr.msk.f32.gmra.mrb[20].mxu0 %vm151_vm0, %v91_v23  ;;  %2729 = vmatprep.subr.bf16.mxu1 %v2728_v40  ;;  %v102_v37 = vld [vmem:[%s4096_s0 + $0xa8] sm:$0xff]  ;;  %v103_v38 = vld [vmem:[%s4096_s0 + $0xb0] sm:$0xff]  ;;  %v1081_v40 = vld [vmem:[%s4099_s3 + $0x1f8] sm:$0xff] }
  0x6b   :  { %2584 = vmatmul.mubr.msk.f32.gmra.mrb[20].mxu1 %vm151_vm0, %v91_v23  ;;  %378 = vmatprep.mubr.f32.mxu0 %v2934_v0  ;;  %v1074_v23 = vld [vmem:[%s4099_s3 + $0x1c0] sm:$0xff]  ;;  %v1079_v39 = vld [vmem:[%s4099_s3 + $0x1e8] sm:$0xff]  ;;  %v1542_v43 = vld [vmem:[#allocation2 + $0x1f8] sm:$0xff] }
  0x6c   :  { %635 = vmatprep.mubr.f32.mxu1 %v2934_v0  ;;  %2667 = vmatpush1.bf16.msra.mxu0 %v2666_v41  ;;  %v2682_v30 = vpack.c.bf16 %v1076_v24, %v1074_v23  ;;  %v1540_v41 = vld [vmem:[#allocation2 + $0x1e8] sm:$0xff]  ;;  %v2684_v42 = vpack.c.bf16 %v1081_v40, %v1079_v39  ;;  %v1078_v44 = vld [vmem:[%s4099_s3 + $0x1e0] sm:$0xff]  ;;  %v104_v50 = vld [vmem:[%s4096_s0 + $0xb8] sm:$0xff] }
  0x6d   :  { %2731 = vmatpush1.bf16.msra.mxu1 %v2730_v45  ;;  %2669 = vmatprep.subr.bf16.mxu0 %v2668_v52  ;;  %v1080_v45 = vld [vmem:[%s4099_s3 + $0x1f0] sm:$0xff]  ;;  %v2748_v46 = vpack.c.bf16 %v1542_v43, %v1540_v41  ;;  %v1539_v48 = vld [vmem:[#allocation2 + $0x1e0] sm:$0xff]  ;;  %v108_v55 = vld [vmem:[%s4096_s0 + $0xd8] sm:$0xff] }
  0x6e   :  { %2553 = vmatmul.mubr.msk.f32.gmra.mrb[22].mxu0 %vm151_vm0, %v92_v36  ;;  %2733 = vmatprep.subr.bf16.mxu1 %v2732_v53  ;;  %v2686_v47 = vpack.c.bf16 %v1080_v45, %v1078_v44  ;;  %v105_v52 = vld [vmem:[%s4096_s0 + $0xc0] sm:$0xff]  ;;  %v106_v53 = vld [vmem:[%s4096_s0 + $0xc8] sm:$0xff]  ;;  %v112_v59 = vld [vmem:[%s4096_s0 + $0xf8] sm:$0xff] }
  0x6f   :  { %2585 = vmatmul.mubr.msk.f32.gmra.mrb[22].mxu1 %vm151_vm0, %v92_v36  ;;  %384 = vmatprep.mubr.f32.mxu0 %v2934_v0  ;;  %v101_v36 = vld [vmem:[%s4096_s0 + $0xa0] sm:$0xff]  ;;  %v110_v57 = vld [vmem:[%s4096_s0 + $0xe8] sm:$0xff]  ;;  %v1943_v39 = vld [vmem:[#allocation4 + $0x18] sm:$0xff] }
  0x70   :  { %641 = vmatprep.mubr.f32.mxu1 %v2934_v0  ;;  %2671 = vmatpush1.bf16.msra.mxu0 %v2670_v54  ;;  %v107_v54 = vld [vmem:[%s4096_s0 + $0xd0] sm:$0xff]  ;;  %v109_v56 = vld [vmem:[%s4096_s0 + $0xe0] sm:$0xff]  ;;  %v2205_v20 = vld [vmem:[#allocation6 + $0x8] sm:$0xff] }
  0x71   :  { %2735 = vmatpush1.bf16.msra.mxu1 %v2734_v58  ;;  %2673 = vmatprep.subr.bf16.mxu0 %v2672_v2  ;;  %v111_v58 = vld [vmem:[%s4096_s0 + $0xf0] sm:$0xff]  ;;  %v129_v1 = vld [vmem:[%s4098_s2] sm:$0xf] }
  0x72   :  { %2554 = vmatmul.mubr.msk.f32.gmra.mrb[24].mxu0 %vm151_vm0, %v93_v49  ;;  %2737 = vmatprep.subr.bf16.mxu1 %v2736_v3  ;;  %v2204_v19 = vld [vmem:[#allocation6] sm:$0xff] }
  0x73   :  { %2586 = vmatmul.mubr.msk.f32.gmra.mrb[24].mxu1 %vm151_vm0, %v93_v49  ;;  %390 = vmatprep.mubr.f32.mxu0 %v2934_v0  ;;  %v1541_v49 = vld [vmem:[#allocation2 + $0x1f0] sm:$0xff] }
  0x74   :  { %647 = vmatprep.mubr.f32.mxu1 %v2934_v0  ;;  %2675 = vmatpush1.bf16.msra.mxu0 %v2674_v4  ;;  %v2750_v51 = vpack.c.bf16 %v1541_v49, %v1539_v48  ;;  %v2206_v48 = vld [vmem:[#allocation6 + $0x10] sm:$0xff]  ;;  %v2207_v49 = vld [vmem:[#allocation6 + $0x18] sm:$0xff] }
  0x75   :  { %2739 = vmatpush1.bf16.msra.mxu1 %v2738_v8  ;;  %2677 = vmatprep.subr.bf16.mxu0 %v2676_v15  ;;  %v1940_v15 = vld [vmem:[#allocation4] sm:$0xff] }
  0x76   :  { %2555 = vmatmul.mubr.msk.f32.gmra.mrb[26].mxu0 %vm151_vm0, %v94_v62  ;;  %2741 = vmatprep.subr.bf16.mxu1 %v2740_v16  ;;  %v1941_v16 = vld [vmem:[#allocation4 + $0x8] sm:$0xff] }
  0x77   :  { %2587 = vmatmul.mubr.msk.f32.gmra.mrb[26].mxu1 %vm151_vm0, %v94_v62  ;;  %396 = vmatprep.mubr.f32.mxu0 %v2934_v0  ;;  %v132_v62 = vshrl.u32 %v131_v61, 7 }
  0x78   :  { %653 = vmatprep.mubr.f32.mxu1 %v2934_v0  ;;  %2679 = vmatpush1.bf16.msra.mxu0 %v2678_v17 }
  0x79   :  { %2743 = vmatpush1.bf16.msra.mxu1 %v2742_v21  ;;  %2681 = vmatprep.subr.bf16.mxu0 %v2680_v28  ;;  %v3509_v63 = vsub.s32 0, %v132_v62  ;;  %v141_v2 = vsub.s32 2, %v132_v62  ;;  %v3514_v3 = vsub.s32 1, %v132_v62  ;;  %v2753_v28 = vpack.c.bf16 %v1941_v16, %v1940_v15 }
  0x7a   :  { %2556 = vmatmul.mubr.msk.f32.gmra.mrb[28].mxu0 %vm151_vm0, %v95_v12  ;;  %2745 = vmatprep.subr.bf16.mxu1 %v2744_v29 }
  0x7b   :  { %2588 = vmatmul.mubr.msk.f32.gmra.mrb[28].mxu1 %vm151_vm0, %v95_v12  ;;  %402 = vmatprep.mubr.f32.mxu0 %v2934_v0  ;;  %v3517_v4 = vrot.slane %v129_v1, %v3509_v63  ;;  %v3519_v5 = vrot.slane %v129_v1, %v141_v2  ;;  %v3522_v6 = vrot.slane %v129_v1, %v3514_v3 }
  0x7c   :  { %659 = vmatprep.mubr.f32.mxu1 %v2934_v0  ;;  %2683 = vmatpush1.bf16.msra.mxu0 %v2682_v30  ;;  %v2804_v2 = vpack.c.bf16 %v2207_v49, %v2206_v48 }
  0x7d   :  { %2747 = vmatpush1.bf16.msra.mxu1 %v2746_v31  ;;  %2685 = vmatprep.subr.bf16.mxu0 %v2684_v42 }
  0x7e   :  { %2557 = vmatmul.mubr.msk.f32.gmra.mrb[30].mxu0 %vm151_vm0, %v96_v25  ;;  %2749 = vmatprep.subr.bf16.mxu1 %v2748_v46 }
  0x7f   :  { %2589 = vmatmul.mubr.msk.f32.gmra.mrb[30].mxu1 %vm151_vm0, %v96_v25  ;;  %408 = vmatprep.mubr.f32.mxu0 %v2934_v0 }
  0x80   :  { %665 = vmatprep.mubr.f32.mxu1 %v2934_v0  ;;  %2687 = vmatpush1.bf16.msra.mxu0 %v2686_v47 }
  0x81   :  { %2751 = vmatpush1.bf16.msra.mxu1 %v2750_v51  ;;  %2752 = vmatprep.subr.bf16.mxu0 %v2935_v60 }
  0x82   :  { %2558 = vmatmul.mubr.msk.f32.gmra.mrb[32].mxu0 %vm151_vm0, %v97_v32  ;;  %2800 = vmatprep.subr.bf16.mxu1 %v2935_v60 }
  0x83   :  { %2590 = vmatmul.mubr.msk.f32.gmra.mrb[32].mxu1 %vm151_vm0, %v97_v32  ;;  %414 = vmatprep.mubr.f32.mxu0 %v2934_v0 }
  0x84   :  { %671 = vmatprep.mubr.f32.mxu1 %v2934_v0 }
  0x86   :  { %2559 = vmatmul.mubr.msk.f32.gmra.mrb[34].mxu0 %vm151_vm0, %v98_v33 }
  0x87   :  { %2591 = vmatmul.mubr.msk.f32.gmra.mrb[34].mxu1 %vm151_vm0, %v98_v33  ;;  %420 = vmatprep.mubr.f32.mxu0 %v2934_v0  ;;  %v2801_v33 = vpack.c.bf16 %v2205_v20, %v2204_v19 }
  0x88   :  { %677 = vmatprep.mubr.f32.mxu1 %v2934_v0 }
  0x8a   :  { %2560 = vmatmul.mubr.msk.f32.gmra.mrb[36].mxu0 %vm151_vm0, %v99_v34 }
  0x8b   :  { %2592 = vmatmul.mubr.msk.f32.gmra.mrb[36].mxu1 %vm151_vm0, %v99_v34  ;;  %426 = vmatprep.mubr.f32.mxu0 %v2934_v0 }
  0x8c   :  { %683 = vmatprep.mubr.f32.mxu1 %v2934_v0 }
  0x8e   :  { %2561 = vmatmul.mubr.msk.f32.gmra.mrb[38].mxu0 %vm151_vm0, %v100_v35 }
  0x8f   :  { %2593 = vmatmul.mubr.msk.f32.gmra.mrb[38].mxu1 %vm151_vm0, %v100_v35  ;;  %432 = vmatprep.mubr.f32.mxu0 %v2934_v0 }
  0x90   :  { %689 = vmatprep.mubr.f32.mxu1 %v2934_v0 }
  0x92   :  { %2562 = vmatmul.mubr.msk.f32.gmra.mrb[40].mxu0 %vm151_vm0, %v101_v36 }
  0x93   :  { %2594 = vmatmul.mubr.msk.f32.gmra.mrb[40].mxu1 %vm151_vm0, %v101_v36  ;;  %438 = vmatprep.mubr.f32.mxu0 %v2934_v0 }
  0x94   :  { %695 = vmatprep.mubr.f32.mxu1 %v2934_v0 }
  0x96   :  { %2563 = vmatmul.mubr.msk.f32.gmra.mrb[42].mxu0 %vm151_vm0, %v102_v37 }
  0x97   :  { %2595 = vmatmul.mubr.msk.f32.gmra.mrb[42].mxu1 %vm151_vm0, %v102_v37  ;;  %444 = vmatprep.mubr.f32.mxu0 %v2934_v0 }
  0x98   :  { %701 = vmatprep.mubr.f32.mxu1 %v2934_v0 }
  0x9a   :  { %2564 = vmatmul.mubr.msk.f32.gmra.mrb[44].mxu0 %vm151_vm0, %v103_v38 }
  0x9b   :  { %2596 = vmatmul.mubr.msk.f32.gmra.mrb[44].mxu1 %vm151_vm0, %v103_v38  ;;  %450 = vmatprep.mubr.f32.mxu0 %v2934_v0  ;;  %v1942_v38 = vld [vmem:[#allocation4 + $0x10] sm:$0xff] }
  0x9c   :  { %707 = vmatprep.mubr.f32.mxu1 %v2934_v0 }
  0x9e   :  { %2565 = vmatmul.mubr.msk.f32.gmra.mrb[46].mxu0 %vm151_vm0, %v104_v50 }
  0x9f   :  { %2597 = vmatmul.mubr.msk.f32.gmra.mrb[46].mxu1 %vm151_vm0, %v104_v50  ;;  %456 = vmatprep.mubr.f32.mxu0 %v2934_v0 }
  0xa0   :  { %713 = vmatprep.mubr.f32.mxu1 %v2934_v0 }
  0xa2   :  { %2566 = vmatmul.mubr.msk.f32.gmra.mrb[48].mxu0 %vm151_vm0, %v105_v52 }
  0xa3   :  { %2598 = vmatmul.mubr.msk.f32.gmra.mrb[48].mxu1 %vm151_vm0, %v105_v52  ;;  %462 = vmatprep.mubr.f32.mxu0 %v2934_v0 }
  0xa4   :  { %719 = vmatprep.mubr.f32.mxu1 %v2934_v0 }
  0xa6   :  { %2567 = vmatmul.mubr.msk.f32.gmra.mrb[50].mxu0 %vm151_vm0, %v106_v53 }
  0xa7   :  { %2599 = vmatmul.mubr.msk.f32.gmra.mrb[50].mxu1 %vm151_vm0, %v106_v53  ;;  %468 = vmatprep.mubr.f32.mxu0 %v2934_v0 }
  0xa8   :  { %725 = vmatprep.mubr.f32.mxu1 %v2934_v0 }
  0xaa   :  { %2568 = vmatmul.mubr.msk.f32.gmra.mrb[52].mxu0 %vm151_vm0, %v107_v54 }
  0xab   :  { %2600 = vmatmul.mubr.msk.f32.gmra.mrb[52].mxu1 %vm151_vm0, %v107_v54  ;;  %474 = vmatprep.mubr.f32.mxu0 %v2934_v0  ;;  %v2756_v54 = vpack.c.bf16 %v1943_v39, %v1942_v38  ;;  %v1947_v38 = vld [vmem:[#allocation4 + $0x38] sm:$0xff] }
  0xac   :  { %731 = vmatprep.mubr.f32.mxu1 %v2934_v0 }
  0xae   :  { %2569 = vmatmul.mubr.msk.f32.gmra.mrb[54].mxu0 %vm151_vm0, %v108_v55 }
  0xaf   :  { %2601 = vmatmul.mubr.msk.f32.gmra.mrb[54].mxu1 %vm151_vm0, %v108_v55  ;;  %480 = vmatprep.mubr.f32.mxu0 %v2934_v0 }
  0xb0   :  { %737 = vmatprep.mubr.f32.mxu1 %v2934_v0 }
  0xb2   :  { %2570 = vmatmul.mubr.msk.f32.gmra.mrb[56].mxu0 %vm151_vm0, %v109_v56 }
  0xb3   :  { %2602 = vmatmul.mubr.msk.f32.gmra.mrb[56].mxu1 %vm151_vm0, %v109_v56  ;;  %486 = vmatprep.mubr.f32.mxu0 %v2934_v0 }
  0xb4   :  { %743 = vmatprep.mubr.f32.mxu1 %v2934_v0 }
  0xb6   :  { %2571 = vmatmul.mubr.msk.f32.gmra.mrb[58].mxu0 %vm151_vm0, %v110_v57 }
  0xb7   :  { %2603 = vmatmul.mubr.msk.f32.gmra.mrb[58].mxu1 %vm151_vm0, %v110_v57  ;;  %492 = vmatprep.mubr.f32.mxu0 %v2934_v0 }
  0xb8   :  { %749 = vmatprep.mubr.f32.mxu1 %v2934_v0 }
  0xba   :  { %2572 = vmatmul.mubr.msk.f32.gmra.mrb[60].mxu0 %vm151_vm0, %v111_v58 }
  0xbb   :  { %2604 = vmatmul.mubr.msk.f32.gmra.mrb[60].mxu1 %vm151_vm0, %v111_v58  ;;  %498 = vmatprep.mubr.f32.mxu0 %v2934_v0 }
  0xbc   :  { %755 = vmatprep.mubr.f32.mxu1 %v2934_v0  ;;  %v145_v0 = vsub.s32 3, %v132_v62 }
  0xbe   :  { %2573 = vmatmul.mubr.msk.f32.gmra.mrb[62].mxu0 %vm151_vm0, %v112_v59  ;;  %v3524_v7 = vrot.slane %v129_v1, %v145_v0 }
  0xbf   :  { %2605 = vmatmul.mubr.msk.f32.gmra.mrb[62].mxu1 %vm151_vm0, %v112_v59 }
 0x115   :  { %v314_v8 = vpop.f32.mrb[0].mxu0 }
 0x116   :  { %v315_v9 = vadd.f32 %v314_v8, %v3517_v4  ;;  %v571_v10 = vpop.f32.mrb[0].mxu1  ;;  %v316_v11 = vpop.f32.mrb[1].mxu0 }
 0x117   :  { %v572_v12 = vadd.f32 %v571_v10, %v3519_v5  ;;  %v317_v13 = vadd.f32 %v316_v11, %v3522_v6  ;;  %v573_v14 = vpop.f32.mrb[1].mxu1  ;;  %v1944_v11 = vld [vmem:[#allocation4 + $0x20] sm:$0xff] }
 0x118   :  { %v762_v17 = vmul.f32 0.01, %v315_v9  ;;  %v574_v18 = vadd.f32 %v573_v14, %v3524_v7 }
 0x119   :  { %v764_v21 = vmul.f32 0.01, %v572_v12  ;;  %v763_v22 = vmul.f32 0.01, %v317_v13  ;;  %v320_v23 = vpop.f32.mrb[2].mxu0 }
 0x11a   :  { %v765_v24 = vmul.f32 0.01, %v574_v18  ;;  %v321_v25 = vadd.f32 %v320_v23, %v3517_v4  ;;  %v577_v26 = vpop.f32.mrb[2].mxu1  ;;  %v322_v27 = vpop.f32.mrb[3].mxu0  ;;  %v890_v34 = vmax.f32 %v315_v9, %v762_v17 }
 0x11b   :  { %v891_v29 = vmax.f32 %v317_v13, %v763_v22  ;;  %v578_v30 = vadd.f32 %v577_v26, %v3519_v5  ;;  %v323_v31 = vadd.f32 %v322_v27, %v3522_v6  ;;  %v579_v32 = vpop.f32.mrb[3].mxu1  ;;  %v892_v40 = vmax.f32 %v572_v12, %v764_v21  ;;  %v1945_v12 = vld [vmem:[#allocation4 + $0x28] sm:$0xff]  ;;  %v2208_v21 = vld [vmem:[#allocation6 + $0x20] sm:$0xff] }
 0x11c   :  { %v893_v35 = vmax.f32 %v574_v18, %v765_v24  ;;  %v766_v36 = vmul.f32 0.01, %v321_v25  ;;  %v580_v37 = vadd.f32 %v579_v32, %v3524_v7  ;;  %v2209_v22 = vld [vmem:[#allocation6 + $0x28] sm:$0xff]  ;;  %v2759_v27 = vpack.c.bf16 %v1945_v12, %v1944_v11 }
 0x11d   :  { %v768_v41 = vmul.f32 0.01, %v578_v30  ;;  %v767_v42 = vmul.f32 0.01, %v323_v31  ;;  %v326_v43 = vpop.f32.mrb[4].mxu0  ;;  %1158 = vmatprep.mubr.f32.mxu0 %v891_v29 }
 0x11e   :  { %v769_v44 = vmul.f32 0.01, %v580_v37  ;;  %v327_v45 = vadd.f32 %v326_v43, %v3517_v4  ;;  %v583_v46 = vpop.f32.mrb[4].mxu1  ;;  %1619 = vmatprep.mubr.f32.mxu1 %v893_v35  ;;  %v328_v47 = vpop.f32.mrb[5].mxu0  ;;  %1159 = vmatmul.mubr.f32.vlgmr.msra.gmra.mrb[64].mxu0 %v890_v34  ;;  %v894_v55 = vmax.f32 %v321_v25, %v766_v36  ;;  %v2807_v36 = vpack.c.bf16 %v2209_v22, %v2208_v21  ;;  %v2210_v43 = vld [vmem:[#allocation6 + $0x30] sm:$0xff] }
 0x11f   :  { %v895_v50 = vmax.f32 %v323_v31, %v767_v42  ;;  %v584_v51 = vadd.f32 %v583_v46, %v3519_v5  ;;  %v329_v52 = vadd.f32 %v328_v47, %v3522_v6  ;;  %v585_v53 = vpop.f32.mrb[5].mxu1  ;;  %1620 = vmatmul.mubr.f32.vlgmr.msra.gmra.mrb[64].mxu1 %v892_v40  ;;  %2754 = vmatpush1.bf16.msra.mxu0 %v2753_v28 }
 0x120   :  { %v897_v56 = vmax.f32 %v580_v37, %v769_v44  ;;  %v770_v57 = vmul.f32 0.01, %v327_v45  ;;  %v586_v58 = vadd.f32 %v585_v53, %v3524_v7  ;;  %2802 = vmatpush1.bf16.msra.mxu1 %v2801_v33  ;;  %v896_v59 = vmax.f32 %v578_v30, %v768_v41  ;;  %2755 = vmatprep.subr.bf16.mxu0 %v2935_v60  ;;  %v1946_v37 = vld [vmem:[#allocation4 + $0x30] sm:$0xff]  ;;  %v2211_v44 = vld [vmem:[#allocation6 + $0x38] sm:$0xff] }
 0x121   :  { %v772_v61 = vmul.f32 0.01, %v584_v51  ;;  %v771_v62 = vmul.f32 0.01, %v329_v52  ;;  %v332_v1 = vpop.f32.mrb[6].mxu0  ;;  %1164 = vmatprep.mubr.f32.mxu0 %v895_v50  ;;  %2803 = vmatprep.subr.bf16.mxu1 %v2935_v60  ;;  %v2762_v53 = vpack.c.bf16 %v1947_v38, %v1946_v37  ;;  %v1951_v37 = vld [vmem:[#allocation4 + $0x58] sm:$0xff] }
 0x122   :  { %v773_v0 = vmul.f32 0.01, %v586_v58  ;;  %v333_v8 = vadd.f32 %v332_v1, %v3517_v4  ;;  %v589_v9 = vpop.f32.mrb[6].mxu1  ;;  %1625 = vmatprep.mubr.f32.mxu1 %v897_v56  ;;  %v334_v10 = vpop.f32.mrb[7].mxu0  ;;  %1165 = vmatmul.mubr.f32.gmra.mrb[66].mxu0 %v894_v55  ;;  %v898_v17 = vmax.f32 %v327_v45, %v770_v57 }
 0x123   :  { %v899_v13 = vmax.f32 %v329_v52, %v771_v62  ;;  %v590_v14 = vadd.f32 %v589_v9, %v3519_v5  ;;  %v335_v15 = vadd.f32 %v334_v10, %v3522_v6  ;;  %v591_v16 = vpop.f32.mrb[7].mxu1  ;;  %1626 = vmatmul.mubr.f32.gmra.mrb[66].mxu1 %v896_v59  ;;  %2757 = vmatpush1.bf16.msra.mxu0 %v2756_v54 }
 0x124   :  { %v901_v18 = vmax.f32 %v586_v58, %v773_v0  ;;  %v774_v19 = vmul.f32 0.01, %v333_v8  ;;  %v592_v20 = vadd.f32 %v591_v16, %v3524_v7  ;;  %v900_v23 = vmax.f32 %v584_v51, %v772_v61  ;;  %2805 = vmatpush1.bf16.msra.mxu1 %v2804_v2  ;;  %2758 = vmatprep.subr.bf16.mxu0 %v2935_v60  ;;  %v1948_v2 = vld [vmem:[#allocation4 + $0x40] sm:$0xff]  ;;  %v1949_v0 = vld [vmem:[#allocation4 + $0x48] sm:$0xff] }
 0x125   :  { %v776_v24 = vmul.f32 0.01, %v590_v14  ;;  %v775_v25 = vmul.f32 0.01, %v335_v15  ;;  %v338_v26 = vpop.f32.mrb[8].mxu0  ;;  %1170 = vmatprep.mubr.f32.mxu0 %v899_v13  ;;  %2806 = vmatprep.subr.bf16.mxu1 %v2935_v60  ;;  %v2810_v58 = vpack.c.bf16 %v2211_v44, %v2210_v43  ;;  %v2212_v16 = vld [vmem:[#allocation6 + $0x40] sm:$0xff]  ;;  %v2765_v22 = vpack.c.bf16 %v1949_v0, %v1948_v2 }
 0x126   :  { %v777_v28 = vmul.f32 0.01, %v592_v20  ;;  %v339_v29 = vadd.f32 %v338_v26, %v3517_v4  ;;  %v595_v30 = vpop.f32.mrb[8].mxu1  ;;  %1631 = vmatprep.mubr.f32.mxu1 %v901_v18  ;;  %v340_v31 = vpop.f32.mrb[9].mxu0  ;;  %1171 = vmatmul.mubr.f32.gmra.mrb[68].mxu0 %v898_v17  ;;  %v902_v39 = vmax.f32 %v333_v8, %v774_v19  ;;  %v2213_v17 = vld [vmem:[#allocation6 + $0x48] sm:$0xff] }
 0x127   :  { %v903_v32 = vmax.f32 %v335_v15, %v775_v25  ;;  %v596_v33 = vadd.f32 %v595_v30, %v3519_v5  ;;  %v341_v34 = vadd.f32 %v340_v31, %v3522_v6  ;;  %v597_v35 = vpop.f32.mrb[9].mxu1  ;;  %1632 = vmatmul.mubr.f32.gmra.mrb[68].mxu1 %v900_v23  ;;  %v904_v45 = vmax.f32 %v590_v14, %v776_v24  ;;  %v1953_v2 = vld [vmem:[#allocation4 + $0x68] sm:$0xff] }
 0x128   :  { %v905_v40 = vmax.f32 %v592_v20, %v777_v28  ;;  %v778_v41 = vmul.f32 0.01, %v339_v29  ;;  %v598_v42 = vadd.f32 %v597_v35, %v3524_v7  ;;  %2760 = vmatpush1.bf16.msra.mxu0 %v2759_v27  ;;  %2808 = vmatpush1.bf16.msra.mxu1 %v2807_v36  ;;  %v2813_v31 = vpack.c.bf16 %v2213_v17, %v2212_v16  ;;  %v1950_v36 = vld [vmem:[#allocation4 + $0x50] sm:$0xff] }
 0x129   :  { %v780_v46 = vmul.f32 0.01, %v596_v33  ;;  %v779_v47 = vmul.f32 0.01, %v341_v34  ;;  %v344_v48 = vpop.f32.mrb[10].mxu0  ;;  %1176 = vmatprep.mubr.f32.mxu0 %v903_v32  ;;  %2761 = vmatprep.subr.bf16.mxu0 %v2935_v60 }
 0x12a   :  { %v781_v49 = vmul.f32 0.01, %v598_v42  ;;  %v345_v50 = vadd.f32 %v344_v48, %v3517_v4  ;;  %v601_v51 = vpop.f32.mrb[10].mxu1  ;;  %1637 = vmatprep.mubr.f32.mxu1 %v905_v40  ;;  %v346_v52 = vpop.f32.mrb[11].mxu0  ;;  %1177 = vmatmul.mubr.f32.gmra.mrb[70].mxu0 %v902_v39  ;;  %v906_v59 = vmax.f32 %v339_v29, %v778_v41 }
 0x12b   :  { %v907_v54 = vmax.f32 %v341_v34, %v779_v47  ;;  %v602_v55 = vadd.f32 %v601_v51, %v3519_v5  ;;  %v347_v56 = vadd.f32 %v346_v52, %v3522_v6  ;;  %v603_v57 = vpop.f32.mrb[11].mxu1  ;;  %1638 = vmatmul.mubr.f32.gmra.mrb[70].mxu1 %v904_v45  ;;  %v908_v8 = vmax.f32 %v596_v33, %v780_v46  ;;  %v2214_v46 = vld [vmem:[#allocation6 + $0x50] sm:$0xff]  ;;  %v2215_v47 = vld [vmem:[#allocation6 + $0x58] sm:$0xff] }
 0x12c   :  { %v909_v61 = vmax.f32 %v598_v42, %v781_v49  ;;  %v782_v62 = vmul.f32 0.01, %v345_v50  ;;  %v604_v1 = vadd.f32 %v603_v57, %v3524_v7  ;;  %2809 = vmatprep.subr.bf16.mxu1 %v2935_v60  ;;  %2763 = vmatpush1.bf16.msra.mxu0 %v2762_v53  ;;  %v2768_v52 = vpack.c.bf16 %v1951_v37, %v1950_v36 }
 0x12d   :  { %v784_v9 = vmul.f32 0.01, %v602_v55  ;;  %v783_v10 = vmul.f32 0.01, %v347_v56  ;;  %v350_v11 = vpop.f32.mrb[12].mxu0  ;;  %1182 = vmatprep.mubr.f32.mxu0 %v907_v54  ;;  %2811 = vmatpush1.bf16.msra.mxu1 %v2810_v58 }
 0x12e   :  { %v785_v12 = vmul.f32 0.01, %v604_v1  ;;  %v351_v13 = vadd.f32 %v350_v11, %v3517_v4  ;;  %v607_v14 = vpop.f32.mrb[12].mxu1  ;;  %1643 = vmatprep.mubr.f32.mxu1 %v909_v61  ;;  %v352_v15 = vpop.f32.mrb[13].mxu0  ;;  %1183 = vmatmul.mubr.f32.gmra.mrb[72].mxu0 %v906_v59  ;;  %v910_v23 = vmax.f32 %v345_v50, %v782_v62  ;;  %v2816_v62 = vpack.c.bf16 %v2215_v47, %v2214_v46  ;;  %v2216_v11 = vld [vmem:[#allocation6 + $0x60] sm:$0xff] }
 0x12f   :  { %v911_v18 = vmax.f32 %v347_v56, %v783_v10  ;;  %v608_v19 = vadd.f32 %v607_v14, %v3519_v5  ;;  %v353_v20 = vadd.f32 %v352_v15, %v3522_v6  ;;  %v609_v21 = vpop.f32.mrb[13].mxu1  ;;  %1644 = vmatmul.mubr.f32.gmra.mrb[72].mxu1 %v908_v8  ;;  %v912_v27 = vmax.f32 %v602_v55, %v784_v9 }
 0x130   :  { %v913_v24 = vmax.f32 %v604_v1, %v785_v12  ;;  %v786_v25 = vmul.f32 0.01, %v351_v13  ;;  %v610_v26 = vadd.f32 %v609_v21, %v3524_v7  ;;  %2764 = vmatprep.subr.bf16.mxu0 %v2935_v60  ;;  %2812 = vmatprep.subr.bf16.mxu1 %v2935_v60  ;;  %v1952_v1 = vld [vmem:[#allocation4 + $0x60] sm:$0xff]  ;;  %v2217_v12 = vld [vmem:[#allocation6 + $0x68] sm:$0xff] }
 0x131   :  { %v788_v28 = vmul.f32 0.01, %v608_v19  ;;  %v787_v29 = vmul.f32 0.01, %v353_v20  ;;  %v356_v30 = vpop.f32.mrb[14].mxu0  ;;  %1188 = vmatprep.mubr.f32.mxu0 %v911_v18  ;;  %2766 = vmatpush1.bf16.msra.mxu0 %v2765_v22  ;;  %v2771_v21 = vpack.c.bf16 %v1953_v2, %v1952_v1  ;;  %v1957_v1 = vld [vmem:[#allocation4 + $0x88] sm:$0xff] }
 0x132   :  { %v789_v32 = vmul.f32 0.01, %v610_v26  ;;  %v357_v33 = vadd.f32 %v356_v30, %v3517_v4  ;;  %v613_v34 = vpop.f32.mrb[14].mxu1  ;;  %1649 = vmatprep.mubr.f32.mxu1 %v913_v24  ;;  %v358_v35 = vpop.f32.mrb[15].mxu0  ;;  %1189 = vmatmul.mubr.f32.gmra.mrb[74].mxu0 %v910_v23  ;;  %v914_v42 = vmax.f32 %v351_v13, %v786_v25 }
 0x133   :  { %v915_v38 = vmax.f32 %v353_v20, %v787_v29  ;;  %v614_v39 = vadd.f32 %v613_v34, %v3519_v5  ;;  %v359_v40 = vadd.f32 %v358_v35, %v3522_v6  ;;  %v615_v41 = vpop.f32.mrb[15].mxu1  ;;  %1650 = vmatmul.mubr.f32.gmra.mrb[74].mxu1 %v912_v27  ;;  %v916_v48 = vmax.f32 %v608_v19, %v788_v28 }
 0x134   :  { %v917_v43 = vmax.f32 %v610_v26, %v789_v32  ;;  %v790_v44 = vmul.f32 0.01, %v357_v33  ;;  %v616_v45 = vadd.f32 %v615_v41, %v3524_v7  ;;  %2814 = vmatpush1.bf16.msra.mxu1 %v2813_v31  ;;  %2767 = vmatprep.subr.bf16.mxu0 %v2935_v60  ;;  %v2819_v26 = vpack.c.bf16 %v2217_v12, %v2216_v11  ;;  %v1954_v31 = vld [vmem:[#allocation4 + $0x70] sm:$0xff]  ;;  %v1955_v32 = vld [vmem:[#allocation4 + $0x78] sm:$0xff] }
 0x135   :  { %v792_v49 = vmul.f32 0.01, %v614_v39  ;;  %v791_v50 = vmul.f32 0.01, %v359_v40  ;;  %v362_v51 = vpop.f32.mrb[16].mxu0  ;;  %1194 = vmatprep.mubr.f32.mxu0 %v915_v38  ;;  %2815 = vmatprep.subr.bf16.mxu1 %v2935_v60  ;;  %v2218_v41 = vld [vmem:[#allocation6 + $0x70] sm:$0xff]  ;;  %v2774_v47 = vpack.c.bf16 %v1955_v32, %v1954_v31 }
 0x136   :  { %v793_v53 = vmul.f32 0.01, %v616_v45  ;;  %v363_v54 = vadd.f32 %v362_v51, %v3517_v4  ;;  %v619_v55 = vpop.f32.mrb[16].mxu1  ;;  %1655 = vmatprep.mubr.f32.mxu1 %v917_v43  ;;  %v364_v56 = vpop.f32.mrb[17].mxu0  ;;  %1195 = vmatmul.mubr.f32.gmra.mrb[76].mxu0 %v914_v42  ;;  %v918_v0 = vmax.f32 %v357_v33, %v790_v44  ;;  %v2219_v42 = vld [vmem:[#allocation6 + $0x78] sm:$0xff] }
 0x137   :  { %v919_v57 = vmax.f32 %v359_v40, %v791_v50  ;;  %v620_v58 = vadd.f32 %v619_v55, %v3519_v5  ;;  %v365_v59 = vadd.f32 %v364_v56, %v3522_v6  ;;  %v621_v61 = vpop.f32.mrb[17].mxu1  ;;  %1656 = vmatmul.mubr.f32.gmra.mrb[76].mxu1 %v916_v48  ;;  %v920_v13 = vmax.f32 %v614_v39, %v792_v49  ;;  %v1959_v31 = vld [vmem:[#allocation4 + $0x98] sm:$0xff] }
 0x138   :  { %v921_v8 = vmax.f32 %v616_v45, %v793_v53  ;;  %v794_v9 = vmul.f32 0.01, %v363_v54  ;;  %v622_v10 = vadd.f32 %v621_v61, %v3524_v7  ;;  %2769 = vmatpush1.bf16.msra.mxu0 %v2768_v52  ;;  %2817 = vmatpush1.bf16.msra.mxu1 %v2816_v62  ;;  %v2822_v56 = vpack.c.bf16 %v2219_v42, %v2218_v41  ;;  %v1956_v62 = vld [vmem:[#allocation4 + $0x80] sm:$0xff] }
 0x139   :  { %v796_v14 = vmul.f32 0.01, %v620_v58  ;;  %v795_v15 = vmul.f32 0.01, %v365_v59  ;;  %v368_v16 = vpop.f32.mrb[18].mxu0  ;;  %1200 = vmatprep.mubr.f32.mxu0 %v919_v57  ;;  %2770 = vmatprep.subr.bf16.mxu0 %v2935_v60 }
 0x13a   :  { %v797_v17 = vmul.f32 0.01, %v622_v10  ;;  %v369_v18 = vadd.f32 %v368_v16, %v3517_v4  ;;  %v625_v19 = vpop.f32.mrb[18].mxu1  ;;  %1661 = vmatprep.mubr.f32.mxu1 %v921_v8  ;;  %v370_v20 = vpop.f32.mrb[19].mxu0  ;;  %1201 = vmatmul.mubr.f32.gmra.mrb[78].mxu0 %v918_v0  ;;  %v922_v27 = vmax.f32 %v363_v54, %v794_v9 }
 0x13b   :  { %v923_v22 = vmax.f32 %v365_v59, %v795_v15  ;;  %v626_v23 = vadd.f32 %v625_v19, %v3519_v5  ;;  %v371_v24 = vadd.f32 %v370_v20, %v3522_v6  ;;  %v627_v25 = vpop.f32.mrb[19].mxu1  ;;  %1662 = vmatmul.mubr.f32.gmra.mrb[78].mxu1 %v920_v13  ;;  %v924_v33 = vmax.f32 %v620_v58, %v796_v14  ;;  %v2220_v14 = vld [vmem:[#allocation6 + $0x80] sm:$0xff]  ;;  %v2221_v15 = vld [vmem:[#allocation6 + $0x88] sm:$0xff] }
 0x13c   :  { %v925_v28 = vmax.f32 %v622_v10, %v797_v17  ;;  %v798_v29 = vmul.f32 0.01, %v369_v18  ;;  %v628_v30 = vadd.f32 %v627_v25, %v3524_v7  ;;  %2818 = vmatprep.subr.bf16.mxu1 %v2935_v60  ;;  %2772 = vmatpush1.bf16.msra.mxu0 %v2771_v21  ;;  %v2777_v20 = vpack.c.bf16 %v1957_v1, %v1956_v62 }
 0x13d   :  { %v800_v34 = vmul.f32 0.01, %v626_v23  ;;  %v799_v35 = vmul.f32 0.01, %v371_v24  ;;  %v374_v36 = vpop.f32.mrb[20].mxu0  ;;  %1206 = vmatprep.mubr.f32.mxu0 %v923_v22  ;;  %2820 = vmatpush1.bf16.msra.mxu1 %v2819_v26 }
 0x13e   :  { %v801_v37 = vmul.f32 0.01, %v628_v30  ;;  %v375_v38 = vadd.f32 %v374_v36, %v3517_v4  ;;  %v631_v39 = vpop.f32.mrb[20].mxu1  ;;  %1667 = vmatprep.mubr.f32.mxu1 %v925_v28  ;;  %v376_v40 = vpop.f32.mrb[21].mxu0  ;;  %1207 = vmatmul.mubr.f32.gmra.mrb[80].mxu0 %v922_v27  ;;  %v926_v48 = vmax.f32 %v369_v18, %v798_v29  ;;  %v2825_v29 = vpack.c.bf16 %v2221_v15, %v2220_v14  ;;  %v2222_v36 = vld [vmem:[#allocation6 + $0x90] sm:$0xff] }
 0x13f   :  { %v927_v43 = vmax.f32 %v371_v24, %v799_v35  ;;  %v632_v44 = vadd.f32 %v631_v39, %v3519_v5  ;;  %v377_v45 = vadd.f32 %v376_v40, %v3522_v6  ;;  %v633_v46 = vpop.f32.mrb[21].mxu1  ;;  %1668 = vmatmul.mubr.f32.gmra.mrb[80].mxu1 %v924_v33  ;;  %v928_v52 = vmax.f32 %v626_v23, %v800_v34 }
 0x140   :  { %v929_v49 = vmax.f32 %v628_v30, %v801_v37  ;;  %v802_v50 = vmul.f32 0.01, %v375_v38  ;;  %v634_v51 = vadd.f32 %v633_v46, %v3524_v7  ;;  %2773 = vmatprep.subr.bf16.mxu0 %v2935_v60  ;;  %2821 = vmatprep.subr.bf16.mxu1 %v2935_v60  ;;  %v1958_v30 = vld [vmem:[#allocation4 + $0x90] sm:$0xff]  ;;  %v2223_v37 = vld [vmem:[#allocation6 + $0x98] sm:$0xff] }
 0x141   :  { %v804_v53 = vmul.f32 0.01, %v632_v44  ;;  %v803_v54 = vmul.f32 0.01, %v377_v45  ;;  %v380_v55 = vpop.f32.mrb[22].mxu0  ;;  %1212 = vmatprep.mubr.f32.mxu0 %v927_v43  ;;  %2775 = vmatpush1.bf16.msra.mxu0 %v2774_v47  ;;  %v2780_v46 = vpack.c.bf16 %v1959_v31, %v1958_v30  ;;  %v1963_v30 = vld [vmem:[#allocation4 + $0xb8] sm:$0xff] }
 0x142   :  { %v805_v57 = vmul.f32 0.01, %v634_v51  ;;  %v381_v58 = vadd.f32 %v380_v55, %v3517_v4  ;;  %v637_v59 = vpop.f32.mrb[22].mxu1  ;;  %1673 = vmatprep.mubr.f32.mxu1 %v929_v49  ;;  %v382_v61 = vpop.f32.mrb[23].mxu0  ;;  %1213 = vmatmul.mubr.f32.gmra.mrb[82].mxu0 %v926_v48  ;;  %v930_v10 = vmax.f32 %v375_v38, %v802_v50 }
 0x143   :  { %v931_v2 = vmax.f32 %v377_v45, %v803_v54  ;;  %v638_v0 = vadd.f32 %v637_v59, %v3519_v5  ;;  %v383_v8 = vadd.f32 %v382_v61, %v3522_v6  ;;  %v639_v9 = vpop.f32.mrb[23].mxu1  ;;  %1674 = vmatmul.mubr.f32.gmra.mrb[82].mxu1 %v928_v52  ;;  %v932_v16 = vmax.f32 %v632_v44, %v804_v53 }
 0x144   :  { %v933_v11 = vmax.f32 %v634_v51, %v805_v57  ;;  %v806_v12 = vmul.f32 0.01, %v381_v58  ;;  %v640_v13 = vadd.f32 %v639_v9, %v3524_v7  ;;  %2823 = vmatpush1.bf16.msra.mxu1 %v2822_v56  ;;  %2776 = vmatprep.subr.bf16.mxu0 %v2935_v60  ;;  %v2828_v51 = vpack.c.bf16 %v2223_v37, %v2222_v36  ;;  %v1960_v56 = vld [vmem:[#allocation4 + $0xa0] sm:$0xff]  ;;  %v1961_v57 = vld [vmem:[#allocation4 + $0xa8] sm:$0xff] }
 0x145   :  { %v808_v17 = vmul.f32 0.01, %v638_v0  ;;  %v807_v18 = vmul.f32 0.01, %v383_v8  ;;  %v386_v19 = vpop.f32.mrb[24].mxu0  ;;  %1218 = vmatprep.mubr.f32.mxu0 %v931_v2  ;;  %2824 = vmatprep.subr.bf16.mxu1 %v2935_v60  ;;  %v2224_v9 = vld [vmem:[#allocation6 + $0xa0] sm:$0xff]  ;;  %v2783_v15 = vpack.c.bf16 %v1961_v57, %v1960_v56 }
 0x146   :  { %v809_v21 = vmul.f32 0.01, %v640_v13  ;;  %v387_v22 = vadd.f32 %v386_v19, %v3517_v4  ;;  %v643_v23 = vpop.f32.mrb[24].mxu1  ;;  %1679 = vmatprep.mubr.f32.mxu1 %v933_v11  ;;  %v388_v24 = vpop.f32.mrb[25].mxu0  ;;  %1219 = vmatmul.mubr.f32.gmra.mrb[84].mxu0 %v930_v10  ;;  %v934_v32 = vmax.f32 %v381_v58, %v806_v12  ;;  %v2225_v10 = vld [vmem:[#allocation6 + $0xa8] sm:$0xff] }
 0x147   :  { %v935_v25 = vmax.f32 %v383_v8, %v807_v18  ;;  %v644_v26 = vadd.f32 %v643_v23, %v3519_v5  ;;  %v389_v27 = vadd.f32 %v388_v24, %v3522_v6  ;;  %v645_v28 = vpop.f32.mrb[25].mxu1  ;;  %1680 = vmatmul.mubr.f32.gmra.mrb[84].mxu1 %v932_v16  ;;  %v936_v38 = vmax.f32 %v638_v0, %v808_v17  ;;  %v1965_v56 = vld [vmem:[#allocation4 + $0xc8] sm:$0xff] }
 0x148   :  { %v937_v33 = vmax.f32 %v640_v13, %v809_v21  ;;  %v810_v34 = vmul.f32 0.01, %v387_v22  ;;  %v646_v35 = vadd.f32 %v645_v28, %v3524_v7  ;;  %2778 = vmatpush1.bf16.msra.mxu0 %v2777_v20  ;;  %2826 = vmatpush1.bf16.msra.mxu1 %v2825_v29  ;;  %v2831_v24 = vpack.c.bf16 %v2225_v10, %v2224_v9  ;;  %v1962_v29 = vld [vmem:[#allocation4 + $0xb0] sm:$0xff] }
 0x149   :  { %v812_v39 = vmul.f32 0.01, %v644_v26  ;;  %v811_v40 = vmul.f32 0.01, %v389_v27  ;;  %v392_v41 = vpop.f32.mrb[26].mxu0  ;;  %1224 = vmatprep.mubr.f32.mxu0 %v935_v25  ;;  %2779 = vmatprep.subr.bf16.mxu0 %v2935_v60 }
 0x14a   :  { %v813_v42 = vmul.f32 0.01, %v646_v35  ;;  %v393_v43 = vadd.f32 %v392_v41, %v3517_v4  ;;  %v649_v44 = vpop.f32.mrb[26].mxu1  ;;  %1685 = vmatprep.mubr.f32.mxu1 %v937_v33  ;;  %v394_v45 = vpop.f32.mrb[27].mxu0  ;;  %1225 = vmatmul.mubr.f32.gmra.mrb[86].mxu0 %v934_v32  ;;  %v938_v52 = vmax.f32 %v387_v22, %v810_v34 }
 0x14b   :  { %v939_v47 = vmax.f32 %v389_v27, %v811_v40  ;;  %v650_v48 = vadd.f32 %v649_v44, %v3519_v5  ;;  %v395_v49 = vadd.f32 %v394_v45, %v3522_v6  ;;  %v651_v50 = vpop.f32.mrb[27].mxu1  ;;  %1686 = vmatmul.mubr.f32.gmra.mrb[86].mxu1 %v936_v38  ;;  %v940_v58 = vmax.f32 %v644_v26, %v812_v39  ;;  %v2226_v39 = vld [vmem:[#allocation6 + $0xb0] sm:$0xff]  ;;  %v2227_v40 = vld [vmem:[#allocation6 + $0xb8] sm:$0xff] }
 0x14c   :  { %v941_v53 = vmax.f32 %v646_v35, %v813_v42  ;;  %v814_v54 = vmul.f32 0.01, %v393_v43  ;;  %v652_v55 = vadd.f32 %v651_v50, %v3524_v7  ;;  %2827 = vmatprep.subr.bf16.mxu1 %v2935_v60  ;;  %2781 = vmatpush1.bf16.msra.mxu0 %v2780_v46  ;;  %v2786_v45 = vpack.c.bf16 %v1963_v30, %v1962_v29 }
 0x14d   :  { %v816_v59 = vmul.f32 0.01, %v650_v48  ;;  %v815_v61 = vmul.f32 0.01, %v395_v49  ;;  %v398_v62 = vpop.f32.mrb[28].mxu0  ;;  %1230 = vmatprep.mubr.f32.mxu0 %v939_v47  ;;  %2829 = vmatpush1.bf16.msra.mxu1 %v2828_v51 }
 0x14e   :  { %v817_v1 = vmul.f32 0.01, %v652_v55  ;;  %v399_v2 = vadd.f32 %v398_v62, %v3517_v4  ;;  %v655_v0 = vpop.f32.mrb[28].mxu1  ;;  %1691 = vmatprep.mubr.f32.mxu1 %v941_v53  ;;  %v400_v8 = vpop.f32.mrb[29].mxu0  ;;  %1231 = vmatmul.mubr.f32.gmra.mrb[88].mxu0 %v938_v52  ;;  %v942_v16 = vmax.f32 %v393_v43, %v814_v54  ;;  %v2834_v54 = vpack.c.bf16 %v2227_v40, %v2226_v39  ;;  %v2228_v62 = vld [vmem:[#allocation6 + $0xc0] sm:$0xff] }
 0x14f   :  { %v943_v11 = vmax.f32 %v395_v49, %v815_v61  ;;  %v656_v12 = vadd.f32 %v655_v0, %v3519_v5  ;;  %v401_v13 = vadd.f32 %v400_v8, %v3522_v6  ;;  %v657_v14 = vpop.f32.mrb[29].mxu1  ;;  %1692 = vmatmul.mubr.f32.gmra.mrb[88].mxu1 %v940_v58  ;;  %v944_v20 = vmax.f32 %v650_v48, %v816_v59 }
 0x150   :  { %v945_v17 = vmax.f32 %v652_v55, %v817_v1  ;;  %v818_v18 = vmul.f32 0.01, %v399_v2  ;;  %v658_v19 = vadd.f32 %v657_v14, %v3524_v7  ;;  %2782 = vmatprep.subr.bf16.mxu0 %v2935_v60  ;;  %2830 = vmatprep.subr.bf16.mxu1 %v2935_v60  ;;  %v1964_v55 = vld [vmem:[#allocation4 + $0xc0] sm:$0xff]  ;;  %v2229_v1 = vld [vmem:[#allocation6 + $0xc8] sm:$0xff] }
 0x151   :  { %v820_v21 = vmul.f32 0.01, %v656_v12  ;;  %v819_v22 = vmul.f32 0.01, %v401_v13  ;;  %v404_v23 = vpop.f32.mrb[30].mxu0  ;;  %1236 = vmatprep.mubr.f32.mxu0 %v943_v11  ;;  %2784 = vmatpush1.bf16.msra.mxu0 %v2783_v15  ;;  %v2789_v14 = vpack.c.bf16 %v1965_v56, %v1964_v55  ;;  %v1969_v55 = vld [vmem:[#allocation4 + $0xe8] sm:$0xff] }
 0x152   :  { %v821_v25 = vmul.f32 0.01, %v658_v19  ;;  %v405_v26 = vadd.f32 %v404_v23, %v3517_v4  ;;  %v661_v27 = vpop.f32.mrb[30].mxu1  ;;  %1697 = vmatprep.mubr.f32.mxu1 %v945_v17  ;;  %v406_v28 = vpop.f32.mrb[31].mxu0  ;;  %1237 = vmatmul.mubr.f32.gmra.mrb[90].mxu0 %v942_v16  ;;  %v946_v35 = vmax.f32 %v399_v2, %v818_v18 }
 0x153   :  { %v947_v31 = vmax.f32 %v401_v13, %v819_v22  ;;  %v662_v32 = vadd.f32 %v661_v27, %v3519_v5  ;;  %v407_v33 = vadd.f32 %v406_v28, %v3522_v6  ;;  %v663_v34 = vpop.f32.mrb[31].mxu1  ;;  %1698 = vmatmul.mubr.f32.gmra.mrb[90].mxu1 %v944_v20  ;;  %v948_v41 = vmax.f32 %v656_v12, %v820_v21 }
 0x154   :  { %v949_v36 = vmax.f32 %v658_v19, %v821_v25  ;;  %v822_v37 = vmul.f32 0.01, %v405_v26  ;;  %v664_v38 = vadd.f32 %v663_v34, %v3524_v7  ;;  %2832 = vmatpush1.bf16.msra.mxu1 %v2831_v24  ;;  %2785 = vmatprep.subr.bf16.mxu0 %v2935_v60  ;;  %v2837_v19 = vpack.c.bf16 %v2229_v1, %v2228_v62  ;;  %v1966_v24 = vld [vmem:[#allocation4 + $0xd0] sm:$0xff]  ;;  %v1967_v25 = vld [vmem:[#allocation4 + $0xd8] sm:$0xff] }
 0x155   :  { %v824_v42 = vmul.f32 0.01, %v662_v32  ;;  %v823_v43 = vmul.f32 0.01, %v407_v33  ;;  %v410_v44 = vpop.f32.mrb[32].mxu0  ;;  %1242 = vmatprep.mubr.f32.mxu0 %v947_v31  ;;  %2833 = vmatprep.subr.bf16.mxu1 %v2935_v60  ;;  %v2230_v34 = vld [vmem:[#allocation6 + $0xd0] sm:$0xff]  ;;  %v2792_v40 = vpack.c.bf16 %v1967_v25, %v1966_v24 }
 0x156   :  { %v825_v46 = vmul.f32 0.01, %v664_v38  ;;  %v411_v47 = vadd.f32 %v410_v44, %v3517_v4  ;;  %v667_v48 = vpop.f32.mrb[32].mxu1  ;;  %1703 = vmatprep.mubr.f32.mxu1 %v949_v36  ;;  %v412_v49 = vpop.f32.mrb[33].mxu0  ;;  %1243 = vmatmul.mubr.f32.gmra.mrb[92].mxu0 %v946_v35  ;;  %v950_v57 = vmax.f32 %v405_v26, %v822_v37  ;;  %v2231_v35 = vld [vmem:[#allocation6 + $0xd8] sm:$0xff] }
 0x157   :  { %v951_v50 = vmax.f32 %v407_v33, %v823_v43  ;;  %v668_v51 = vadd.f32 %v667_v48, %v3519_v5  ;;  %v413_v52 = vadd.f32 %v412_v49, %v3522_v6  ;;  %v669_v53 = vpop.f32.mrb[33].mxu1  ;;  %1704 = vmatmul.mubr.f32.gmra.mrb[92].mxu1 %v948_v41  ;;  %v952_v2 = vmax.f32 %v662_v32, %v824_v42 }
 0x158   :  { %v953_v58 = vmax.f32 %v664_v38, %v825_v46  ;;  %v826_v59 = vmul.f32 0.01, %v411_v47  ;;  %v670_v61 = vadd.f32 %v669_v53, %v3524_v7  ;;  %2787 = vmatpush1.bf16.msra.mxu0 %v2786_v45  ;;  %2835 = vmatpush1.bf16.msra.mxu1 %v2834_v54  ;;  %v2840_v49 = vpack.c.bf16 %v2231_v35, %v2230_v34  ;;  %v1968_v54 = vld [vmem:[#allocation4 + $0xe0] sm:$0xff] }
 0x159   :  { %v828_v0 = vmul.f32 0.01, %v668_v51  ;;  %v827_v8 = vmul.f32 0.01, %v413_v52  ;;  %v416_v9 = vpop.f32.mrb[34].mxu0  ;;  %1248 = vmatprep.mubr.f32.mxu0 %v951_v50  ;;  %2788 = vmatprep.subr.bf16.mxu0 %v2935_v60 }
 0x15a   :  { %v829_v10 = vmul.f32 0.01, %v670_v61  ;;  %v417_v11 = vadd.f32 %v416_v9, %v3517_v4  ;;  %v673_v12 = vpop.f32.mrb[34].mxu1  ;;  %1709 = vmatprep.mubr.f32.mxu1 %v953_v58  ;;  %v418_v13 = vpop.f32.mrb[35].mxu0  ;;  %1249 = vmatmul.mubr.f32.gmra.mrb[94].mxu0 %v950_v57  ;;  %v954_v20 = vmax.f32 %v411_v47, %v826_v59 }
 0x15b   :  { %v955_v15 = vmax.f32 %v413_v52, %v827_v8  ;;  %v674_v16 = vadd.f32 %v673_v12, %v3519_v5  ;;  %v419_v17 = vadd.f32 %v418_v13, %v3522_v6  ;;  %v675_v18 = vpop.f32.mrb[35].mxu1  ;;  %1710 = vmatmul.mubr.f32.gmra.mrb[94].mxu1 %v952_v2  ;;  %v956_v26 = vmax.f32 %v668_v51, %v828_v0  ;;  %v2232_v0 = vld [vmem:[#allocation6 + $0xe0] sm:$0xff]  ;;  %v2233_v8 = vld [vmem:[#allocation6 + $0xe8] sm:$0xff] }
 0x15c   :  { %v957_v21 = vmax.f32 %v670_v61, %v829_v10  ;;  %v830_v22 = vmul.f32 0.01, %v417_v11  ;;  %v676_v23 = vadd.f32 %v675_v18, %v3524_v7  ;;  %2836 = vmatprep.subr.bf16.mxu1 %v2935_v60  ;;  %2790 = vmatpush1.bf16.msra.mxu0 %v2789_v14  ;;  %v2795_v13 = vpack.c.bf16 %v1969_v55, %v1968_v54 }
 0x15d   :  { %v832_v27 = vmul.f32 0.01, %v674_v16  ;;  %v831_v28 = vmul.f32 0.01, %v419_v17  ;;  %v422_v29 = vpop.f32.mrb[36].mxu0  ;;  %1254 = vmatprep.mubr.f32.mxu0 %v955_v15  ;;  %2838 = vmatpush1.bf16.msra.mxu1 %v2837_v19 }
 0x15e   :  { %v833_v30 = vmul.f32 0.01, %v676_v23  ;;  %v423_v31 = vadd.f32 %v422_v29, %v3517_v4  ;;  %v679_v32 = vpop.f32.mrb[36].mxu1  ;;  %1715 = vmatprep.mubr.f32.mxu1 %v957_v21  ;;  %v424_v33 = vpop.f32.mrb[37].mxu0  ;;  %1255 = vmatmul.mubr.f32.gmra.mrb[96].mxu0 %v954_v20  ;;  %v958_v41 = vmax.f32 %v417_v11, %v830_v22  ;;  %v2843_v22 = vpack.c.bf16 %v2233_v8, %v2232_v0 }
 0x15f   :  { %v959_v36 = vmax.f32 %v419_v17, %v831_v28  ;;  %v680_v37 = vadd.f32 %v679_v32, %v3519_v5  ;;  %v425_v38 = vadd.f32 %v424_v33, %v3522_v6  ;;  %v681_v39 = vpop.f32.mrb[37].mxu1  ;;  %1716 = vmatmul.mubr.f32.gmra.mrb[96].mxu1 %v956_v26  ;;  %v960_v45 = vmax.f32 %v674_v16, %v832_v27 }
 0x160   :  { %v961_v42 = vmax.f32 %v676_v23, %v833_v30  ;;  %v834_v43 = vmul.f32 0.01, %v423_v31  ;;  %v682_v44 = vadd.f32 %v681_v39, %v3524_v7  ;;  %2791 = vmatprep.subr.bf16.mxu0 %v2935_v60  ;;  %2839 = vmatprep.subr.bf16.mxu1 %v2935_v60 }
 0x161   :  { %v836_v46 = vmul.f32 0.01, %v680_v37  ;;  %v835_v47 = vmul.f32 0.01, %v425_v38  ;;  %v428_v48 = vpop.f32.mrb[38].mxu0  ;;  %1260 = vmatprep.mubr.f32.mxu0 %v959_v36  ;;  %2793 = vmatpush1.bf16.msra.mxu0 %v2792_v40 }
 0x162   :  { %v837_v50 = vmul.f32 0.01, %v682_v44  ;;  %v429_v51 = vadd.f32 %v428_v48, %v3517_v4  ;;  %v685_v52 = vpop.f32.mrb[38].mxu1  ;;  %1721 = vmatprep.mubr.f32.mxu1 %v961_v42  ;;  %v430_v53 = vpop.f32.mrb[39].mxu0  ;;  %1261 = vmatmul.mubr.f32.gmra.mrb[98].mxu0 %v958_v41  ;;  %v962_v61 = vmax.f32 %v423_v31, %v834_v43 }
 0x163   :  { %v963_v56 = vmax.f32 %v425_v38, %v835_v47  ;;  %v686_v57 = vadd.f32 %v685_v52, %v3519_v5  ;;  %v431_v58 = vadd.f32 %v430_v53, %v3522_v6  ;;  %v687_v59 = vpop.f32.mrb[39].mxu1  ;;  %1722 = vmatmul.mubr.f32.gmra.mrb[98].mxu1 %v960_v45  ;;  %v964_v9 = vmax.f32 %v680_v37, %v836_v46 }
 0x164   :  { %v965_v62 = vmax.f32 %v682_v44, %v837_v50  ;;  %v838_v1 = vmul.f32 0.01, %v429_v51  ;;  %v688_v2 = vadd.f32 %v687_v59, %v3524_v7  ;;  %2841 = vmatpush1.bf16.msra.mxu1 %v2840_v49  ;;  %2794 = vmatprep.subr.bf16.mxu0 %v2935_v60 }
 0x165   :  { %v840_v10 = vmul.f32 0.01, %v686_v57  ;;  %v839_v11 = vmul.f32 0.01, %v431_v58  ;;  %v434_v12 = vpop.f32.mrb[40].mxu0  ;;  %1266 = vmatprep.mubr.f32.mxu0 %v963_v56  ;;  %2842 = vmatprep.subr.bf16.mxu1 %v2935_v60 }
 0x166   :  { %v841_v14 = vmul.f32 0.01, %v688_v2  ;;  %v435_v15 = vadd.f32 %v434_v12, %v3517_v4  ;;  %v691_v16 = vpop.f32.mrb[40].mxu1  ;;  %1727 = vmatprep.mubr.f32.mxu1 %v965_v62  ;;  %v436_v17 = vpop.f32.mrb[41].mxu0  ;;  %1267 = vmatmul.mubr.f32.gmra.mrb[100].mxu0 %v962_v61  ;;  %v966_v23 = vmax.f32 %v429_v51, %v838_v1 }
 0x167   :  { %v967_v18 = vmax.f32 %v431_v58, %v839_v11  ;;  %v692_v19 = vadd.f32 %v691_v16, %v3519_v5  ;;  %v437_v20 = vadd.f32 %v436_v17, %v3522_v6  ;;  %v693_v21 = vpop.f32.mrb[41].mxu1  ;;  %1728 = vmatmul.mubr.f32.gmra.mrb[100].mxu1 %v964_v9  ;;  %v968_v27 = vmax.f32 %v686_v57, %v840_v10 }
 0x168   :  { %v969_v24 = vmax.f32 %v688_v2, %v841_v14  ;;  %v842_v25 = vmul.f32 0.01, %v435_v15  ;;  %v694_v26 = vadd.f32 %v693_v21, %v3524_v7  ;;  %2796 = vmatpush1.bf16.msra.mxu0 %v2795_v13  ;;  %2844 = vmatpush1.bf16.msra.mxu1 %v2843_v22  ;;  %v1970_v21 = vld [vmem:[#allocation4 + $0xf0] sm:$0xff] }
 0x169   :  { %v844_v28 = vmul.f32 0.01, %v692_v19  ;;  %v843_v29 = vmul.f32 0.01, %v437_v20  ;;  %v440_v30 = vpop.f32.mrb[42].mxu0  ;;  %1272 = vmatprep.mubr.f32.mxu0 %v967_v18  ;;  %2797 = vmatprep.subr.bf16.mxu0 %v2935_v60 }
 0x16a   :  { %v845_v31 = vmul.f32 0.01, %v694_v26  ;;  %v441_v32 = vadd.f32 %v440_v30, %v3517_v4  ;;  %v697_v33 = vpop.f32.mrb[42].mxu1  ;;  %1733 = vmatprep.mubr.f32.mxu1 %v969_v24  ;;  %v442_v34 = vpop.f32.mrb[43].mxu0  ;;  %1273 = vmatmul.mubr.f32.gmra.mrb[102].mxu0 %v966_v23  ;;  %v970_v39 = vmax.f32 %v435_v15, %v842_v25 }
 0x16b   :  { %v971_v35 = vmax.f32 %v437_v20, %v843_v29  ;;  %v698_v36 = vadd.f32 %v697_v33, %v3519_v5  ;;  %v443_v37 = vadd.f32 %v442_v34, %v3522_v6  ;;  %v699_v38 = vpop.f32.mrb[43].mxu1  ;;  %1734 = vmatmul.mubr.f32.gmra.mrb[102].mxu1 %v968_v27  ;;  %v972_v43 = vmax.f32 %v692_v19, %v844_v28  ;;  %v2234_v27 = vld [vmem:[#allocation6 + $0xf0] sm:$0xff]  ;;  %v2235_v33 = vld [vmem:[#allocation6 + $0xf8] sm:$0xff] }
 0x16c   :  { %v973_v40 = vmax.f32 %v694_v26, %v845_v31  ;;  %v846_v41 = vmul.f32 0.01, %v441_v32  ;;  %v700_v42 = vadd.f32 %v699_v38, %v3524_v7  ;;  %2845 = vmatprep.subr.bf16.mxu1 %v2935_v60  ;;  %v1971_v26 = vld [vmem:[#allocation4 + $0xf8] sm:$0xff] }
 0x16d   :  { %v848_v44 = vmul.f32 0.01, %v698_v36  ;;  %v847_v45 = vmul.f32 0.01, %v443_v37  ;;  %v446_v46 = vpop.f32.mrb[44].mxu0  ;;  %1278 = vmatprep.mubr.f32.mxu0 %v971_v35 }
 0x16e   :  { %v849_v47 = vmul.f32 0.01, %v700_v42  ;;  %v447_v48 = vadd.f32 %v446_v46, %v3517_v4  ;;  %v703_v49 = vpop.f32.mrb[44].mxu1  ;;  %1739 = vmatprep.mubr.f32.mxu1 %v973_v40  ;;  %v448_v50 = vpop.f32.mrb[45].mxu0  ;;  %1279 = vmatmul.mubr.f32.gmra.mrb[104].mxu0 %v970_v39  ;;  %v974_v55 = vmax.f32 %v441_v32, %v846_v41 }
 0x16f   :  { %v975_v51 = vmax.f32 %v443_v37, %v847_v45  ;;  %v704_v52 = vadd.f32 %v703_v49, %v3519_v5  ;;  %v449_v53 = vadd.f32 %v448_v50, %v3522_v6  ;;  %v705_v54 = vpop.f32.mrb[45].mxu1  ;;  %1740 = vmatmul.mubr.f32.gmra.mrb[104].mxu1 %v972_v43  ;;  %v976_v60 = vmax.f32 %v698_v36, %v848_v44 }
 0x170   :  { %v977_v56 = vmax.f32 %v700_v42, %v849_v47  ;;  %v850_v57 = vmul.f32 0.01, %v447_v48  ;;  %v706_v58 = vadd.f32 %v705_v54, %v3524_v7  ;;  %v2798_v37 = vpack.c.bf16 %v1971_v26, %v1970_v21 }
 0x171   :  { %v852_v59 = vmul.f32 0.01, %v704_v52  ;;  %v851_v61 = vmul.f32 0.01, %v449_v53  ;;  %v452_v62 = vpop.f32.mrb[46].mxu0  ;;  %1284 = vmatprep.mubr.f32.mxu0 %v975_v51  ;;  %v2846_v42 = vpack.c.bf16 %v2235_v33, %v2234_v27 }
 0x172   :  { %v853_v1 = vmul.f32 0.01, %v706_v58  ;;  %v453_v2 = vadd.f32 %v452_v62, %v3517_v4  ;;  %v709_v0 = vpop.f32.mrb[46].mxu1  ;;  %1745 = vmatprep.mubr.f32.mxu1 %v977_v56  ;;  %v454_v8 = vpop.f32.mrb[47].mxu0  ;;  %1285 = vmatmul.mubr.f32.gmra.mrb[106].mxu0 %v974_v55  ;;  %v978_v13 = vmax.f32 %v447_v48, %v850_v57 }
 0x173   :  { %v979_v9 = vmax.f32 %v449_v53, %v851_v61  ;;  %v710_v10 = vadd.f32 %v709_v0, %v3519_v5  ;;  %v455_v11 = vadd.f32 %v454_v8, %v3522_v6  ;;  %v711_v12 = vpop.f32.mrb[47].mxu1  ;;  %1746 = vmatmul.mubr.f32.gmra.mrb[106].mxu1 %v976_v60  ;;  %v980_v17 = vmax.f32 %v704_v52, %v852_v59 }
 0x174   :  { %v981_v14 = vmax.f32 %v706_v58, %v853_v1  ;;  %v854_v15 = vmul.f32 0.01, %v453_v2  ;;  %v712_v16 = vadd.f32 %v711_v12, %v3524_v7  ;;  %2799 = vmatpush1.bf16.msra.mxu0 %v2798_v37  ;;  %2847 = vmatpush1.bf16.msra.mxu1 %v2846_v42 }
 0x175   :  { %v856_v18 = vmul.f32 0.01, %v710_v10  ;;  %v855_v19 = vmul.f32 0.01, %v455_v11  ;;  %v458_v20 = vpop.f32.mrb[48].mxu0  ;;  %1290 = vmatprep.mubr.f32.mxu0 %v979_v9 }
 0x176   :  { %v857_v22 = vmul.f32 0.01, %v712_v16  ;;  %v459_v23 = vadd.f32 %v458_v20, %v3517_v4  ;;  %v715_v24 = vpop.f32.mrb[48].mxu1  ;;  %1751 = vmatprep.mubr.f32.mxu1 %v981_v14  ;;  %v460_v25 = vpop.f32.mrb[49].mxu0  ;;  %1291 = vmatmul.mubr.f32.gmra.mrb[108].mxu0 %v978_v13  ;;  %v982_v28 = vmax.f32 %v453_v2, %v854_v15 }
 0x177   :  { %v983_v29 = vmax.f32 %v455_v11, %v855_v19  ;;  %v716_v30 = vadd.f32 %v715_v24, %v3519_v5  ;;  %v461_v31 = vadd.f32 %v460_v25, %v3522_v6  ;;  %v717_v32 = vpop.f32.mrb[49].mxu1  ;;  %1752 = vmatmul.mubr.f32.gmra.mrb[108].mxu1 %v980_v17  ;;  %v984_v38 = vmax.f32 %v710_v10, %v856_v18 }
 0x178   :  { %v985_v34 = vmax.f32 %v712_v16, %v857_v22  ;;  %v858_v35 = vmul.f32 0.01, %v459_v23  ;;  %v718_v36 = vadd.f32 %v717_v32, %v3524_v7 }
 0x179   :  { %v860_v39 = vmul.f32 0.01, %v716_v30  ;;  %v859_v40 = vmul.f32 0.01, %v461_v31  ;;  %v464_v41 = vpop.f32.mrb[50].mxu0  ;;  %1296 = vmatprep.mubr.f32.mxu0 %v983_v29 }
 0x17a   :  { %v861_v43 = vmul.f32 0.01, %v718_v36  ;;  %v465_v44 = vadd.f32 %v464_v41, %v3517_v4  ;;  %v721_v45 = vpop.f32.mrb[50].mxu1  ;;  %1757 = vmatprep.mubr.f32.mxu1 %v985_v34  ;;  %v466_v46 = vpop.f32.mrb[51].mxu0  ;;  %1297 = vmatmul.mubr.f32.gmra.mrb[110].mxu0 %v982_v28  ;;  %v986_v51 = vmax.f32 %v459_v23, %v858_v35 }
 0x17b   :  { %v987_v47 = vmax.f32 %v461_v31, %v859_v40  ;;  %v722_v48 = vadd.f32 %v721_v45, %v3519_v5  ;;  %v467_v49 = vadd.f32 %v466_v46, %v3522_v6  ;;  %v723_v50 = vpop.f32.mrb[51].mxu1  ;;  %1758 = vmatmul.mubr.f32.gmra.mrb[110].mxu1 %v984_v38  ;;  %v988_v55 = vmax.f32 %v716_v30, %v860_v39 }
 0x17c   :  { %v989_v52 = vmax.f32 %v718_v36, %v861_v43  ;;  %v862_v53 = vmul.f32 0.01, %v465_v44  ;;  %v724_v54 = vadd.f32 %v723_v50, %v3524_v7 }
 0x17d   :  { %v864_v56 = vmul.f32 0.01, %v722_v48  ;;  %v863_v57 = vmul.f32 0.01, %v467_v49  ;;  %v470_v58 = vpop.f32.mrb[52].mxu0  ;;  %1302 = vmatprep.mubr.f32.mxu0 %v987_v47 }
 0x17e   :  { %v865_v60 = vmul.f32 0.01, %v724_v54  ;;  %v471_v59 = vadd.f32 %v470_v58, %v3517_v4  ;;  %v727_v61 = vpop.f32.mrb[52].mxu1  ;;  %1763 = vmatprep.mubr.f32.mxu1 %v989_v52  ;;  %v472_v62 = vpop.f32.mrb[53].mxu0  ;;  %1303 = vmatmul.mubr.f32.gmra.mrb[112].mxu0 %v986_v51  ;;  %v990_v9 = vmax.f32 %v465_v44, %v862_v53 }
 0x17f   :  { %v991_v1 = vmax.f32 %v467_v49, %v863_v57  ;;  %v728_v2 = vadd.f32 %v727_v61, %v3519_v5  ;;  %v473_v0 = vadd.f32 %v472_v62, %v3522_v6  ;;  %v729_v8 = vpop.f32.mrb[53].mxu1  ;;  %1764 = vmatmul.mubr.f32.gmra.mrb[112].mxu1 %v988_v55  ;;  %v992_v13 = vmax.f32 %v722_v48, %v864_v56 }
 0x180   :  { %v993_v10 = vmax.f32 %v724_v54, %v865_v60  ;;  %v866_v11 = vmul.f32 0.01, %v471_v59  ;;  %v730_v12 = vadd.f32 %v729_v8, %v3524_v7 }
 0x181   :  { %v868_v14 = vmul.f32 0.01, %v728_v2  ;;  %v867_v15 = vmul.f32 0.01, %v473_v0  ;;  %v476_v16 = vpop.f32.mrb[54].mxu0  ;;  %1308 = vmatprep.mubr.f32.mxu0 %v991_v1 }
 0x182   :  { %v869_v17 = vmul.f32 0.01, %v730_v12  ;;  %v477_v18 = vadd.f32 %v476_v16, %v3517_v4  ;;  %v733_v19 = vpop.f32.mrb[54].mxu1  ;;  %1769 = vmatprep.mubr.f32.mxu1 %v993_v10  ;;  %v478_v20 = vpop.f32.mrb[55].mxu0  ;;  %1309 = vmatmul.mubr.f32.gmra.mrb[114].mxu0 %v990_v9  ;;  %v994_v25 = vmax.f32 %v471_v59, %v866_v11 }
 0x183   :  { %v995_v21 = vmax.f32 %v473_v0, %v867_v15  ;;  %v734_v22 = vadd.f32 %v733_v19, %v3519_v5  ;;  %v479_v23 = vadd.f32 %v478_v20, %v3522_v6  ;;  %v735_v24 = vpop.f32.mrb[55].mxu1  ;;  %1770 = vmatmul.mubr.f32.gmra.mrb[114].mxu1 %v992_v13  ;;  %v996_v29 = vmax.f32 %v728_v2, %v868_v14 }
 0x184   :  { %v997_v26 = vmax.f32 %v730_v12, %v869_v17  ;;  %v870_v27 = vmul.f32 0.01, %v477_v18  ;;  %v736_v28 = vadd.f32 %v735_v24, %v3524_v7 }
 0x185   :  { %v872_v30 = vmul.f32 0.01, %v734_v22  ;;  %v871_v31 = vmul.f32 0.01, %v479_v23  ;;  %v482_v32 = vpop.f32.mrb[56].mxu0  ;;  %1314 = vmatprep.mubr.f32.mxu0 %v995_v21 }
 0x186   :  { %v873_v33 = vmul.f32 0.01, %v736_v28  ;;  %v483_v34 = vadd.f32 %v482_v32, %v3517_v4  ;;  %v739_v35 = vpop.f32.mrb[56].mxu1  ;;  %1775 = vmatprep.mubr.f32.mxu1 %v997_v26  ;;  %v484_v36 = vpop.f32.mrb[57].mxu0  ;;  %1315 = vmatmul.mubr.f32.gmra.mrb[116].mxu0 %v994_v25  ;;  %v998_v41 = vmax.f32 %v477_v18, %v870_v27 }
 0x187   :  { %v999_v37 = vmax.f32 %v479_v23, %v871_v31  ;;  %v740_v38 = vadd.f32 %v739_v35, %v3519_v5  ;;  %v485_v39 = vadd.f32 %v484_v36, %v3522_v6  ;;  %v741_v40 = vpop.f32.mrb[57].mxu1  ;;  %1776 = vmatmul.mubr.f32.gmra.mrb[116].mxu1 %v996_v29  ;;  %v1000_v45 = vmax.f32 %v734_v22, %v872_v30 }
 0x188   :  { %v1001_v42 = vmax.f32 %v736_v28, %v873_v33  ;;  %v874_v43 = vmul.f32 0.01, %v483_v34  ;;  %v742_v44 = vadd.f32 %v741_v40, %v3524_v7 }
 0x189   :  { %v876_v46 = vmul.f32 0.01, %v740_v38  ;;  %v875_v47 = vmul.f32 0.01, %v485_v39  ;;  %v488_v48 = vpop.f32.mrb[58].mxu0  ;;  %1320 = vmatprep.mubr.f32.mxu0 %v999_v37 }
 0x18a   :  { %v877_v49 = vmul.f32 0.01, %v742_v44  ;;  %v489_v50 = vadd.f32 %v488_v48, %v3517_v4  ;;  %v745_v51 = vpop.f32.mrb[58].mxu1  ;;  %1781 = vmatprep.mubr.f32.mxu1 %v1001_v42  ;;  %v490_v52 = vpop.f32.mrb[59].mxu0  ;;  %1321 = vmatmul.mubr.f32.gmra.mrb[118].mxu0 %v998_v41  ;;  %v1002_v57 = vmax.f32 %v483_v34, %v874_v43 }
 0x18b   :  { %v1003_v53 = vmax.f32 %v485_v39, %v875_v47  ;;  %v746_v54 = vadd.f32 %v745_v51, %v3519_v5  ;;  %v491_v55 = vadd.f32 %v490_v52, %v3522_v6  ;;  %v747_v56 = vpop.f32.mrb[59].mxu1  ;;  %1782 = vmatmul.mubr.f32.gmra.mrb[118].mxu1 %v1000_v45  ;;  %v1004_v61 = vmax.f32 %v740_v38, %v876_v46 }
 0x18c   :  { %v1005_v58 = vmax.f32 %v742_v44, %v877_v49  ;;  %v878_v60 = vmul.f32 0.01, %v489_v50  ;;  %v748_v59 = vadd.f32 %v747_v56, %v3524_v7 }
 0x18d   :  { %v880_v62 = vmul.f32 0.01, %v746_v54  ;;  %v879_v1 = vmul.f32 0.01, %v491_v55  ;;  %v494_v2 = vpop.f32.mrb[60].mxu0  ;;  %1326 = vmatprep.mubr.f32.mxu0 %v1003_v53 }
 0x18e   :  { %v881_v0 = vmul.f32 0.01, %v748_v59  ;;  %v495_v8 = vadd.f32 %v494_v2, %v3517_v4  ;;  %v751_v9 = vpop.f32.mrb[60].mxu1  ;;  %1787 = vmatprep.mubr.f32.mxu1 %v1005_v58  ;;  %v496_v10 = vpop.f32.mrb[61].mxu0  ;;  %1327 = vmatmul.mubr.f32.gmra.mrb[120].mxu0 %v1002_v57  ;;  %v1006_v15 = vmax.f32 %v489_v50, %v878_v60 }
 0x18f   :  { %v1007_v11 = vmax.f32 %v491_v55, %v879_v1  ;;  %v752_v12 = vadd.f32 %v751_v9, %v3519_v5  ;;  %v497_v13 = vadd.f32 %v496_v10, %v3522_v6  ;;  %v753_v14 = vpop.f32.mrb[61].mxu1  ;;  %1788 = vmatmul.mubr.f32.gmra.mrb[120].mxu1 %v1004_v61  ;;  %v1008_v19 = vmax.f32 %v746_v54, %v880_v62 }
 0x190   :  { %v1009_v16 = vmax.f32 %v748_v59, %v881_v0  ;;  %v882_v17 = vmul.f32 0.01, %v495_v8  ;;  %v754_v18 = vadd.f32 %v753_v14, %v3524_v7 }
 0x191   :  { %v884_v20 = vmul.f32 0.01, %v752_v12  ;;  %v883_v21 = vmul.f32 0.01, %v497_v13  ;;  %v500_v22 = vpop.f32.mrb[62].mxu0  ;;  %1332 = vmatprep.mubr.f32.mxu0 %v1007_v11 }
 0x192   :  { %v885_v23 = vmul.f32 0.01, %v754_v18  ;;  %v501_v24 = vadd.f32 %v500_v22, %v3517_v4  ;;  %v757_v25 = vpop.f32.mrb[62].mxu1  ;;  %1793 = vmatprep.mubr.f32.mxu1 %v1009_v16  ;;  %v502_v26 = vpop.f32.mrb[63].mxu0  ;;  %1333 = vmatmul.mubr.f32.gmra.mrb[122].mxu0 %v1006_v15  ;;  %v1010_v31 = vmax.f32 %v495_v8, %v882_v17 }
 0x193   :  { %v1011_v27 = vmax.f32 %v497_v13, %v883_v21  ;;  %v758_v28 = vadd.f32 %v757_v25, %v3519_v5  ;;  %v503_v29 = vadd.f32 %v502_v26, %v3522_v6  ;;  %v759_v30 = vpop.f32.mrb[63].mxu1  ;;  %1794 = vmatmul.mubr.f32.gmra.mrb[122].mxu1 %v1008_v19  ;;  %v1012_v35 = vmax.f32 %v752_v12, %v884_v20  ;;  %v1082_v6 = vld [vmem:[%s4100_s4] sm:$0x3] }
 0x194   :  { %v1013_v32 = vmax.f32 %v754_v18, %v885_v23  ;;  %v886_v33 = vmul.f32 0.01, %v501_v24  ;;  %v760_v34 = vadd.f32 %v759_v30, %v3524_v7  ;;  %v1543_v7 = vld [vmem:[%s4102_s6] sm:$0x3]  ;;  %v3691_v41 = vrot.slane %v1082_v6, %v3509_v63 }
 0x195   :  { %v888_v36 = vmul.f32 0.01, %v758_v28  ;;  %v887_v37 = vmul.f32 0.01, %v503_v29  ;;  %1338 = vmatprep.mubr.f32.mxu0 %v1011_v27  ;;  %v3694_v42 = vrot.slane %v1543_v7, %v3509_v63  ;;  %v3697_v43 = vrot.slane %v1082_v6, %v3514_v3 }
 0x196   :  { %v889_v4 = vmul.f32 0.01, %v760_v34  ;;  %1799 = vmatprep.mubr.f32.mxu1 %v1013_v32  ;;  %1339 = vmatmul.mubr.f32.gmra.mrb[124].mxu0 %v1010_v31  ;;  %v1014_v39 = vmax.f32 %v501_v24, %v886_v33  ;;  %v3700_v44 = vrot.slane %v1543_v7, %v3514_v3 }
 0x197   :  { %v1015_v38 = vmax.f32 %v503_v29, %v887_v37  ;;  %1800 = vmatmul.mubr.f32.gmra.mrb[124].mxu1 %v1012_v35  ;;  %v1016_v40 = vmax.f32 %v758_v28, %v888_v36 }
 0x198   :  { %v1017_v5 = vmax.f32 %v760_v34, %v889_v4 }
 0x199   :  { %1344 = vmatprep.mubr.f32.mxu0 %v1015_v38 }
 0x19a   :  { %1805 = vmatprep.mubr.f32.mxu1 %v1017_v5  ;;  %1345 = vmatmul.mubr.f32.gmra.mrb[126].mxu0 %v1014_v39 }
 0x19b   :  { %1806 = vmatmul.mubr.f32.gmra.mrb[126].mxu1 %v1016_v40 }
 0x1f1   :  { %v1160_v45 = vpop.f32.mrb[64].mxu0 }
 0x1f2   :  { %v1161_v46 = vadd.f32 %v1160_v45, %v3691_v41  ;;  %v1621_v47 = vpop.f32.mrb[64].mxu1  ;;  %v1162_v48 = vpop.f32.mrb[65].mxu0 }
 0x1f3   :  { %v1622_v49 = vadd.f32 %v1621_v47, %v3694_v42  ;;  %v1163_v50 = vadd.f32 %v1162_v48, %v3697_v43  ;;  %v1623_v51 = vpop.f32.mrb[65].mxu1 }
 0x1f4   :  { %v1351_v52 = vmul.f32 0.01, %v1161_v46  ;;  %v1624_v63 = vadd.f32 %v1623_v51, %v3700_v44 }
 0x1f5   :  { %v1812_v53 = vmul.f32 0.01, %v1622_v49  ;;  %v1352_v54 = vmul.f32 0.01, %v1163_v50  ;;  %v1166_v55 = vpop.f32.mrb[66].mxu0 }
 0x1f6   :  { %v1813_v56 = vmul.f32 0.01, %v1624_v63  ;;  %v1167_v3 = vadd.f32 %v1166_v55, %v3691_v41  ;;  %v1627_v57 = vpop.f32.mrb[66].mxu1  ;;  %v1168_v58 = vpop.f32.mrb[67].mxu0  ;;  %v1415_v1 = vmax.f32 %v1161_v46, %v1351_v52 }
 0x1f7   :  { %v1416_v60 = vmax.f32 %v1163_v50, %v1352_v54  ;;  %v1628_v59 = vadd.f32 %v1627_v57, %v3694_v42  ;;  %v1169_v61 = vadd.f32 %v1168_v58, %v3697_v43  ;;  %v1629_v62 = vpop.f32.mrb[67].mxu1  ;;  %v1876_v9 = vmax.f32 %v1622_v49, %v1812_v53 }
 0x1f8   :  { %v1877_v2 = vmax.f32 %v1624_v63, %v1813_v56  ;;  %v1353_v0 = vmul.f32 0.01, %v1167_v3  ;;  %v1630_v8 = vadd.f32 %v1629_v62, %v3700_v44 }
 0x1f9   :  { %v1814_v10 = vmul.f32 0.01, %v1628_v59  ;;  %v1354_v11 = vmul.f32 0.01, %v1169_v61  ;;  %v1172_v12 = vpop.f32.mrb[68].mxu0  ;;  %2043 = vmatprep.mubr.f32.mxu0 %v1416_v60 }
 0x1fa   :  { %v1815_v13 = vmul.f32 0.01, %v1630_v8  ;;  %v1173_v14 = vadd.f32 %v1172_v12, %v3691_v41  ;;  %v1633_v15 = vpop.f32.mrb[68].mxu1  ;;  %2307 = vmatprep.mubr.f32.mxu1 %v1877_v2  ;;  %v1174_v16 = vpop.f32.mrb[69].mxu0  ;;  %2044 = vmatmul.mubr.f32.vlgmr.msra.gmra.mrb[128].mxu0 %v1415_v1  ;;  %v1417_v21 = vmax.f32 %v1167_v3, %v1353_v0 }
 0x1fb   :  { %v1418_v17 = vmax.f32 %v1169_v61, %v1354_v11  ;;  %v1634_v18 = vadd.f32 %v1633_v15, %v3694_v42  ;;  %v1175_v19 = vadd.f32 %v1174_v16, %v3697_v43  ;;  %v1635_v20 = vpop.f32.mrb[69].mxu1  ;;  %2308 = vmatmul.mubr.f32.vlgmr.msra.gmra.mrb[128].mxu1 %v1876_v9  ;;  %v1878_v25 = vmax.f32 %v1628_v59, %v1814_v10 }
 0x1fc   :  { %v1879_v22 = vmax.f32 %v1630_v8, %v1815_v13  ;;  %v1355_v23 = vmul.f32 0.01, %v1173_v14  ;;  %v1636_v24 = vadd.f32 %v1635_v20, %v3700_v44 }
 0x1fd   :  { %v1816_v26 = vmul.f32 0.01, %v1634_v18  ;;  %v1356_v27 = vmul.f32 0.01, %v1175_v19  ;;  %v1178_v28 = vpop.f32.mrb[70].mxu0  ;;  %2048 = vmatprep.mubr.f32.mxu0 %v1418_v17 }
 0x1fe   :  { %v1817_v29 = vmul.f32 0.01, %v1636_v24  ;;  %v1179_v30 = vadd.f32 %v1178_v28, %v3691_v41  ;;  %v1639_v31 = vpop.f32.mrb[70].mxu1  ;;  %2312 = vmatprep.mubr.f32.mxu1 %v1879_v22  ;;  %v1180_v32 = vpop.f32.mrb[71].mxu0  ;;  %2049 = vmatmul.mubr.f32.gmra.mrb[130].mxu0 %v1417_v21  ;;  %v1419_v37 = vmax.f32 %v1173_v14, %v1355_v23 }
 0x1ff   :  { %v1420_v33 = vmax.f32 %v1175_v19, %v1356_v27  ;;  %v1640_v34 = vadd.f32 %v1639_v31, %v3694_v42  ;;  %v1181_v35 = vadd.f32 %v1180_v32, %v3697_v43  ;;  %v1641_v36 = vpop.f32.mrb[71].mxu1  ;;  %2313 = vmatmul.mubr.f32.gmra.mrb[130].mxu1 %v1878_v25  ;;  %v1880_v5 = vmax.f32 %v1634_v18, %v1816_v26 }
 0x200   :  { %v1881_v4 = vmax.f32 %v1636_v24, %v1817_v29  ;;  %v1357_v38 = vmul.f32 0.01, %v1179_v30  ;;  %v1642_v39 = vadd.f32 %v1641_v36, %v3700_v44 }
 0x201   :  { %v1818_v40 = vmul.f32 0.01, %v1640_v34  ;;  %v1358_v6 = vmul.f32 0.01, %v1181_v35  ;;  %v1184_v7 = vpop.f32.mrb[72].mxu0  ;;  %2053 = vmatprep.mubr.f32.mxu0 %v1420_v33 }
 0x202   :  { %v1819_v45 = vmul.f32 0.01, %v1642_v39  ;;  %v1185_v46 = vadd.f32 %v1184_v7, %v3691_v41  ;;  %v1645_v47 = vpop.f32.mrb[72].mxu1  ;;  %2317 = vmatprep.mubr.f32.mxu1 %v1881_v4  ;;  %v1186_v48 = vpop.f32.mrb[73].mxu0  ;;  %2054 = vmatmul.mubr.f32.gmra.mrb[132].mxu0 %v1419_v37  ;;  %v1421_v63 = vmax.f32 %v1179_v30, %v1357_v38 }
 0x203   :  { %v1422_v49 = vmax.f32 %v1181_v35, %v1358_v6  ;;  %v1646_v50 = vadd.f32 %v1645_v47, %v3694_v42  ;;  %v1187_v51 = vadd.f32 %v1186_v48, %v3697_v43  ;;  %v1647_v52 = vpop.f32.mrb[73].mxu1  ;;  %2318 = vmatmul.mubr.f32.gmra.mrb[132].mxu1 %v1880_v5  ;;  %v1882_v56 = vmax.f32 %v1640_v34, %v1818_v40 }
 0x204   :  { %v1883_v53 = vmax.f32 %v1642_v39, %v1819_v45  ;;  %v1359_v54 = vmul.f32 0.01, %v1185_v46  ;;  %v1648_v55 = vadd.f32 %v1647_v52, %v3700_v44 }
 0x205   :  { %v1820_v3 = vmul.f32 0.01, %v1646_v50  ;;  %v1360_v57 = vmul.f32 0.01, %v1187_v51  ;;  %v1190_v58 = vpop.f32.mrb[74].mxu0  ;;  %2058 = vmatprep.mubr.f32.mxu0 %v1422_v49 }
 0x206   :  { %v1821_v60 = vmul.f32 0.01, %v1648_v55  ;;  %v1191_v59 = vadd.f32 %v1190_v58, %v3691_v41  ;;  %v1651_v61 = vpop.f32.mrb[74].mxu1  ;;  %2322 = vmatprep.mubr.f32.mxu1 %v1883_v53  ;;  %v1192_v62 = vpop.f32.mrb[75].mxu0  ;;  %2059 = vmatmul.mubr.f32.gmra.mrb[134].mxu0 %v1421_v63  ;;  %v1423_v9 = vmax.f32 %v1185_v46, %v1359_v54 }
 0x207   :  { %v1424_v1 = vmax.f32 %v1187_v51, %v1360_v57  ;;  %v1652_v2 = vadd.f32 %v1651_v61, %v3694_v42  ;;  %v1193_v0 = vadd.f32 %v1192_v62, %v3697_v43  ;;  %v1653_v8 = vpop.f32.mrb[75].mxu1  ;;  %2323 = vmatmul.mubr.f32.gmra.mrb[134].mxu1 %v1882_v56  ;;  %v1884_v13 = vmax.f32 %v1646_v50, %v1820_v3 }
 0x208   :  { %v1885_v10 = vmax.f32 %v1648_v55, %v1821_v60  ;;  %v1361_v11 = vmul.f32 0.01, %v1191_v59  ;;  %v1654_v12 = vadd.f32 %v1653_v8, %v3700_v44 }
 0x209   :  { %v1822_v14 = vmul.f32 0.01, %v1652_v2  ;;  %v1362_v15 = vmul.f32 0.01, %v1193_v0  ;;  %v1196_v16 = vpop.f32.mrb[76].mxu0  ;;  %2063 = vmatprep.mubr.f32.mxu0 %v1424_v1 }
 0x20a   :  { %v1823_v17 = vmul.f32 0.01, %v1654_v12  ;;  %v1197_v18 = vadd.f32 %v1196_v16, %v3691_v41  ;;  %v1657_v19 = vpop.f32.mrb[76].mxu1  ;;  %2327 = vmatprep.mubr.f32.mxu1 %v1885_v10  ;;  %v1198_v20 = vpop.f32.mrb[77].mxu0  ;;  %2064 = vmatmul.mubr.f32.gmra.mrb[136].mxu0 %v1423_v9  ;;  %v1425_v25 = vmax.f32 %v1191_v59, %v1361_v11 }
 0x20b   :  { %v1426_v21 = vmax.f32 %v1193_v0, %v1362_v15  ;;  %v1658_v22 = vadd.f32 %v1657_v19, %v3694_v42  ;;  %v1199_v23 = vadd.f32 %v1198_v20, %v3697_v43  ;;  %v1659_v24 = vpop.f32.mrb[77].mxu1  ;;  %2328 = vmatmul.mubr.f32.gmra.mrb[136].mxu1 %v1884_v13  ;;  %v1886_v29 = vmax.f32 %v1652_v2, %v1822_v14 }
 0x20c   :  { %v1887_v26 = vmax.f32 %v1654_v12, %v1823_v17  ;;  %v1363_v27 = vmul.f32 0.01, %v1197_v18  ;;  %v1660_v28 = vadd.f32 %v1659_v24, %v3700_v44 }
 0x20d   :  { %v1824_v30 = vmul.f32 0.01, %v1658_v22  ;;  %v1364_v31 = vmul.f32 0.01, %v1199_v23  ;;  %v1202_v32 = vpop.f32.mrb[78].mxu0  ;;  %2068 = vmatprep.mubr.f32.mxu0 %v1426_v21 }
 0x20e   :  { %v1825_v33 = vmul.f32 0.01, %v1660_v28  ;;  %v1203_v34 = vadd.f32 %v1202_v32, %v3691_v41  ;;  %v1663_v35 = vpop.f32.mrb[78].mxu1  ;;  %2332 = vmatprep.mubr.f32.mxu1 %v1887_v26  ;;  %v1204_v36 = vpop.f32.mrb[79].mxu0  ;;  %2069 = vmatmul.mubr.f32.gmra.mrb[138].mxu0 %v1425_v25  ;;  %v1427_v5 = vmax.f32 %v1197_v18, %v1363_v27 }
 0x20f   :  { %v1428_v37 = vmax.f32 %v1199_v23, %v1364_v31  ;;  %v1664_v4 = vadd.f32 %v1663_v35, %v3694_v42  ;;  %v1205_v38 = vadd.f32 %v1204_v36, %v3697_v43  ;;  %v1665_v39 = vpop.f32.mrb[79].mxu1  ;;  %2333 = vmatmul.mubr.f32.gmra.mrb[138].mxu1 %v1886_v29  ;;  %v1888_v45 = vmax.f32 %v1658_v22, %v1824_v30 }
 0x210   :  { %v1889_v40 = vmax.f32 %v1660_v28, %v1825_v33  ;;  %v1365_v6 = vmul.f32 0.01, %v1203_v34  ;;  %v1666_v7 = vadd.f32 %v1665_v39, %v3700_v44 }
 0x211   :  { %v1826_v46 = vmul.f32 0.01, %v1664_v4  ;;  %v1366_v47 = vmul.f32 0.01, %v1205_v38  ;;  %v1208_v48 = vpop.f32.mrb[80].mxu0  ;;  %2073 = vmatprep.mubr.f32.mxu0 %v1428_v37 }
 0x212   :  { %v1827_v49 = vmul.f32 0.01, %v1666_v7  ;;  %v1209_v50 = vadd.f32 %v1208_v48, %v3691_v41  ;;  %v1669_v51 = vpop.f32.mrb[80].mxu1  ;;  %2337 = vmatprep.mubr.f32.mxu1 %v1889_v40  ;;  %v1210_v52 = vpop.f32.mrb[81].mxu0  ;;  %2074 = vmatmul.mubr.f32.gmra.mrb[140].mxu0 %v1427_v5  ;;  %v1429_v56 = vmax.f32 %v1203_v34, %v1365_v6 }
 0x213   :  { %v1430_v63 = vmax.f32 %v1205_v38, %v1366_v47  ;;  %v1670_v53 = vadd.f32 %v1669_v51, %v3694_v42  ;;  %v1211_v54 = vadd.f32 %v1210_v52, %v3697_v43  ;;  %v1671_v55 = vpop.f32.mrb[81].mxu1  ;;  %2338 = vmatmul.mubr.f32.gmra.mrb[140].mxu1 %v1888_v45  ;;  %v1890_v60 = vmax.f32 %v1664_v4, %v1826_v46 }
 0x214   :  { %v1891_v3 = vmax.f32 %v1666_v7, %v1827_v49  ;;  %v1367_v57 = vmul.f32 0.01, %v1209_v50  ;;  %v1672_v58 = vadd.f32 %v1671_v55, %v3700_v44 }
 0x215   :  { %v1828_v59 = vmul.f32 0.01, %v1670_v53  ;;  %v1368_v61 = vmul.f32 0.01, %v1211_v54  ;;  %v1214_v62 = vpop.f32.mrb[82].mxu0  ;;  %2078 = vmatprep.mubr.f32.mxu0 %v1430_v63 }
 0x216   :  { %v1829_v1 = vmul.f32 0.01, %v1672_v58  ;;  %v1215_v2 = vadd.f32 %v1214_v62, %v3691_v41  ;;  %v1675_v0 = vpop.f32.mrb[82].mxu1  ;;  %2342 = vmatprep.mubr.f32.mxu1 %v1891_v3  ;;  %v1216_v8 = vpop.f32.mrb[83].mxu0  ;;  %2079 = vmatmul.mubr.f32.gmra.mrb[142].mxu0 %v1429_v56  ;;  %v1431_v13 = vmax.f32 %v1209_v50, %v1367_v57 }
 0x217   :  { %v1432_v9 = vmax.f32 %v1211_v54, %v1368_v61  ;;  %v1676_v10 = vadd.f32 %v1675_v0, %v3694_v42  ;;  %v1217_v11 = vadd.f32 %v1216_v8, %v3697_v43  ;;  %v1677_v12 = vpop.f32.mrb[83].mxu1  ;;  %2343 = vmatmul.mubr.f32.gmra.mrb[142].mxu1 %v1890_v60  ;;  %v1892_v17 = vmax.f32 %v1670_v53, %v1828_v59 }
 0x218   :  { %v1893_v14 = vmax.f32 %v1672_v58, %v1829_v1  ;;  %v1369_v15 = vmul.f32 0.01, %v1215_v2  ;;  %v1678_v16 = vadd.f32 %v1677_v12, %v3700_v44 }
 0x219   :  { %v1830_v18 = vmul.f32 0.01, %v1676_v10  ;;  %v1370_v19 = vmul.f32 0.01, %v1217_v11  ;;  %v1220_v20 = vpop.f32.mrb[84].mxu0  ;;  %2083 = vmatprep.mubr.f32.mxu0 %v1432_v9 }
 0x21a   :  { %v1831_v21 = vmul.f32 0.01, %v1678_v16  ;;  %v1221_v22 = vadd.f32 %v1220_v20, %v3691_v41  ;;  %v1681_v23 = vpop.f32.mrb[84].mxu1  ;;  %2347 = vmatprep.mubr.f32.mxu1 %v1893_v14  ;;  %v1222_v24 = vpop.f32.mrb[85].mxu0  ;;  %2084 = vmatmul.mubr.f32.gmra.mrb[144].mxu0 %v1431_v13  ;;  %v1433_v29 = vmax.f32 %v1215_v2, %v1369_v15 }
 0x21b   :  { %v1434_v25 = vmax.f32 %v1217_v11, %v1370_v19  ;;  %v1682_v26 = vadd.f32 %v1681_v23, %v3694_v42  ;;  %v1223_v27 = vadd.f32 %v1222_v24, %v3697_v43  ;;  %v1683_v28 = vpop.f32.mrb[85].mxu1  ;;  %2348 = vmatmul.mubr.f32.gmra.mrb[144].mxu1 %v1892_v17  ;;  %v1894_v33 = vmax.f32 %v1676_v10, %v1830_v18 }
 0x21c   :  { %v1895_v30 = vmax.f32 %v1678_v16, %v1831_v21  ;;  %v1371_v31 = vmul.f32 0.01, %v1221_v22  ;;  %v1684_v32 = vadd.f32 %v1683_v28, %v3700_v44 }
 0x21d   :  { %v1832_v34 = vmul.f32 0.01, %v1682_v26  ;;  %v1372_v35 = vmul.f32 0.01, %v1223_v27  ;;  %v1226_v36 = vpop.f32.mrb[86].mxu0  ;;  %2088 = vmatprep.mubr.f32.mxu0 %v1434_v25 }
 0x21e   :  { %v1833_v37 = vmul.f32 0.01, %v1684_v32  ;;  %v1227_v4 = vadd.f32 %v1226_v36, %v3691_v41  ;;  %v1687_v38 = vpop.f32.mrb[86].mxu1  ;;  %2352 = vmatprep.mubr.f32.mxu1 %v1895_v30  ;;  %v1228_v39 = vpop.f32.mrb[87].mxu0  ;;  %2089 = vmatmul.mubr.f32.gmra.mrb[146].mxu0 %v1433_v29  ;;  %v1435_v45 = vmax.f32 %v1221_v22, %v1371_v31 }
 0x21f   :  { %v1436_v5 = vmax.f32 %v1223_v27, %v1372_v35  ;;  %v1688_v40 = vadd.f32 %v1687_v38, %v3694_v42  ;;  %v1229_v6 = vadd.f32 %v1228_v39, %v3697_v43  ;;  %v1689_v7 = vpop.f32.mrb[87].mxu1  ;;  %2353 = vmatmul.mubr.f32.gmra.mrb[146].mxu1 %v1894_v33  ;;  %v1896_v49 = vmax.f32 %v1682_v26, %v1832_v34 }
 0x220   :  { %v1897_v46 = vmax.f32 %v1684_v32, %v1833_v37  ;;  %v1373_v47 = vmul.f32 0.01, %v1227_v4  ;;  %v1690_v48 = vadd.f32 %v1689_v7, %v3700_v44 }
 0x221   :  { %v1834_v50 = vmul.f32 0.01, %v1688_v40  ;;  %v1374_v51 = vmul.f32 0.01, %v1229_v6  ;;  %v1232_v52 = vpop.f32.mrb[88].mxu0  ;;  %2093 = vmatprep.mubr.f32.mxu0 %v1436_v5 }
 0x222   :  { %v1835_v63 = vmul.f32 0.01, %v1690_v48  ;;  %v1233_v53 = vadd.f32 %v1232_v52, %v3691_v41  ;;  %v1693_v54 = vpop.f32.mrb[88].mxu1  ;;  %2357 = vmatprep.mubr.f32.mxu1 %v1897_v46  ;;  %v1234_v55 = vpop.f32.mrb[89].mxu0  ;;  %2094 = vmatmul.mubr.f32.gmra.mrb[148].mxu0 %v1435_v45  ;;  %v1437_v60 = vmax.f32 %v1227_v4, %v1373_v47 }
 0x223   :  { %v1438_v56 = vmax.f32 %v1229_v6, %v1374_v51  ;;  %v1694_v3 = vadd.f32 %v1693_v54, %v3694_v42  ;;  %v1235_v57 = vadd.f32 %v1234_v55, %v3697_v43  ;;  %v1695_v58 = vpop.f32.mrb[89].mxu1  ;;  %2358 = vmatmul.mubr.f32.gmra.mrb[148].mxu1 %v1896_v49  ;;  %v1898_v1 = vmax.f32 %v1688_v40, %v1834_v50 }
 0x224   :  { %v1899_v59 = vmax.f32 %v1690_v48, %v1835_v63  ;;  %v1375_v61 = vmul.f32 0.01, %v1233_v53  ;;  %v1696_v62 = vadd.f32 %v1695_v58, %v3700_v44 }
 0x225   :  { %v1836_v2 = vmul.f32 0.01, %v1694_v3  ;;  %v1376_v0 = vmul.f32 0.01, %v1235_v57  ;;  %v1238_v8 = vpop.f32.mrb[90].mxu0  ;;  %2098 = vmatprep.mubr.f32.mxu0 %v1438_v56 }
 0x226   :  { %v1837_v9 = vmul.f32 0.01, %v1696_v62  ;;  %v1239_v10 = vadd.f32 %v1238_v8, %v3691_v41  ;;  %v1699_v11 = vpop.f32.mrb[90].mxu1  ;;  %2362 = vmatprep.mubr.f32.mxu1 %v1899_v59  ;;  %v1240_v12 = vpop.f32.mrb[91].mxu0  ;;  %2099 = vmatmul.mubr.f32.gmra.mrb[150].mxu0 %v1437_v60  ;;  %v1439_v17 = vmax.f32 %v1233_v53, %v1375_v61 }
 0x227   :  { %v1440_v13 = vmax.f32 %v1235_v57, %v1376_v0  ;;  %v1700_v14 = vadd.f32 %v1699_v11, %v3694_v42  ;;  %v1241_v15 = vadd.f32 %v1240_v12, %v3697_v43  ;;  %v1701_v16 = vpop.f32.mrb[91].mxu1  ;;  %2363 = vmatmul.mubr.f32.gmra.mrb[150].mxu1 %v1898_v1  ;;  %v1900_v21 = vmax.f32 %v1694_v3, %v1836_v2 }
 0x228   :  { %v1901_v18 = vmax.f32 %v1696_v62, %v1837_v9  ;;  %v1377_v19 = vmul.f32 0.01, %v1239_v10  ;;  %v1702_v20 = vadd.f32 %v1701_v16, %v3700_v44 }
 0x229   :  { %v1838_v22 = vmul.f32 0.01, %v1700_v14  ;;  %v1378_v23 = vmul.f32 0.01, %v1241_v15  ;;  %v1244_v24 = vpop.f32.mrb[92].mxu0  ;;  %2103 = vmatprep.mubr.f32.mxu0 %v1440_v13 }
 0x22a   :  { %v1839_v25 = vmul.f32 0.01, %v1702_v20  ;;  %v1245_v26 = vadd.f32 %v1244_v24, %v3691_v41  ;;  %v1705_v27 = vpop.f32.mrb[92].mxu1  ;;  %2367 = vmatprep.mubr.f32.mxu1 %v1901_v18  ;;  %v1246_v28 = vpop.f32.mrb[93].mxu0  ;;  %2104 = vmatmul.mubr.f32.gmra.mrb[152].mxu0 %v1439_v17  ;;  %v1441_v33 = vmax.f32 %v1239_v10, %v1377_v19 }
 0x22b   :  { %v1442_v29 = vmax.f32 %v1241_v15, %v1378_v23  ;;  %v1706_v30 = vadd.f32 %v1705_v27, %v3694_v42  ;;  %v1247_v31 = vadd.f32 %v1246_v28, %v3697_v43  ;;  %v1707_v32 = vpop.f32.mrb[93].mxu1  ;;  %2368 = vmatmul.mubr.f32.gmra.mrb[152].mxu1 %v1900_v21  ;;  %v1902_v37 = vmax.f32 %v1700_v14, %v1838_v22 }
 0x22c   :  { %v1903_v34 = vmax.f32 %v1702_v20, %v1839_v25  ;;  %v1379_v35 = vmul.f32 0.01, %v1245_v26  ;;  %v1708_v36 = vadd.f32 %v1707_v32, %v3700_v44 }
 0x22d   :  { %v1840_v4 = vmul.f32 0.01, %v1706_v30  ;;  %v1380_v38 = vmul.f32 0.01, %v1247_v31  ;;  %v1250_v39 = vpop.f32.mrb[94].mxu0  ;;  %2108 = vmatprep.mubr.f32.mxu0 %v1442_v29 }
 0x22e   :  { %v1841_v5 = vmul.f32 0.01, %v1708_v36  ;;  %v1251_v40 = vadd.f32 %v1250_v39, %v3691_v41  ;;  %v1711_v6 = vpop.f32.mrb[94].mxu1  ;;  %2372 = vmatprep.mubr.f32.mxu1 %v1903_v34  ;;  %v1252_v7 = vpop.f32.mrb[95].mxu0  ;;  %2109 = vmatmul.mubr.f32.gmra.mrb[154].mxu0 %v1441_v33  ;;  %v1443_v49 = vmax.f32 %v1245_v26, %v1379_v35 }
 0x22f   :  { %v1444_v45 = vmax.f32 %v1247_v31, %v1380_v38  ;;  %v1712_v46 = vadd.f32 %v1711_v6, %v3694_v42  ;;  %v1253_v47 = vadd.f32 %v1252_v7, %v3697_v43  ;;  %v1713_v48 = vpop.f32.mrb[95].mxu1  ;;  %2373 = vmatmul.mubr.f32.gmra.mrb[154].mxu1 %v1902_v37  ;;  %v1904_v63 = vmax.f32 %v1706_v30, %v1840_v4 }
 0x230   :  { %v1905_v50 = vmax.f32 %v1708_v36, %v1841_v5  ;;  %v1381_v51 = vmul.f32 0.01, %v1251_v40  ;;  %v1714_v52 = vadd.f32 %v1713_v48, %v3700_v44 }
 0x231   :  { %v1842_v53 = vmul.f32 0.01, %v1712_v46  ;;  %v1382_v54 = vmul.f32 0.01, %v1253_v47  ;;  %v1256_v55 = vpop.f32.mrb[96].mxu0  ;;  %2113 = vmatprep.mubr.f32.mxu0 %v1444_v45 }
 0x232   :  { %v1843_v56 = vmul.f32 0.01, %v1714_v52  ;;  %v1257_v3 = vadd.f32 %v1256_v55, %v3691_v41  ;;  %v1717_v57 = vpop.f32.mrb[96].mxu1  ;;  %2377 = vmatprep.mubr.f32.mxu1 %v1905_v50  ;;  %v1258_v58 = vpop.f32.mrb[97].mxu0  ;;  %2114 = vmatmul.mubr.f32.gmra.mrb[156].mxu0 %v1443_v49  ;;  %v1445_v1 = vmax.f32 %v1251_v40, %v1381_v51 }
 0x233   :  { %v1446_v60 = vmax.f32 %v1253_v47, %v1382_v54  ;;  %v1718_v59 = vadd.f32 %v1717_v57, %v3694_v42  ;;  %v1259_v61 = vadd.f32 %v1258_v58, %v3697_v43  ;;  %v1719_v62 = vpop.f32.mrb[97].mxu1  ;;  %2378 = vmatmul.mubr.f32.gmra.mrb[156].mxu1 %v1904_v63  ;;  %v1906_v9 = vmax.f32 %v1712_v46, %v1842_v53 }
 0x234   :  { %v1907_v2 = vmax.f32 %v1714_v52, %v1843_v56  ;;  %v1383_v0 = vmul.f32 0.01, %v1257_v3  ;;  %v1720_v8 = vadd.f32 %v1719_v62, %v3700_v44 }
 0x235   :  { %v1844_v10 = vmul.f32 0.01, %v1718_v59  ;;  %v1384_v11 = vmul.f32 0.01, %v1259_v61  ;;  %v1262_v12 = vpop.f32.mrb[98].mxu0  ;;  %2118 = vmatprep.mubr.f32.mxu0 %v1446_v60 }
 0x236   :  { %v1845_v13 = vmul.f32 0.01, %v1720_v8  ;;  %v1263_v14 = vadd.f32 %v1262_v12, %v3691_v41  ;;  %v1723_v15 = vpop.f32.mrb[98].mxu1  ;;  %2382 = vmatprep.mubr.f32.mxu1 %v1907_v2  ;;  %v1264_v16 = vpop.f32.mrb[99].mxu0  ;;  %2119 = vmatmul.mubr.f32.gmra.mrb[158].mxu0 %v1445_v1  ;;  %v1447_v21 = vmax.f32 %v1257_v3, %v1383_v0 }
 0x237   :  { %v1448_v17 = vmax.f32 %v1259_v61, %v1384_v11  ;;  %v1724_v18 = vadd.f32 %v1723_v15, %v3694_v42  ;;  %v1265_v19 = vadd.f32 %v1264_v16, %v3697_v43  ;;  %v1725_v20 = vpop.f32.mrb[99].mxu1  ;;  %2383 = vmatmul.mubr.f32.gmra.mrb[158].mxu1 %v1906_v9  ;;  %v1908_v25 = vmax.f32 %v1718_v59, %v1844_v10 }
 0x238   :  { %v1909_v22 = vmax.f32 %v1720_v8, %v1845_v13  ;;  %v1385_v23 = vmul.f32 0.01, %v1263_v14  ;;  %v1726_v24 = vadd.f32 %v1725_v20, %v3700_v44 }
 0x239   :  { %v1846_v26 = vmul.f32 0.01, %v1724_v18  ;;  %v1386_v27 = vmul.f32 0.01, %v1265_v19  ;;  %v1268_v28 = vpop.f32.mrb[100].mxu0  ;;  %2123 = vmatprep.mubr.f32.mxu0 %v1448_v17 }
 0x23a   :  { %v1847_v29 = vmul.f32 0.01, %v1726_v24  ;;  %v1269_v30 = vadd.f32 %v1268_v28, %v3691_v41  ;;  %v1729_v31 = vpop.f32.mrb[100].mxu1  ;;  %2387 = vmatprep.mubr.f32.mxu1 %v1909_v22  ;;  %v1270_v32 = vpop.f32.mrb[101].mxu0  ;;  %2124 = vmatmul.mubr.f32.gmra.mrb[160].mxu0 %v1447_v21  ;;  %v1449_v37 = vmax.f32 %v1263_v14, %v1385_v23 }
 0x23b   :  { %v1450_v33 = vmax.f32 %v1265_v19, %v1386_v27  ;;  %v1730_v34 = vadd.f32 %v1729_v31, %v3694_v42  ;;  %v1271_v35 = vadd.f32 %v1270_v32, %v3697_v43  ;;  %v1731_v36 = vpop.f32.mrb[101].mxu1  ;;  %2388 = vmatmul.mubr.f32.gmra.mrb[160].mxu1 %v1908_v25  ;;  %v1910_v5 = vmax.f32 %v1724_v18, %v1846_v26 }
 0x23c   :  { %v1911_v4 = vmax.f32 %v1726_v24, %v1847_v29  ;;  %v1387_v38 = vmul.f32 0.01, %v1269_v30  ;;  %v1732_v39 = vadd.f32 %v1731_v36, %v3700_v44 }
 0x23d   :  { %v1848_v40 = vmul.f32 0.01, %v1730_v34  ;;  %v1388_v6 = vmul.f32 0.01, %v1271_v35  ;;  %v1274_v7 = vpop.f32.mrb[102].mxu0  ;;  %2128 = vmatprep.mubr.f32.mxu0 %v1450_v33 }
 0x23e   :  { %v1849_v45 = vmul.f32 0.01, %v1732_v39  ;;  %v1275_v46 = vadd.f32 %v1274_v7, %v3691_v41  ;;  %v1735_v47 = vpop.f32.mrb[102].mxu1  ;;  %2392 = vmatprep.mubr.f32.mxu1 %v1911_v4  ;;  %v1276_v48 = vpop.f32.mrb[103].mxu0  ;;  %2129 = vmatmul.mubr.f32.gmra.mrb[162].mxu0 %v1449_v37  ;;  %v1451_v63 = vmax.f32 %v1269_v30, %v1387_v38 }
 0x23f   :  { %v1452_v49 = vmax.f32 %v1271_v35, %v1388_v6  ;;  %v1736_v50 = vadd.f32 %v1735_v47, %v3694_v42  ;;  %v1277_v51 = vadd.f32 %v1276_v48, %v3697_v43  ;;  %v1737_v52 = vpop.f32.mrb[103].mxu1  ;;  %2393 = vmatmul.mubr.f32.gmra.mrb[162].mxu1 %v1910_v5  ;;  %v1912_v56 = vmax.f32 %v1730_v34, %v1848_v40 }
 0x240   :  { %v1913_v53 = vmax.f32 %v1732_v39, %v1849_v45  ;;  %v1389_v54 = vmul.f32 0.01, %v1275_v46  ;;  %v1738_v55 = vadd.f32 %v1737_v52, %v3700_v44 }
 0x241   :  { %v1850_v3 = vmul.f32 0.01, %v1736_v50  ;;  %v1390_v57 = vmul.f32 0.01, %v1277_v51  ;;  %v1280_v58 = vpop.f32.mrb[104].mxu0  ;;  %2133 = vmatprep.mubr.f32.mxu0 %v1452_v49 }
 0x242   :  { %v1851_v60 = vmul.f32 0.01, %v1738_v55  ;;  %v1281_v59 = vadd.f32 %v1280_v58, %v3691_v41  ;;  %v1741_v61 = vpop.f32.mrb[104].mxu1  ;;  %2397 = vmatprep.mubr.f32.mxu1 %v1913_v53  ;;  %v1282_v62 = vpop.f32.mrb[105].mxu0  ;;  %2134 = vmatmul.mubr.f32.gmra.mrb[164].mxu0 %v1451_v63  ;;  %v1453_v9 = vmax.f32 %v1275_v46, %v1389_v54 }
 0x243   :  { %v1454_v1 = vmax.f32 %v1277_v51, %v1390_v57  ;;  %v1742_v2 = vadd.f32 %v1741_v61, %v3694_v42  ;;  %v1283_v0 = vadd.f32 %v1282_v62, %v3697_v43  ;;  %v1743_v8 = vpop.f32.mrb[105].mxu1  ;;  %2398 = vmatmul.mubr.f32.gmra.mrb[164].mxu1 %v1912_v56  ;;  %v1914_v13 = vmax.f32 %v1736_v50, %v1850_v3 }
 0x244   :  { %v1915_v10 = vmax.f32 %v1738_v55, %v1851_v60  ;;  %v1391_v11 = vmul.f32 0.01, %v1281_v59  ;;  %v1744_v12 = vadd.f32 %v1743_v8, %v3700_v44 }
 0x245   :  { %v1852_v14 = vmul.f32 0.01, %v1742_v2  ;;  %v1392_v15 = vmul.f32 0.01, %v1283_v0  ;;  %v1286_v16 = vpop.f32.mrb[106].mxu0  ;;  %2138 = vmatprep.mubr.f32.mxu0 %v1454_v1 }
 0x246   :  { %v1853_v17 = vmul.f32 0.01, %v1744_v12  ;;  %v1287_v18 = vadd.f32 %v1286_v16, %v3691_v41  ;;  %v1747_v19 = vpop.f32.mrb[106].mxu1  ;;  %2402 = vmatprep.mubr.f32.mxu1 %v1915_v10  ;;  %v1288_v20 = vpop.f32.mrb[107].mxu0  ;;  %2139 = vmatmul.mubr.f32.gmra.mrb[166].mxu0 %v1453_v9  ;;  %v1455_v25 = vmax.f32 %v1281_v59, %v1391_v11 }
 0x247   :  { %v1456_v21 = vmax.f32 %v1283_v0, %v1392_v15  ;;  %v1748_v22 = vadd.f32 %v1747_v19, %v3694_v42  ;;  %v1289_v23 = vadd.f32 %v1288_v20, %v3697_v43  ;;  %v1749_v24 = vpop.f32.mrb[107].mxu1  ;;  %2403 = vmatmul.mubr.f32.gmra.mrb[166].mxu1 %v1914_v13  ;;  %v1916_v29 = vmax.f32 %v1742_v2, %v1852_v14 }
 0x248   :  { %v1917_v26 = vmax.f32 %v1744_v12, %v1853_v17  ;;  %v1393_v27 = vmul.f32 0.01, %v1287_v18  ;;  %v1750_v28 = vadd.f32 %v1749_v24, %v3700_v44 }
 0x249   :  { %v1854_v30 = vmul.f32 0.01, %v1748_v22  ;;  %v1394_v31 = vmul.f32 0.01, %v1289_v23  ;;  %v1292_v32 = vpop.f32.mrb[108].mxu0  ;;  %2143 = vmatprep.mubr.f32.mxu0 %v1456_v21 }
 0x24a   :  { %v1855_v33 = vmul.f32 0.01, %v1750_v28  ;;  %v1293_v34 = vadd.f32 %v1292_v32, %v3691_v41  ;;  %v1753_v35 = vpop.f32.mrb[108].mxu1  ;;  %2407 = vmatprep.mubr.f32.mxu1 %v1917_v26  ;;  %v1294_v36 = vpop.f32.mrb[109].mxu0  ;;  %2144 = vmatmul.mubr.f32.gmra.mrb[168].mxu0 %v1455_v25  ;;  %v1457_v5 = vmax.f32 %v1287_v18, %v1393_v27 }
 0x24b   :  { %v1458_v37 = vmax.f32 %v1289_v23, %v1394_v31  ;;  %v1754_v4 = vadd.f32 %v1753_v35, %v3694_v42  ;;  %v1295_v38 = vadd.f32 %v1294_v36, %v3697_v43  ;;  %v1755_v39 = vpop.f32.mrb[109].mxu1  ;;  %2408 = vmatmul.mubr.f32.gmra.mrb[168].mxu1 %v1916_v29  ;;  %v1918_v45 = vmax.f32 %v1748_v22, %v1854_v30 }
 0x24c   :  { %v1919_v40 = vmax.f32 %v1750_v28, %v1855_v33  ;;  %v1395_v6 = vmul.f32 0.01, %v1293_v34  ;;  %v1756_v7 = vadd.f32 %v1755_v39, %v3700_v44 }
 0x24d   :  { %v1856_v46 = vmul.f32 0.01, %v1754_v4  ;;  %v1396_v47 = vmul.f32 0.01, %v1295_v38  ;;  %v1298_v48 = vpop.f32.mrb[110].mxu0  ;;  %2148 = vmatprep.mubr.f32.mxu0 %v1458_v37 }
 0x24e   :  { %v1857_v49 = vmul.f32 0.01, %v1756_v7  ;;  %v1299_v50 = vadd.f32 %v1298_v48, %v3691_v41  ;;  %v1759_v51 = vpop.f32.mrb[110].mxu1  ;;  %2412 = vmatprep.mubr.f32.mxu1 %v1919_v40  ;;  %v1300_v52 = vpop.f32.mrb[111].mxu0  ;;  %2149 = vmatmul.mubr.f32.gmra.mrb[170].mxu0 %v1457_v5  ;;  %v1459_v56 = vmax.f32 %v1293_v34, %v1395_v6 }
 0x24f   :  { %v1460_v63 = vmax.f32 %v1295_v38, %v1396_v47  ;;  %v1760_v53 = vadd.f32 %v1759_v51, %v3694_v42  ;;  %v1301_v54 = vadd.f32 %v1300_v52, %v3697_v43  ;;  %v1761_v55 = vpop.f32.mrb[111].mxu1  ;;  %2413 = vmatmul.mubr.f32.gmra.mrb[170].mxu1 %v1918_v45  ;;  %v1920_v60 = vmax.f32 %v1754_v4, %v1856_v46 }
 0x250   :  { %v1921_v3 = vmax.f32 %v1756_v7, %v1857_v49  ;;  %v1397_v57 = vmul.f32 0.01, %v1299_v50  ;;  %v1762_v58 = vadd.f32 %v1761_v55, %v3700_v44 }
 0x251   :  { %v1858_v59 = vmul.f32 0.01, %v1760_v53  ;;  %v1398_v61 = vmul.f32 0.01, %v1301_v54  ;;  %v1304_v62 = vpop.f32.mrb[112].mxu0  ;;  %2153 = vmatprep.mubr.f32.mxu0 %v1460_v63 }
 0x252   :  { %v1859_v1 = vmul.f32 0.01, %v1762_v58  ;;  %v1305_v2 = vadd.f32 %v1304_v62, %v3691_v41  ;;  %v1765_v0 = vpop.f32.mrb[112].mxu1  ;;  %2417 = vmatprep.mubr.f32.mxu1 %v1921_v3  ;;  %v1306_v8 = vpop.f32.mrb[113].mxu0  ;;  %2154 = vmatmul.mubr.f32.gmra.mrb[172].mxu0 %v1459_v56  ;;  %v1461_v13 = vmax.f32 %v1299_v50, %v1397_v57 }
 0x253   :  { %v1462_v9 = vmax.f32 %v1301_v54, %v1398_v61  ;;  %v1766_v10 = vadd.f32 %v1765_v0, %v3694_v42  ;;  %v1307_v11 = vadd.f32 %v1306_v8, %v3697_v43  ;;  %v1767_v12 = vpop.f32.mrb[113].mxu1  ;;  %2418 = vmatmul.mubr.f32.gmra.mrb[172].mxu1 %v1920_v60  ;;  %v1922_v17 = vmax.f32 %v1760_v53, %v1858_v59 }
 0x254   :  { %v1923_v14 = vmax.f32 %v1762_v58, %v1859_v1  ;;  %v1399_v15 = vmul.f32 0.01, %v1305_v2  ;;  %v1768_v16 = vadd.f32 %v1767_v12, %v3700_v44 }
 0x255   :  { %v1860_v18 = vmul.f32 0.01, %v1766_v10  ;;  %v1400_v19 = vmul.f32 0.01, %v1307_v11  ;;  %v1310_v20 = vpop.f32.mrb[114].mxu0  ;;  %2158 = vmatprep.mubr.f32.mxu0 %v1462_v9 }
 0x256   :  { %v1861_v21 = vmul.f32 0.01, %v1768_v16  ;;  %v1311_v22 = vadd.f32 %v1310_v20, %v3691_v41  ;;  %v1771_v23 = vpop.f32.mrb[114].mxu1  ;;  %2422 = vmatprep.mubr.f32.mxu1 %v1923_v14  ;;  %v1312_v24 = vpop.f32.mrb[115].mxu0  ;;  %2159 = vmatmul.mubr.f32.gmra.mrb[174].mxu0 %v1461_v13  ;;  %v1463_v29 = vmax.f32 %v1305_v2, %v1399_v15 }
 0x257   :  { %v1464_v25 = vmax.f32 %v1307_v11, %v1400_v19  ;;  %v1772_v26 = vadd.f32 %v1771_v23, %v3694_v42  ;;  %v1313_v27 = vadd.f32 %v1312_v24, %v3697_v43  ;;  %v1773_v28 = vpop.f32.mrb[115].mxu1  ;;  %2423 = vmatmul.mubr.f32.gmra.mrb[174].mxu1 %v1922_v17  ;;  %v1924_v33 = vmax.f32 %v1766_v10, %v1860_v18 }
 0x258   :  { %v1925_v30 = vmax.f32 %v1768_v16, %v1861_v21  ;;  %v1401_v31 = vmul.f32 0.01, %v1311_v22  ;;  %v1774_v32 = vadd.f32 %v1773_v28, %v3700_v44 }
 0x259   :  { %v1862_v34 = vmul.f32 0.01, %v1772_v26  ;;  %v1402_v35 = vmul.f32 0.01, %v1313_v27  ;;  %v1316_v36 = vpop.f32.mrb[116].mxu0  ;;  %2163 = vmatprep.mubr.f32.mxu0 %v1464_v25 }
 0x25a   :  { %v1863_v37 = vmul.f32 0.01, %v1774_v32  ;;  %v1317_v4 = vadd.f32 %v1316_v36, %v3691_v41  ;;  %v1777_v38 = vpop.f32.mrb[116].mxu1  ;;  %2427 = vmatprep.mubr.f32.mxu1 %v1925_v30  ;;  %v1318_v39 = vpop.f32.mrb[117].mxu0  ;;  %2164 = vmatmul.mubr.f32.gmra.mrb[176].mxu0 %v1463_v29  ;;  %v1465_v45 = vmax.f32 %v1311_v22, %v1401_v31 }
 0x25b   :  { %v1466_v5 = vmax.f32 %v1313_v27, %v1402_v35  ;;  %v1778_v40 = vadd.f32 %v1777_v38, %v3694_v42  ;;  %v1319_v6 = vadd.f32 %v1318_v39, %v3697_v43  ;;  %v1779_v7 = vpop.f32.mrb[117].mxu1  ;;  %2428 = vmatmul.mubr.f32.gmra.mrb[176].mxu1 %v1924_v33  ;;  %v1926_v49 = vmax.f32 %v1772_v26, %v1862_v34 }
 0x25c   :  { %v1927_v46 = vmax.f32 %v1774_v32, %v1863_v37  ;;  %v1403_v47 = vmul.f32 0.01, %v1317_v4  ;;  %v1780_v48 = vadd.f32 %v1779_v7, %v3700_v44 }
 0x25d   :  { %v1864_v50 = vmul.f32 0.01, %v1778_v40  ;;  %v1404_v51 = vmul.f32 0.01, %v1319_v6  ;;  %v1322_v52 = vpop.f32.mrb[118].mxu0  ;;  %2168 = vmatprep.mubr.f32.mxu0 %v1466_v5 }
 0x25e   :  { %v1865_v63 = vmul.f32 0.01, %v1780_v48  ;;  %v1323_v53 = vadd.f32 %v1322_v52, %v3691_v41  ;;  %v1783_v54 = vpop.f32.mrb[118].mxu1  ;;  %2432 = vmatprep.mubr.f32.mxu1 %v1927_v46  ;;  %v1324_v55 = vpop.f32.mrb[119].mxu0  ;;  %2169 = vmatmul.mubr.f32.gmra.mrb[178].mxu0 %v1465_v45  ;;  %v1467_v60 = vmax.f32 %v1317_v4, %v1403_v47 }
 0x25f   :  { %v1468_v56 = vmax.f32 %v1319_v6, %v1404_v51  ;;  %v1784_v3 = vadd.f32 %v1783_v54, %v3694_v42  ;;  %v1325_v57 = vadd.f32 %v1324_v55, %v3697_v43  ;;  %v1785_v58 = vpop.f32.mrb[119].mxu1  ;;  %2433 = vmatmul.mubr.f32.gmra.mrb[178].mxu1 %v1926_v49  ;;  %v1928_v1 = vmax.f32 %v1778_v40, %v1864_v50 }
 0x260   :  { %v1929_v59 = vmax.f32 %v1780_v48, %v1865_v63  ;;  %v1405_v61 = vmul.f32 0.01, %v1323_v53  ;;  %v1786_v62 = vadd.f32 %v1785_v58, %v3700_v44 }
 0x261   :  { %v1866_v2 = vmul.f32 0.01, %v1784_v3  ;;  %v1406_v0 = vmul.f32 0.01, %v1325_v57  ;;  %v1328_v8 = vpop.f32.mrb[120].mxu0  ;;  %2173 = vmatprep.mubr.f32.mxu0 %v1468_v56 }
 0x262   :  { %v1867_v9 = vmul.f32 0.01, %v1786_v62  ;;  %v1329_v10 = vadd.f32 %v1328_v8, %v3691_v41  ;;  %v1789_v11 = vpop.f32.mrb[120].mxu1  ;;  %2437 = vmatprep.mubr.f32.mxu1 %v1929_v59  ;;  %v1330_v12 = vpop.f32.mrb[121].mxu0  ;;  %2174 = vmatmul.mubr.f32.gmra.mrb[180].mxu0 %v1467_v60  ;;  %v1469_v17 = vmax.f32 %v1323_v53, %v1405_v61 }
 0x263   :  { %v1470_v13 = vmax.f32 %v1325_v57, %v1406_v0  ;;  %v1790_v14 = vadd.f32 %v1789_v11, %v3694_v42  ;;  %v1331_v15 = vadd.f32 %v1330_v12, %v3697_v43  ;;  %v1791_v16 = vpop.f32.mrb[121].mxu1  ;;  %2438 = vmatmul.mubr.f32.gmra.mrb[180].mxu1 %v1928_v1  ;;  %v1930_v21 = vmax.f32 %v1784_v3, %v1866_v2 }
 0x264   :  { %v1931_v18 = vmax.f32 %v1786_v62, %v1867_v9  ;;  %v1407_v19 = vmul.f32 0.01, %v1329_v10  ;;  %v1792_v20 = vadd.f32 %v1791_v16, %v3700_v44 }
 0x265   :  { %v1868_v22 = vmul.f32 0.01, %v1790_v14  ;;  %v1408_v23 = vmul.f32 0.01, %v1331_v15  ;;  %v1334_v24 = vpop.f32.mrb[122].mxu0  ;;  %2178 = vmatprep.mubr.f32.mxu0 %v1470_v13 }
 0x266   :  { %v1869_v25 = vmul.f32 0.01, %v1792_v20  ;;  %v1335_v26 = vadd.f32 %v1334_v24, %v3691_v41  ;;  %v1795_v27 = vpop.f32.mrb[122].mxu1  ;;  %2442 = vmatprep.mubr.f32.mxu1 %v1931_v18  ;;  %v1336_v28 = vpop.f32.mrb[123].mxu0  ;;  %2179 = vmatmul.mubr.f32.gmra.mrb[182].mxu0 %v1469_v17  ;;  %v1471_v33 = vmax.f32 %v1329_v10, %v1407_v19 }
 0x267   :  { %v1472_v29 = vmax.f32 %v1331_v15, %v1408_v23  ;;  %v1796_v30 = vadd.f32 %v1795_v27, %v3694_v42  ;;  %v1337_v31 = vadd.f32 %v1336_v28, %v3697_v43  ;;  %v1797_v32 = vpop.f32.mrb[123].mxu1  ;;  %2443 = vmatmul.mubr.f32.gmra.mrb[182].mxu1 %v1930_v21  ;;  %v1932_v37 = vmax.f32 %v1790_v14, %v1868_v22 }
 0x268   :  { %v1933_v34 = vmax.f32 %v1792_v20, %v1869_v25  ;;  %v1409_v35 = vmul.f32 0.01, %v1335_v26  ;;  %v1798_v36 = vadd.f32 %v1797_v32, %v3700_v44 }
 0x269   :  { %v1870_v4 = vmul.f32 0.01, %v1796_v30  ;;  %v1410_v38 = vmul.f32 0.01, %v1337_v31  ;;  %v1340_v39 = vpop.f32.mrb[124].mxu0  ;;  %2183 = vmatprep.mubr.f32.mxu0 %v1472_v29 }
 0x26a   :  { %v1871_v5 = vmul.f32 0.01, %v1798_v36  ;;  %v1341_v40 = vadd.f32 %v1340_v39, %v3691_v41  ;;  %v1801_v6 = vpop.f32.mrb[124].mxu1  ;;  %2447 = vmatprep.mubr.f32.mxu1 %v1933_v34  ;;  %v1342_v7 = vpop.f32.mrb[125].mxu0  ;;  %2184 = vmatmul.mubr.f32.gmra.mrb[184].mxu0 %v1471_v33  ;;  %v1473_v49 = vmax.f32 %v1335_v26, %v1409_v35 }
 0x26b   :  { %v1474_v45 = vmax.f32 %v1337_v31, %v1410_v38  ;;  %v1802_v46 = vadd.f32 %v1801_v6, %v3694_v42  ;;  %v1343_v47 = vadd.f32 %v1342_v7, %v3697_v43  ;;  %v1803_v48 = vpop.f32.mrb[125].mxu1  ;;  %2448 = vmatmul.mubr.f32.gmra.mrb[184].mxu1 %v1932_v37  ;;  %v1934_v63 = vmax.f32 %v1796_v30, %v1870_v4 }
 0x26c   :  { %v1935_v50 = vmax.f32 %v1798_v36, %v1871_v5  ;;  %v1411_v51 = vmul.f32 0.01, %v1341_v40  ;;  %v1804_v52 = vadd.f32 %v1803_v48, %v3700_v44 }
 0x26d   :  { %v1872_v53 = vmul.f32 0.01, %v1802_v46  ;;  %v1412_v54 = vmul.f32 0.01, %v1343_v47  ;;  %v1346_v55 = vpop.f32.mrb[126].mxu0  ;;  %2188 = vmatprep.mubr.f32.mxu0 %v1474_v45 }
 0x26e   :  { %v1873_v56 = vmul.f32 0.01, %v1804_v52  ;;  %v1347_v3 = vadd.f32 %v1346_v55, %v3691_v41  ;;  %v1807_v57 = vpop.f32.mrb[126].mxu1  ;;  %2452 = vmatprep.mubr.f32.mxu1 %v1935_v50  ;;  %v1348_v58 = vpop.f32.mrb[127].mxu0  ;;  %2189 = vmatmul.mubr.f32.gmra.mrb[186].mxu0 %v1473_v49  ;;  %v1475_v1 = vmax.f32 %v1341_v40, %v1411_v51 }
 0x26f   :  { %v1476_v60 = vmax.f32 %v1343_v47, %v1412_v54  ;;  %v1808_v59 = vadd.f32 %v1807_v57, %v3694_v42  ;;  %v1349_v61 = vadd.f32 %v1348_v58, %v3697_v43  ;;  %v1809_v62 = vpop.f32.mrb[127].mxu1  ;;  %2453 = vmatmul.mubr.f32.gmra.mrb[186].mxu1 %v1934_v63  ;;  %v1936_v9 = vmax.f32 %v1802_v46, %v1872_v53  ;;  %v3833_v43 = vld [vmem:[%s4104_s8] ss:$0 sm:$0xff] }
 0x270   :  { %v1937_v2 = vmax.f32 %v1804_v52, %v1873_v56  ;;  %v1413_v0 = vmul.f32 0.01, %v1347_v3  ;;  %v1810_v8 = vadd.f32 %v1809_v62, %v3700_v44  ;;  %v3838_v44 = vld [vmem:[%s4106_s10] ss:$0 sm:$0xff] }
 0x271   :  { %v1874_v10 = vmul.f32 0.01, %v1808_v59  ;;  %v1414_v11 = vmul.f32 0.01, %v1349_v61  ;;  %2193 = vmatprep.mubr.f32.mxu0 %v1476_v60 }
 0x272   :  { %v1875_v41 = vmul.f32 0.01, %v1810_v8  ;;  %2457 = vmatprep.mubr.f32.mxu1 %v1937_v2  ;;  %2194 = vmatmul.mubr.f32.gmra.mrb[188].mxu0 %v1475_v1  ;;  %v1477_v13 = vmax.f32 %v1347_v3, %v1413_v0 }
 0x273   :  { %v1478_v12 = vmax.f32 %v1349_v61, %v1414_v11  ;;  %2458 = vmatmul.mubr.f32.gmra.mrb[188].mxu1 %v1936_v9  ;;  %v1938_v14 = vmax.f32 %v1808_v59, %v1874_v10 }
 0x274   :  { %v1939_v42 = vmax.f32 %v1810_v8, %v1875_v41 }
 0x275   :  { %2198 = vmatprep.mubr.f32.mxu0 %v1478_v12 }
 0x276   :  { %2462 = vmatprep.mubr.f32.mxu1 %v1939_v42  ;;  %2199 = vmatmul.mubr.f32.gmra.mrb[190].mxu0 %v1477_v13 }
 0x277   :  { %2463 = vmatmul.mubr.f32.gmra.mrb[190].mxu1 %v1938_v14 }
 0x2cd   :  { %v2045_v15 = vpop.f32.mrb[128].mxu0 }
 0x2ce   :  { %v2046_v16 = vadd.f32 %v3833_v43, %v2045_v15  ;;  %v2309_v17 = vpop.f32.mrb[128].mxu1  ;;  %v2047_v18 = vpop.f32.mrb[129].mxu0 }
 0x2cf   :  { %v2310_v19 = vadd.f32 %v3838_v44, %v2309_v17  ;;  %v2311_v20 = vpop.f32.mrb[129].mxu1 }
 0x2d0   :  { %2468 = vst [vmem:[%s4107_s11] sm:$0xff] %v2046_v16 }
 0x2d1   :  { %2500 = vst [vmem:[%s4108_s12] sm:$0xff] %v2310_v19  ;;  %v2050_v21 = vpop.f32.mrb[130].mxu0 }
 0x2d2   :  { %v2051_v22 = vadd.f32 %v3833_v43, %v2050_v21  ;;  %v2314_v23 = vpop.f32.mrb[130].mxu1  ;;  %v2052_v24 = vpop.f32.mrb[131].mxu0 }
 0x2d3   :  { %v2315_v25 = vadd.f32 %v3838_v44, %v2314_v23  ;;  %v2316_v26 = vpop.f32.mrb[131].mxu1 }
 0x2d4   :  { %2469 = vst [vmem:[%s4107_s11 + $0x8] sm:$0xff] %v2051_v22 }
 0x2d5   :  { %2501 = vst [vmem:[%s4108_s12 + $0x8] sm:$0xff] %v2315_v25  ;;  %v2055_v27 = vpop.f32.mrb[132].mxu0 }
 0x2d6   :  { %v2056_v28 = vadd.f32 %v3833_v43, %v2055_v27  ;;  %v2319_v29 = vpop.f32.mrb[132].mxu1  ;;  %v2057_v30 = vpop.f32.mrb[133].mxu0 }
 0x2d7   :  { %v2320_v31 = vadd.f32 %v3838_v44, %v2319_v29  ;;  %v2321_v32 = vpop.f32.mrb[133].mxu1 }
 0x2d8   :  { %2470 = vst [vmem:[%s4107_s11 + $0x10] sm:$0xff] %v2056_v28 }
 0x2d9   :  { %2502 = vst [vmem:[%s4108_s12 + $0x10] sm:$0xff] %v2320_v31  ;;  %v2060_v33 = vpop.f32.mrb[134].mxu0 }
 0x2da   :  { %v2061_v34 = vadd.f32 %v3833_v43, %v2060_v33  ;;  %v2324_v35 = vpop.f32.mrb[134].mxu1  ;;  %v2062_v36 = vpop.f32.mrb[135].mxu0 }
 0x2db   :  { %v2325_v37 = vadd.f32 %v3838_v44, %v2324_v35  ;;  %v2326_v4 = vpop.f32.mrb[135].mxu1 }
 0x2dc   :  { %2471 = vst [vmem:[%s4107_s11 + $0x18] sm:$0xff] %v2061_v34 }
 0x2dd   :  { %2503 = vst [vmem:[%s4108_s12 + $0x18] sm:$0xff] %v2325_v37  ;;  %v2065_v38 = vpop.f32.mrb[136].mxu0 }
 0x2de   :  { %v2066_v39 = vadd.f32 %v3833_v43, %v2065_v38  ;;  %v2329_v5 = vpop.f32.mrb[136].mxu1  ;;  %v2067_v40 = vpop.f32.mrb[137].mxu0 }
 0x2df   :  { %v2330_v6 = vadd.f32 %v3838_v44, %v2329_v5  ;;  %v2331_v7 = vpop.f32.mrb[137].mxu1 }
 0x2e0   :  { %2472 = vst [vmem:[%s4107_s11 + $0x20] sm:$0xff] %v2066_v39 }
 0x2e1   :  { %2504 = vst [vmem:[%s4108_s12 + $0x20] sm:$0xff] %v2330_v6  ;;  %v2070_v45 = vpop.f32.mrb[138].mxu0 }
 0x2e2   :  { %v2071_v46 = vadd.f32 %v3833_v43, %v2070_v45  ;;  %v2334_v47 = vpop.f32.mrb[138].mxu1  ;;  %v2072_v48 = vpop.f32.mrb[139].mxu0 }
 0x2e3   :  { %v2335_v49 = vadd.f32 %v3838_v44, %v2334_v47  ;;  %v2336_v50 = vpop.f32.mrb[139].mxu1 }
 0x2e4   :  { %2473 = vst [vmem:[%s4107_s11 + $0x28] sm:$0xff] %v2071_v46 }
 0x2e5   :  { %2505 = vst [vmem:[%s4108_s12 + $0x28] sm:$0xff] %v2335_v49  ;;  %v2075_v51 = vpop.f32.mrb[140].mxu0 }
 0x2e6   :  { %v2076_v52 = vadd.f32 %v3833_v43, %v2075_v51  ;;  %v2339_v63 = vpop.f32.mrb[140].mxu1  ;;  %v2077_v53 = vpop.f32.mrb[141].mxu0 }
 0x2e7   :  { %v2340_v54 = vadd.f32 %v3838_v44, %v2339_v63  ;;  %v2341_v55 = vpop.f32.mrb[141].mxu1 }
 0x2e8   :  { %2474 = vst [vmem:[%s4107_s11 + $0x30] sm:$0xff] %v2076_v52 }
 0x2e9   :  { %2506 = vst [vmem:[%s4108_s12 + $0x30] sm:$0xff] %v2340_v54  ;;  %v2080_v56 = vpop.f32.mrb[142].mxu0 }
 0x2ea   :  { %v2081_v3 = vadd.f32 %v3833_v43, %v2080_v56  ;;  %v2344_v57 = vpop.f32.mrb[142].mxu1  ;;  %v2082_v58 = vpop.f32.mrb[143].mxu0 }
 0x2eb   :  { %v2345_v60 = vadd.f32 %v3838_v44, %v2344_v57  ;;  %v2346_v59 = vpop.f32.mrb[143].mxu1 }
 0x2ec   :  { %2475 = vst [vmem:[%s4107_s11 + $0x38] sm:$0xff] %v2081_v3 }
 0x2ed   :  { %2507 = vst [vmem:[%s4108_s12 + $0x38] sm:$0xff] %v2345_v60  ;;  %v2085_v61 = vpop.f32.mrb[144].mxu0 }
 0x2ee   :  { %v2086_v62 = vadd.f32 %v3833_v43, %v2085_v61  ;;  %v2349_v1 = vpop.f32.mrb[144].mxu1  ;;  %v2087_v2 = vpop.f32.mrb[145].mxu0 }
 0x2ef   :  { %v2350_v0 = vadd.f32 %v3838_v44, %v2349_v1  ;;  %v2351_v8 = vpop.f32.mrb[145].mxu1 }
 0x2f0   :  { %2476 = vst [vmem:[%s4107_s11 + $0x40] sm:$0xff] %v2086_v62 }
 0x2f1   :  { %2508 = vst [vmem:[%s4108_s12 + $0x40] sm:$0xff] %v2350_v0  ;;  %v2090_v9 = vpop.f32.mrb[146].mxu0 }
 0x2f2   :  { %v2091_v10 = vadd.f32 %v3833_v43, %v2090_v9  ;;  %v2354_v11 = vpop.f32.mrb[146].mxu1  ;;  %v2092_v41 = vpop.f32.mrb[147].mxu0 }
 0x2f3   :  { %v2355_v12 = vadd.f32 %v3838_v44, %v2354_v11  ;;  %v2356_v13 = vpop.f32.mrb[147].mxu1 }
 0x2f4   :  { %2477 = vst [vmem:[%s4107_s11 + $0x48] sm:$0xff] %v2091_v10 }
 0x2f5   :  { %2509 = vst [vmem:[%s4108_s12 + $0x48] sm:$0xff] %v2355_v12  ;;  %v2095_v42 = vpop.f32.mrb[148].mxu0 }
 0x2f6   :  { %v2096_v14 = vadd.f32 %v3833_v43, %v2095_v42  ;;  %v2359_v15 = vpop.f32.mrb[148].mxu1  ;;  %v2097_v16 = vpop.f32.mrb[149].mxu0 }
 0x2f7   :  { %v2360_v17 = vadd.f32 %v3838_v44, %v2359_v15  ;;  %v2361_v18 = vpop.f32.mrb[149].mxu1 }
 0x2f8   :  { %2478 = vst [vmem:[%s4107_s11 + $0x50] sm:$0xff] %v2096_v14 }
 0x2f9   :  { %2510 = vst [vmem:[%s4108_s12 + $0x50] sm:$0xff] %v2360_v17  ;;  %v2100_v19 = vpop.f32.mrb[150].mxu0 }
 0x2fa   :  { %v2101_v20 = vadd.f32 %v3833_v43, %v2100_v19  ;;  %v2364_v21 = vpop.f32.mrb[150].mxu1  ;;  %v2102_v22 = vpop.f32.mrb[151].mxu0 }
 0x2fb   :  { %v2365_v23 = vadd.f32 %v3838_v44, %v2364_v21  ;;  %v2366_v24 = vpop.f32.mrb[151].mxu1 }
 0x2fc   :  { %2479 = vst [vmem:[%s4107_s11 + $0x58] sm:$0xff] %v2101_v20 }
 0x2fd   :  { %2511 = vst [vmem:[%s4108_s12 + $0x58] sm:$0xff] %v2365_v23  ;;  %v2105_v25 = vpop.f32.mrb[152].mxu0 }
 0x2fe   :  { %v2106_v26 = vadd.f32 %v3833_v43, %v2105_v25  ;;  %v2369_v27 = vpop.f32.mrb[152].mxu1  ;;  %v2107_v28 = vpop.f32.mrb[153].mxu0 }
 0x2ff   :  { %v2370_v29 = vadd.f32 %v3838_v44, %v2369_v27  ;;  %v2371_v30 = vpop.f32.mrb[153].mxu1 }
 0x300   :  { %2480 = vst [vmem:[%s4107_s11 + $0x60] sm:$0xff] %v2106_v26 }
 0x301   :  { %2512 = vst [vmem:[%s4108_s12 + $0x60] sm:$0xff] %v2370_v29  ;;  %v2110_v31 = vpop.f32.mrb[154].mxu0 }
 0x302   :  { %v2111_v32 = vadd.f32 %v3833_v43, %v2110_v31  ;;  %v2374_v33 = vpop.f32.mrb[154].mxu1  ;;  %v2112_v34 = vpop.f32.mrb[155].mxu0 }
 0x303   :  { %v2375_v35 = vadd.f32 %v3838_v44, %v2374_v33  ;;  %v2376_v36 = vpop.f32.mrb[155].mxu1 }
 0x304   :  { %2481 = vst [vmem:[%s4107_s11 + $0x68] sm:$0xff] %v2111_v32 }
 0x305   :  { %2513 = vst [vmem:[%s4108_s12 + $0x68] sm:$0xff] %v2375_v35  ;;  %v2115_v37 = vpop.f32.mrb[156].mxu0 }
 0x306   :  { %v2116_v4 = vadd.f32 %v3833_v43, %v2115_v37  ;;  %v2379_v38 = vpop.f32.mrb[156].mxu1  ;;  %v2117_v39 = vpop.f32.mrb[157].mxu0 }
 0x307   :  { %v2380_v5 = vadd.f32 %v3838_v44, %v2379_v38  ;;  %v2381_v40 = vpop.f32.mrb[157].mxu1 }
 0x308   :  { %2482 = vst [vmem:[%s4107_s11 + $0x70] sm:$0xff] %v2116_v4 }
 0x309   :  { %2514 = vst [vmem:[%s4108_s12 + $0x70] sm:$0xff] %v2380_v5  ;;  %v2120_v6 = vpop.f32.mrb[158].mxu0 }
 0x30a   :  { %v2121_v7 = vadd.f32 %v3833_v43, %v2120_v6  ;;  %v2384_v45 = vpop.f32.mrb[158].mxu1  ;;  %v2122_v46 = vpop.f32.mrb[159].mxu0 }
 0x30b   :  { %v2385_v47 = vadd.f32 %v3838_v44, %v2384_v45  ;;  %v2386_v48 = vpop.f32.mrb[159].mxu1 }
 0x30c   :  { %2483 = vst [vmem:[%s4107_s11 + $0x78] sm:$0xff] %v2121_v7 }
 0x30d   :  { %2515 = vst [vmem:[%s4108_s12 + $0x78] sm:$0xff] %v2385_v47  ;;  %v2125_v49 = vpop.f32.mrb[160].mxu0 }
 0x30e   :  { %v2126_v50 = vadd.f32 %v3833_v43, %v2125_v49  ;;  %v2389_v51 = vpop.f32.mrb[160].mxu1  ;;  %v2127_v52 = vpop.f32.mrb[161].mxu0 }
 0x30f   :  { %v2390_v63 = vadd.f32 %v3838_v44, %v2389_v51  ;;  %v2391_v53 = vpop.f32.mrb[161].mxu1 }
 0x310   :  { %2484 = vst [vmem:[%s4107_s11 + $0x80] sm:$0xff] %v2126_v50 }
 0x311   :  { %2516 = vst [vmem:[%s4108_s12 + $0x80] sm:$0xff] %v2390_v63  ;;  %v2130_v54 = vpop.f32.mrb[162].mxu0 }
 0x312   :  { %v2131_v55 = vadd.f32 %v3833_v43, %v2130_v54  ;;  %v2394_v56 = vpop.f32.mrb[162].mxu1  ;;  %v2132_v3 = vpop.f32.mrb[163].mxu0 }
 0x313   :  { %v2395_v57 = vadd.f32 %v3838_v44, %v2394_v56  ;;  %v2396_v58 = vpop.f32.mrb[163].mxu1 }
 0x314   :  { %2485 = vst [vmem:[%s4107_s11 + $0x88] sm:$0xff] %v2131_v55 }
 0x315   :  { %2517 = vst [vmem:[%s4108_s12 + $0x88] sm:$0xff] %v2395_v57  ;;  %v2135_v60 = vpop.f32.mrb[164].mxu0 }
 0x316   :  { %v2136_v59 = vadd.f32 %v3833_v43, %v2135_v60  ;;  %v2399_v61 = vpop.f32.mrb[164].mxu1  ;;  %v2137_v62 = vpop.f32.mrb[165].mxu0 }
 0x317   :  { %v2400_v1 = vadd.f32 %v3838_v44, %v2399_v61  ;;  %v2401_v2 = vpop.f32.mrb[165].mxu1 }
 0x318   :  { %2486 = vst [vmem:[%s4107_s11 + $0x90] sm:$0xff] %v2136_v59 }
 0x319   :  { %2518 = vst [vmem:[%s4108_s12 + $0x90] sm:$0xff] %v2400_v1  ;;  %v2140_v0 = vpop.f32.mrb[166].mxu0 }
 0x31a   :  { %v2141_v8 = vadd.f32 %v3833_v43, %v2140_v0  ;;  %v2404_v9 = vpop.f32.mrb[166].mxu1  ;;  %v2142_v10 = vpop.f32.mrb[167].mxu0 }
 0x31b   :  { %v2405_v11 = vadd.f32 %v3838_v44, %v2404_v9  ;;  %v2406_v41 = vpop.f32.mrb[167].mxu1 }
 0x31c   :  { %2487 = vst [vmem:[%s4107_s11 + $0x98] sm:$0xff] %v2141_v8 }
 0x31d   :  { %2519 = vst [vmem:[%s4108_s12 + $0x98] sm:$0xff] %v2405_v11  ;;  %v2145_v12 = vpop.f32.mrb[168].mxu0 }
 0x31e   :  { %v2146_v13 = vadd.f32 %v3833_v43, %v2145_v12  ;;  %v2409_v42 = vpop.f32.mrb[168].mxu1  ;;  %v2147_v14 = vpop.f32.mrb[169].mxu0 }
 0x31f   :  { %v2410_v15 = vadd.f32 %v3838_v44, %v2409_v42  ;;  %v2411_v16 = vpop.f32.mrb[169].mxu1 }
 0x320   :  { %2488 = vst [vmem:[%s4107_s11 + $0xa0] sm:$0xff] %v2146_v13 }
 0x321   :  { %2520 = vst [vmem:[%s4108_s12 + $0xa0] sm:$0xff] %v2410_v15  ;;  %v2150_v17 = vpop.f32.mrb[170].mxu0 }
 0x322   :  { %v2151_v18 = vadd.f32 %v3833_v43, %v2150_v17  ;;  %v2414_v19 = vpop.f32.mrb[170].mxu1  ;;  %v2152_v20 = vpop.f32.mrb[171].mxu0 }
 0x323   :  { %v2415_v21 = vadd.f32 %v3838_v44, %v2414_v19  ;;  %v2416_v22 = vpop.f32.mrb[171].mxu1 }
 0x324   :  { %2489 = vst [vmem:[%s4107_s11 + $0xa8] sm:$0xff] %v2151_v18 }
 0x325   :  { %2521 = vst [vmem:[%s4108_s12 + $0xa8] sm:$0xff] %v2415_v21  ;;  %v2155_v23 = vpop.f32.mrb[172].mxu0 }
 0x326   :  { %v2156_v24 = vadd.f32 %v3833_v43, %v2155_v23  ;;  %v2419_v25 = vpop.f32.mrb[172].mxu1  ;;  %v2157_v26 = vpop.f32.mrb[173].mxu0 }
 0x327   :  { %v2420_v27 = vadd.f32 %v3838_v44, %v2419_v25  ;;  %v2421_v28 = vpop.f32.mrb[173].mxu1 }
 0x328   :  { %2490 = vst [vmem:[%s4107_s11 + $0xb0] sm:$0xff] %v2156_v24 }
 0x329   :  { %2522 = vst [vmem:[%s4108_s12 + $0xb0] sm:$0xff] %v2420_v27  ;;  %v2160_v29 = vpop.f32.mrb[174].mxu0 }
 0x32a   :  { %v2161_v30 = vadd.f32 %v3833_v43, %v2160_v29  ;;  %v2424_v31 = vpop.f32.mrb[174].mxu1  ;;  %v2162_v32 = vpop.f32.mrb[175].mxu0 }
 0x32b   :  { %v2425_v33 = vadd.f32 %v3838_v44, %v2424_v31  ;;  %v2426_v34 = vpop.f32.mrb[175].mxu1 }
 0x32c   :  { %2491 = vst [vmem:[%s4107_s11 + $0xb8] sm:$0xff] %v2161_v30 }
 0x32d   :  { %2523 = vst [vmem:[%s4108_s12 + $0xb8] sm:$0xff] %v2425_v33  ;;  %v2165_v35 = vpop.f32.mrb[176].mxu0 }
 0x32e   :  { %v2166_v36 = vadd.f32 %v3833_v43, %v2165_v35  ;;  %v2429_v37 = vpop.f32.mrb[176].mxu1  ;;  %v2167_v4 = vpop.f32.mrb[177].mxu0 }
 0x32f   :  { %v2430_v38 = vadd.f32 %v3838_v44, %v2429_v37  ;;  %v2431_v39 = vpop.f32.mrb[177].mxu1 }
 0x330   :  { %2492 = vst [vmem:[%s4107_s11 + $0xc0] sm:$0xff] %v2166_v36 }
 0x331   :  { %2524 = vst [vmem:[%s4108_s12 + $0xc0] sm:$0xff] %v2430_v38  ;;  %v2170_v5 = vpop.f32.mrb[178].mxu0 }
 0x332   :  { %v2171_v40 = vadd.f32 %v3833_v43, %v2170_v5  ;;  %v2434_v6 = vpop.f32.mrb[178].mxu1  ;;  %v2172_v7 = vpop.f32.mrb[179].mxu0 }
 0x333   :  { %v2435_v45 = vadd.f32 %v3838_v44, %v2434_v6  ;;  %v2436_v46 = vpop.f32.mrb[179].mxu1 }
 0x334   :  { %2493 = vst [vmem:[%s4107_s11 + $0xc8] sm:$0xff] %v2171_v40 }
 0x335   :  { %2525 = vst [vmem:[%s4108_s12 + $0xc8] sm:$0xff] %v2435_v45  ;;  %v2175_v47 = vpop.f32.mrb[180].mxu0 }
 0x336   :  { %v2176_v48 = vadd.f32 %v3833_v43, %v2175_v47  ;;  %v2439_v49 = vpop.f32.mrb[180].mxu1  ;;  %v2177_v50 = vpop.f32.mrb[181].mxu0 }
 0x337   :  { %v2440_v51 = vadd.f32 %v3838_v44, %v2439_v49  ;;  %v2441_v52 = vpop.f32.mrb[181].mxu1 }
 0x338   :  { %2494 = vst [vmem:[%s4107_s11 + $0xd0] sm:$0xff] %v2176_v48 }
 0x339   :  { %2526 = vst [vmem:[%s4108_s12 + $0xd0] sm:$0xff] %v2440_v51  ;;  %v2180_v63 = vpop.f32.mrb[182].mxu0 }
 0x33a   :  { %v2181_v53 = vadd.f32 %v3833_v43, %v2180_v63  ;;  %v2444_v54 = vpop.f32.mrb[182].mxu1  ;;  %v2182_v55 = vpop.f32.mrb[183].mxu0 }
 0x33b   :  { %v2445_v56 = vadd.f32 %v3838_v44, %v2444_v54  ;;  %v2446_v3 = vpop.f32.mrb[183].mxu1 }
 0x33c   :  { %2495 = vst [vmem:[%s4107_s11 + $0xd8] sm:$0xff] %v2181_v53 }
 0x33d   :  { %2527 = vst [vmem:[%s4108_s12 + $0xd8] sm:$0xff] %v2445_v56  ;;  %v2185_v57 = vpop.f32.mrb[184].mxu0 }
 0x33e   :  { %v2186_v58 = vadd.f32 %v3833_v43, %v2185_v57  ;;  %v2449_v60 = vpop.f32.mrb[184].mxu1  ;;  %v2187_v59 = vpop.f32.mrb[185].mxu0 }
 0x33f   :  { %v2450_v61 = vadd.f32 %v3838_v44, %v2449_v60  ;;  %v2451_v62 = vpop.f32.mrb[185].mxu1 }
 0x340   :  { %2496 = vst [vmem:[%s4107_s11 + $0xe0] sm:$0xff] %v2186_v58 }
 0x341   :  { %2528 = vst [vmem:[%s4108_s12 + $0xe0] sm:$0xff] %v2450_v61  ;;  %v2190_v1 = vpop.f32.mrb[186].mxu0 }
 0x342   :  { %v2191_v2 = vadd.f32 %v3833_v43, %v2190_v1  ;;  %v2454_v0 = vpop.f32.mrb[186].mxu1  ;;  %v2192_v8 = vpop.f32.mrb[187].mxu0 }
 0x343   :  { %v2455_v9 = vadd.f32 %v3838_v44, %v2454_v0  ;;  %v2456_v10 = vpop.f32.mrb[187].mxu1 }
 0x344   :  { %2497 = vst [vmem:[%s4107_s11 + $0xe8] sm:$0xff] %v2191_v2 }
 0x345   :  { %2529 = vst [vmem:[%s4108_s12 + $0xe8] sm:$0xff] %v2455_v9  ;;  %v2195_v11 = vpop.f32.mrb[188].mxu0 }
 0x346   :  { %v2196_v41 = vadd.f32 %v3833_v43, %v2195_v11  ;;  %v2459_v12 = vpop.f32.mrb[188].mxu1  ;;  %v2197_v13 = vpop.f32.mrb[189].mxu0 }
 0x347   :  { %v2460_v42 = vadd.f32 %v3838_v44, %v2459_v12  ;;  %v2461_v14 = vpop.f32.mrb[189].mxu1 }
 0x348   :  { %2498 = vst [vmem:[%s4107_s11 + $0xf0] sm:$0xff] %v2196_v41 }
 0x349   :  { %2530 = vst [vmem:[%s4108_s12 + $0xf0] sm:$0xff] %v2460_v42  ;;  %v2200_v15 = vpop.f32.mrb[190].mxu0 }
 0x34a   :  { %v2201_v16 = vadd.f32 %v3833_v43, %v2200_v15  ;;  %v2464_v17 = vpop.f32.mrb[190].mxu1  ;;  %v2202_v18 = vpop.f32.mrb[191].mxu0 }
 0x34b   :  { %v2465_v19 = vadd.f32 %v3838_v44, %v2464_v17  ;;  %v2466_v20 = vpop.f32.mrb[191].mxu1 }
 0x34c   :  { %2499 = vst [vmem:[%s4107_s11 + $0xf8] sm:$0xff] %v2201_v16 }
 0x34d   :  { %2531 = vst [vmem:[%s4108_s12 + $0xf8] sm:$0xff] %v2465_v19 }
 0x34e   :  { %2540 = vsyncpa [#allocation3], 1 }
 0x34f   :  { %2541 = vsyncpa [#allocation5], 1 }

</bundles_post_ra>
